<compile_context>
chip_gen: v7x
topology: tpu7x:2x2x1
jax: 0.10.0
libtpu: 0.0.40
codegen_flags: <defaults>
</compile_context>

<pallas_src>
import functools

import numpy as np
import jax
import jax.numpy as jnp
from jax.experimental import pallas as pl
from jax.experimental.pallas import tpu as pltpu


_BP = 8   # padded batch-row count inside conv2/fc stages -> all slices 8-aligned


# ----------------------------------------------------------------------------
# Host-side helpers (tiny, layout-only)
# ----------------------------------------------------------------------------
def im2col(x, k, stride, pad):
    """x: [B, C, H, W] -> patches [B*Ho*Wo, C*k*k] (C-major, then kh, kw)."""
    x = jnp.pad(x, ((0, 0), (0, 0), (pad, pad), (pad, pad)))
    B, C, H, W = x.shape
    Ho = (H - k) // stride + 1
    Wo = (W - k) // stride + 1
    cols = []
    for i in range(k):
        for j in range(k):
            cols.append(x[:, :, i:i + stride * Ho:stride, j:j + stride * Wo:stride])
    patches = jnp.stack(cols, axis=2)                                  # [B,C,k*k,Ho,Wo]
    patches = patches.transpose(0, 3, 4, 1, 2).reshape(B * Ho * Wo, C * k * k)
    return patches, Ho, Wo


@functools.lru_cache(maxsize=None)
def _conv2_gather_np(batch):
    """0/1 selection matrices that turn conv1-output rows (b*64 + oh*8 + ow)
    into conv2 im2col taps.  S[kk, o2*_BP + b, b*64 + s1] = 1; padded taps and
    padded batch rows (b >= batch) are all-zero."""
    S = np.zeros((9, 16 * _BP, batch * 64), np.float32)
    for kh in range(3):
        for kw in range(3):
            kk = kh * 3 + kw
            for oh in range(4):
                for ow in range(4):
                    r, c = 2 * oh + kh - 1, 2 * ow + kw - 1
                    if 0 <= r < 8 and 0 <= c < 8:
                        o2 = oh * 4 + ow
                        s1 = r * 8 + c
                        for b in range(batch):
                            S[kk, o2 * _BP + b, b * 64 + s1] = 1.0
    return S


# ----------------------------------------------------------------------------
# Kernel 1: fused DepthEncoder (conv1 + conv2 + fc), grid=(2,) over encoders
# ----------------------------------------------------------------------------
def _dual_encoder_kernel(p1_ref, w1_ref, b1_ref, sel_ref, w2_ref, b2_ref,
                         wfc_ref, bfc_ref, out_ref):
    B = out_ref.shape[0]
    BP = sel_ref.shape[1] // 16

    # conv1: im2col patches (built in the wrapper from the raw 16x16 input)
    h1 = jnp.dot(p1_ref[...], w1_ref[...], preferred_element_type=jnp.float32)
    h1 = jnp.maximum(h1 + b1_ref[...], 0.0).astype(jnp.bfloat16)       # [B*64, 32]

    # conv2: 9 taps, each = (gather conv1 rows via constant 0/1 matrix) @ W2_kk
    acc2 = jnp.broadcast_to(b2_ref[...], (16 * BP, 64))
    for kk in range(9):
        g = jnp.dot(sel_ref[kk], h1, preferred_element_type=jnp.float32)   # [16*BP, 32]
        acc2 = acc2 + jnp.dot(g.astype(jnp.bfloat16), w2_ref[kk],
                              preferred_element_type=jnp.float32)          # [16*BP, 64]
    h2 = jnp.maximum(acc2, 0.0)                                            # rows: (o2, b)

    # fc over the flattened conv2 output: one [BP,64]@[64,128] slab per position
    accf = jnp.broadcast_to(bfc_ref[...], (BP, 128))
    for p in range(16):
        slab = h2[p * BP:(p + 1) * BP, :].astype(jnp.bfloat16)
        accf = accf + jnp.dot(slab, wfc_ref[p], preferred_element_type=jnp.float32)
    out_ref[...] = jnp.maximum(accf, 0.0)[:B, :]


def pallas_dual_encoder(patches, sel, ep):
    _, rows, _ = patches.shape                   # (2, B*64, 16)
    B = rows // 64

    def per_enc(arr):
        n = arr.ndim - 1
        return pl.BlockSpec((None,) + arr.shape[1:], lambda i: (i,) + (0,) * n)

    grid_spec = pltpu.PrefetchScalarGridSpec(
        num_scalar_prefetch=0,
        grid=(2,),
        in_specs=[
            per_enc(patches),
            per_enc(ep["w1"]), per_enc(ep["b1"]),
            pl.BlockSpec(sel.shape, lambda i: (0, 0, 0)),
            per_enc(ep["w2"]), per_enc(ep["b2"]),
            per_enc(ep["wfc"]), per_enc(ep["bfc"]),
        ],
        out_specs=pl.BlockSpec((None, B, 128), lambda i: (i, 0, 0)),
    )
    return pl.pallas_call(
        _dual_encoder_kernel,
        out_shape=jax.ShapeDtypeStruct((2, B, 128), jnp.float32),
        grid_spec=grid_spec,
        compiler_params=pltpu.CompilerParams(dimension_semantics=("parallel",)),
    )(patches, ep["w1"], ep["b1"], sel, ep["w2"], ep["b2"], ep["wfc"], ep["bfc"])


# ----------------------------------------------------------------------------
# Kernel 2: posterior_z + reparameterization + KL-mean + decoder, fully fused
# ----------------------------------------------------------------------------
def _head_kernel(enc_ref, eps_ref, pw1a_ref, pw1b_ref, pb1_ref, pwml_ref, pbml_ref,
                 dw1a_ref, dw1b_ref, db1_ref, dwh_ref, dbh_ref,
                 zmean_ref, zlvar_ref, z_ref, kl_ref, dec_ref, *, eval_mode):
    B, latent = zmean_ref.shape

    obs_e = enc_ref[0].astype(jnp.bfloat16)      # [B, 128]
    nxt_e = enc_ref[1].astype(jnp.bfloat16)

    # posterior_z hidden = ReLU([obs || next] @ W1 + b1), via split weights
    h = jnp.dot(obs_e, pw1a_ref[...], preferred_element_type=jnp.float32)
    h = h + jnp.dot(nxt_e, pw1b_ref[...], preferred_element_type=jnp.float32)
    h = jnp.maximum(h + pb1_ref[...], 0.0).astype(jnp.bfloat16)

    # mean || logvar from one lane-dense [128, 2*latent] matmul
    ml = jnp.dot(h, pwml_ref[...], preferred_element_type=jnp.float32) + pbml_ref[...]
    z_mean = ml[:, :latent]
    z_log_var = ml[:, latent:]
    zmean_ref[...] = z_mean
    zlvar_ref[...] = z_log_var

    # KL mean reduced fully in-kernel to a (1,1) scalar
    kl_elem = -0.5 * (1.0 + z_log_var - z_mean * z_mean - jnp.exp(z_log_var))
    kl_col = jnp.sum(kl_elem, axis=0, keepdims=True)                    # [1, latent]
    kl_ref[...] = jnp.sum(kl_col, axis=1, keepdims=True) * (1.0 / (B * latent))

    # reparameterize (eval mode: use externally drawn N(0,1) sample directly)
    if eval_mode:
        z = eps_ref[...]
    else:
        z = z_mean + jnp.exp(0.5 * z_log_var) * eps_ref[...]
    z_ref[...] = z

    # decoder: hidden = ReLU([obs || z] @ Wd1 + b), then the 6|3|1 heads padded
    # to a single lane-dense 128-wide output.
    hd = jnp.dot(obs_e, dw1a_ref[...], preferred_element_type=jnp.float32)
    hd = hd + jnp.dot(z.astype(jnp.bfloat16), dw1b_ref[...],
                      preferred_element_type=jnp.float32)
    hd = jnp.maximum(hd + db1_ref[...], 0.0).astype(jnp.bfloat16)
    dec_ref[...] = jnp.dot(hd, dwh_ref[...],
                           preferred_element_type=jnp.float32) + dbh_ref[...]


def pallas_head(enc, eps, params, *, eval_mode):
    B = enc.shape[1]
    pz, dec = params["posterior"], params["decoder"]
    latent = pz["wml"].shape[1] // 2
    vmem = pl.BlockSpec(memory_space=pltpu.MemorySpace.VMEM)
    out_shape = (
        jax.ShapeDtypeStruct((B, latent), jnp.float32),   # z_mean
        jax.ShapeDtypeStruct((B, latent), jnp.float32),   # z_log_var
        jax.ShapeDtypeStruct((B, latent), jnp.float32),   # z
        jax.ShapeDtypeStruct((1, 1), jnp.float32),        # mean KL
        jax.ShapeDtypeStruct((B, 128), jnp.float32),      # decoder heads (padded)
    )
    kernel = functools.partial(_head_kernel, eval_mode=eval_mode)
    return pl.pallas_call(
        kernel,
        out_shape=out_shape,
        in_specs=[vmem] * 12,
        out_specs=(vmem,) * 5,
    )(enc, eps,
      pz["w1a"], pz["w1b"], pz["b1"], pz["wml"], pz["bml"],
      dec["w1a"], dec["w1b"], dec["b1"], dec["wh"], dec["bh"])


# ----------------------------------------------------------------------------
# Parameter construction (deterministic, synthetic; weights bf16, biases f32)
# ----------------------------------------------------------------------------
def _init(key, shape, scale=0.05):
    return scale * jax.random.normal(key, shape, dtype=jnp.float32)


def make_params(key):
    ks = iter(jax.random.split(key, 24))
    bf16 = jnp.bfloat16
    enc = {   # leading dim 2: [0] = obs_encoder, [1] = next_obs_encode
        "w1":  _init(next(ks), (2, 16, 32)).astype(bf16),     # 9 taps + 7 padded rows
        "b1":  _init(next(ks), (2, 1, 32)),
        "w2":  _init(next(ks), (2, 9, 32, 64)).astype(bf16),  # per-tap conv2 weights
        "b2":  _init(next(ks), (2, 1, 64)),
        "wfc": _init(next(ks), (2, 16, 64, 128)).astype(bf16),  # per conv2-position fc slab
        "bfc": _init(next(ks), (2, 1, 128)),
    }
    posterior = {
        "w1a": _init(next(ks), (128, 128)).astype(bf16),      # obs_encode half of W1
        "w1b": _init(next(ks), (128, 128)).astype(bf16),      # next_obs_encode half
        "b1":  _init(next(ks), (1, 128)),
        "wml": _init(next(ks), (128, 512)).astype(bf16),      # [:, :256]=mean, [:, 256:]=logvar
        "bml": _init(next(ks), (1, 512)),
    }
    wh = jnp.zeros((128, 128), jnp.float32).at[:, :10].set(_init(next(ks), (128, 10)))
    bh = jnp.zeros((1, 128), jnp.float32).at[:, :10].set(_init(next(ks), (1, 10)))
    decoder = {
        "w1a": _init(next(ks), (128, 128)).astype(bf16),      # obs_encode part
        "w1b": _init(next(ks), (256, 128)).astype(bf16),      # z part
        "b1":  _init(next(ks), (1, 128)),
        "wh":  wh.astype(bf16),                               # cols 0:6 rot | 6:9 point | 9:10 force
        "bh":  bh,
    }
    return {"enc": enc, "posterior": posterior, "decoder": decoder}


# ----------------------------------------------------------------------------
# Forward pass (mirrors TaskCVAEModelBaseline.forward)
# ----------------------------------------------------------------------------
def task_cvae_forward(params, inter_params, obs, next_obs, rng_key, eval=False):
    # NOTE: inter_params is accepted (as in the PyTorch module) but unused here.
    del inter_params
    B = obs.shape[0]
    latent = params["posterior"]["wml"].shape[1] // 2

    if next_obs.ndim == 3:                       # torch.unsqueeze(next_obs, 1)
        next_obs = next_obs[:, None, :, :]

    # conv1 im2col on the raw (tiny) inputs; everything downstream stays in VMEM
    p_obs, _, _ = im2col(obs, 3, 2, 1)           # [B*64, 9]
    p_nxt, _, _ = im2col(next_obs, 3, 2, 1)
    patches = jnp.stack([p_obs, p_nxt], axis=0)                        # [2, B*64, 9]
    patches = jnp.pad(patches, ((0, 0), (0, 0), (0, 16 - patches.shape[-1])))
    patches = patches.astype(jnp.bfloat16)

    sel = jnp.asarray(_conv2_gather_np(B), dtype=jnp.bfloat16)         # [9, 16*_BP, B*64]

    enc = pallas_dual_encoder(patches, sel, params["enc"])             # [2, B, 128]

    if eval:
        # torch.empty((B, 256)).normal_(0, 1) equivalent; reparam skipped.
        eps = jax.random.normal(jax.random.fold_in(rng_key, 1), (B, latent), jnp.float32)
    else:
        eps = jax.random.normal(rng_key, (B, latent), jnp.float32)

    z_mean, z_log_var, z, kl_mean, dec_out = pallas_head(enc, eps, params, eval_mode=eval)

    kl_loss_z = kl_mean[0, 0]                     # torch.mean over all KL elements
    recon_rotations = dec_out[:, :6]
    recon_point = dec_out[:, 6:9]
    recon_force = dec_out[:, 9:10]
    return (kl_loss_z, (z_mean, z_log_var),
            (recon_rotations, recon_point, recon_force), z)


# ----------------------------------------------------------------------------
if __name__ == "__main__":
    B, H, W = 2, 16, 16

    key = jax.random.PRNGKey(0)
    k_obs, k_next, k_inter, k_eps, k_params = jax.random.split(key, 5)

    obs = jax.random.normal(k_obs, (B, 1, H, W), dtype=jnp.float32)      # NCHW depth
    next_obs = jax.random.normal(k_next, (B, H, W), dtype=jnp.float32)   # 3-D -> unsqueeze path
    inter_params = jax.random.normal(k_inter, (B, 7), dtype=jnp.float32) # unused by forward

    params = make_params(k_params)

    fwd = jax.jit(task_cvae_forward, static_argnames=("eval",))
    out = fwd(params, inter_params, obs, next_obs, k_eps, eval=False)
    kl_loss_z, (z_mean, z_log_var), (recon_rot, recon_pt, recon_force), z = out
    jax.block_until_ready(out)

    assert z_mean.shape == (B, 256) and z_log_var.shape == (B, 256)
    assert z.shape == (B, 256)
    assert recon_rot.shape == (B, 6) and recon_pt.shape == (B, 3)
    assert recon_force.shape == (B, 1)
    assert kl_loss_z.shape == ()

    print("KERNEL_OK")
</pallas_src>

<mosaic_0001>
module attributes {stable_mosaic.version = 11 : i64} {
  func.func @_dual_encoder_kernel(%arg0: i32, %arg1: memref<1x128x16xbf16, #tpu.memory_space<vmem>>, %arg2: memref<1x16x32xbf16, #tpu.memory_space<vmem>>, %arg3: memref<1x1x32xf32, #tpu.memory_space<vmem>>, %arg4: memref<9x128x128xbf16, #tpu.memory_space<vmem>>, %arg5: memref<1x9x32x64xbf16, #tpu.memory_space<vmem>>, %arg6: memref<1x1x64xf32, #tpu.memory_space<vmem>>, %arg7: memref<1x16x64x128xbf16, #tpu.memory_space<vmem>>, %arg8: memref<1x1x128xf32, #tpu.memory_space<vmem>>, %arg9: memref<1x2x128xf32, #tpu.memory_space<vmem>>) attributes {dimension_semantics = [#tpu.dimension_semantics<parallel>], iteration_bounds = array<i64: 2>, scalar_prefetch = 0 : i64, scratch_operands = 0 : i64, tpu.core_type = #tpu.core_type<tc>, window_params = [{transform_indices = @transform_0, window_bounds = array<i64: 1, 128, 16>}, {transform_indices = @transform_1, window_bounds = array<i64: 1, 16, 32>}, {transform_indices = @transform_2, window_bounds = array<i64: 1, 1, 32>}, {pipeline_mode = #tpu.pipeline_mode<synchronous>, transform_indices = @transform_3, window_bounds = array<i64: 9, 128, 128>}, {transform_indices = @transform_4, window_bounds = array<i64: 1, 9, 32, 64>}, {transform_indices = @transform_5, window_bounds = array<i64: 1, 1, 64>}, {transform_indices = @transform_6, window_bounds = array<i64: 1, 16, 64, 128>}, {transform_indices = @transform_7, window_bounds = array<i64: 1, 1, 128>}, {transform_indices = @transform_8, window_bounds = array<i64: 1, 2, 128>}]} {
    %c0 = arith.constant 0 : index
    %c0_0 = arith.constant 0 : index
    %c0_1 = arith.constant 0 : index
    %0 = vector.load %arg1[%c0, %c0_0, %c0_1] : memref<1x128x16xbf16, #tpu.memory_space<vmem>>, vector<1x128x16xbf16>
    %1 = vector.shape_cast %0 : vector<1x128x16xbf16> to vector<128x16xbf16>
    %c0_2 = arith.constant 0 : index
    %c0_3 = arith.constant 0 : index
    %c0_4 = arith.constant 0 : index
    %2 = vector.load %arg2[%c0_2, %c0_3, %c0_4] : memref<1x16x32xbf16, #tpu.memory_space<vmem>>, vector<1x16x32xbf16>
    %3 = vector.shape_cast %2 : vector<1x16x32xbf16> to vector<16x32xbf16>
    %cst = arith.constant dense<0.000000e+00> : vector<128x32xf32>
    %4 = tpu.matmul %1, %3, %cst {dimension_numbers = #tpu.dot_dimension_numbers<[1], [0], [0], [1], [0, 0, 1, 1], [], []>} : vector<128x16xbf16>, vector<16x32xbf16>, vector<128x32xf32> -> vector<128x32xf32>
    %c0_5 = arith.constant 0 : index
    %c0_6 = arith.constant 0 : index
    %c0_7 = arith.constant 0 : index
    %5 = vector.load %arg3[%c0_5, %c0_6, %c0_7] : memref<1x1x32xf32, #tpu.memory_space<vmem>>, vector<1x1x32xf32>
    %6 = vector.shape_cast %5 : vector<1x1x32xf32> to vector<1x32xf32>
    %7 = vector.broadcast %6 : vector<1x32xf32> to vector<128x32xf32>
    %8 = arith.addf %4, %7 : vector<128x32xf32>
    %cst_8 = arith.constant 0.000000e+00 : f32
    %9 = vector.broadcast %cst_8 : f32 to vector<128x32xf32>
    %10 = arith.maximumf %8, %9 : vector<128x32xf32>
    %11 = arith.truncf %10 : vector<128x32xf32> to vector<128x32xbf16>
    %c0_9 = arith.constant 0 : index
    %c0_10 = arith.constant 0 : index
    %c0_11 = arith.constant 0 : index
    %12 = vector.load %arg6[%c0_9, %c0_10, %c0_11] : memref<1x1x64xf32, #tpu.memory_space<vmem>>, vector<1x1x64xf32>
    %13 = vector.shape_cast %12 : vector<1x1x64xf32> to vector<1x64xf32>
    %14 = vector.shape_cast %13 : vector<1x64xf32> to vector<1x64xf32>
    %15 = vector.broadcast %14 : vector<1x64xf32> to vector<128x64xf32>
    %c0_12 = arith.constant 0 : index
    %c0_13 = arith.constant 0 : index
    %c0_14 = arith.constant 0 : index
    %16 = vector.load %arg4[%c0_12, %c0_13, %c0_14] : memref<9x128x128xbf16, #tpu.memory_space<vmem>>, vector<1x128x128xbf16>
    %17 = vector.shape_cast %16 : vector<1x128x128xbf16> to vector<128x128xbf16>
    %cst_15 = arith.constant dense<0.000000e+00> : vector<128x32xf32>
    %18 = tpu.matmul %17, %11, %cst_15 {dimension_numbers = #tpu.dot_dimension_numbers<[1], [0], [0], [1], [0, 0, 1, 1], [], []>} : vector<128x128xbf16>, vector<128x32xbf16>, vector<128x32xf32> -> vector<128x32xf32>
    %19 = arith.truncf %18 : vector<128x32xf32> to vector<128x32xbf16>
    %c0_16 = arith.constant 0 : index
    %c0_17 = arith.constant 0 : index
    %c0_18 = arith.constant 0 : index
    %c0_19 = arith.constant 0 : index
    %20 = vector.load %arg5[%c0_16, %c0_17, %c0_18, %c0_19] : memref<1x9x32x64xbf16, #tpu.memory_space<vmem>>, vector<1x1x32x64xbf16>
    %21 = vector.shape_cast %20 : vector<1x1x32x64xbf16> to vector<32x64xbf16>
    %cst_20 = arith.constant dense<0.000000e+00> : vector<128x64xf32>
    %22 = tpu.matmul %19, %21, %cst_20 {dimension_numbers = #tpu.dot_dimension_numbers<[1], [0], [0], [1], [0, 0, 1, 1], [], []>} : vector<128x32xbf16>, vector<32x64xbf16>, vector<128x64xf32> -> vector<128x64xf32>
    %23 = arith.addf %15, %22 : vector<128x64xf32>
    %c1 = arith.constant 1 : index
    %c0_21 = arith.constant 0 : index
    %c0_22 = arith.constant 0 : index
    %24 = vector.load %arg4[%c1, %c0_21, %c0_22] : memref<9x128x128xbf16, #tpu.memory_space<vmem>>, vector<1x128x128xbf16>
    %25 = vector.shape_cast %24 : vector<1x128x128xbf16> to vector<128x128xbf16>
    %cst_23 = arith.constant dense<0.000000e+00> : vector<128x32xf32>
    %26 = tpu.matmul %25, %11, %cst_23 {dimension_numbers = #tpu.dot_dimension_numbers<[1], [0], [0], [1], [0, 0, 1, 1], [], []>} : vector<128x128xbf16>, vector<128x32xbf16>, vector<128x32xf32> -> vector<128x32xf32>
    %27 = arith.truncf %26 : vector<128x32xf32> to vector<128x32xbf16>
    %c0_24 = arith.constant 0 : index
    %c1_25 = arith.constant 1 : index
    %c0_26 = arith.constant 0 : index
    %c0_27 = arith.constant 0 : index
    %28 = vector.load %arg5[%c0_24, %c1_25, %c0_26, %c0_27] : memref<1x9x32x64xbf16, #tpu.memory_space<vmem>>, vector<1x1x32x64xbf16>
    %29 = vector.shape_cast %28 : vector<1x1x32x64xbf16> to vector<32x64xbf16>
    %cst_28 = arith.constant dense<0.000000e+00> : vector<128x64xf32>
    %30 = tpu.matmul %27, %29, %cst_28 {dimension_numbers = #tpu.dot_dimension_numbers<[1], [0], [0], [1], [0, 0, 1, 1], [], []>} : vector<128x32xbf16>, vector<32x64xbf16>, vector<128x64xf32> -> vector<128x64xf32>
    %31 = arith.addf %23, %30 : vector<128x64xf32>
    %c2 = arith.constant 2 : index
    %c0_29 = arith.constant 0 : index
    %c0_30 = arith.constant 0 : index
    %32 = vector.load %arg4[%c2, %c0_29, %c0_30] : memref<9x128x128xbf16, #tpu.memory_space<vmem>>, vector<1x128x128xbf16>
    %33 = vector.shape_cast %32 : vector<1x128x128xbf16> to vector<128x128xbf16>
    %cst_31 = arith.constant dense<0.000000e+00> : vector<128x32xf32>
    %34 = tpu.matmul %33, %11, %cst_31 {dimension_numbers = #tpu.dot_dimension_numbers<[1], [0], [0], [1], [0, 0, 1, 1], [], []>} : vector<128x128xbf16>, vector<128x32xbf16>, vector<128x32xf32> -> vector<128x32xf32>
    %35 = arith.truncf %34 : vector<128x32xf32> to vector<128x32xbf16>
    %c0_32 = arith.constant 0 : index
    %c2_33 = arith.constant 2 : index
    %c0_34 = arith.constant 0 : index
    %c0_35 = arith.constant 0 : index
    %36 = vector.load %arg5[%c0_32, %c2_33, %c0_34, %c0_35] : memref<1x9x32x64xbf16, #tpu.memory_space<vmem>>, vector<1x1x32x64xbf16>
    %37 = vector.shape_cast %36 : vector<1x1x32x64xbf16> to vector<32x64xbf16>
    %cst_36 = arith.constant dense<0.000000e+00> : vector<128x64xf32>
    %38 = tpu.matmul %35, %37, %cst_36 {dimension_numbers = #tpu.dot_dimension_numbers<[1], [0], [0], [1], [0, 0, 1, 1], [], []>} : vector<128x32xbf16>, vector<32x64xbf16>, vector<128x64xf32> -> vector<128x64xf32>
    %39 = arith.addf %31, %38 : vector<128x64xf32>
    %c3 = arith.constant 3 : index
    %c0_37 = arith.constant 0 : index
    %c0_38 = arith.constant 0 : index
    %40 = vector.load %arg4[%c3, %c0_37, %c0_38] : memref<9x128x128xbf16, #tpu.memory_space<vmem>>, vector<1x128x128xbf16>
    %41 = vector.shape_cast %40 : vector<1x128x128xbf16> to vector<128x128xbf16>
    %cst_39 = arith.constant dense<0.000000e+00> : vector<128x32xf32>
    %42 = tpu.matmul %41, %11, %cst_39 {dimension_numbers = #tpu.dot_dimension_numbers<[1], [0], [0], [1], [0, 0, 1, 1], [], []>} : vector<128x128xbf16>, vector<128x32xbf16>, vector<128x32xf32> -> vector<128x32xf32>
    %43 = arith.truncf %42 : vector<128x32xf32> to vector<128x32xbf16>
    %c0_40 = arith.constant 0 : index
    %c3_41 = arith.constant 3 : index
    %c0_42 = arith.constant 0 : index
    %c0_43 = arith.constant 0 : index
    %44 = vector.load %arg5[%c0_40, %c3_41, %c0_42, %c0_43] : memref<1x9x32x64xbf16, #tpu.memory_space<vmem>>, vector<1x1x32x64xbf16>
    %45 = vector.shape_cast %44 : vector<1x1x32x64xbf16> to vector<32x64xbf16>
    %cst_44 = arith.constant dense<0.000000e+00> : vector<128x64xf32>
    %46 = tpu.matmul %43, %45, %cst_44 {dimension_numbers = #tpu.dot_dimension_numbers<[1], [0], [0], [1], [0, 0, 1, 1], [], []>} : vector<128x32xbf16>, vector<32x64xbf16>, vector<128x64xf32> -> vector<128x64xf32>
    %47 = arith.addf %39, %46 : vector<128x64xf32>
    %c4 = arith.constant 4 : index
    %c0_45 = arith.constant 0 : index
    %c0_46 = arith.constant 0 : index
    %48 = vector.load %arg4[%c4, %c0_45, %c0_46] : memref<9x128x128xbf16, #tpu.memory_space<vmem>>, vector<1x128x128xbf16>
    %49 = vector.shape_cast %48 : vector<1x128x128xbf16> to vector<128x128xbf16>
    %cst_47 = arith.constant dense<0.000000e+00> : vector<128x32xf32>
    %50 = tpu.matmul %49, %11, %cst_47 {dimension_numbers = #tpu.dot_dimension_numbers<[1], [0], [0], [1], [0, 0, 1, 1], [], []>} : vector<128x128xbf16>, vector<128x32xbf16>, vector<128x32xf32> -> vector<128x32xf32>
    %51 = arith.truncf %50 : vector<128x32xf32> to vector<128x32xbf16>
    %c0_48 = arith.constant 0 : index
    %c4_49 = arith.constant 4 : index
    %c0_50 = arith.constant 0 : index
    %c0_51 = arith.constant 0 : index
    %52 = vector.load %arg5[%c0_48, %c4_49, %c0_50, %c0_51] : memref<1x9x32x64xbf16, #tpu.memory_space<vmem>>, vector<1x1x32x64xbf16>
    %53 = vector.shape_cast %52 : vector<1x1x32x64xbf16> to vector<32x64xbf16>
    %cst_52 = arith.constant dense<0.000000e+00> : vector<128x64xf32>
    %54 = tpu.matmul %51, %53, %cst_52 {dimension_numbers = #tpu.dot_dimension_numbers<[1], [0], [0], [1], [0, 0, 1, 1], [], []>} : vector<128x32xbf16>, vector<32x64xbf16>, vector<128x64xf32> -> vector<128x64xf32>
    %55 = arith.addf %47, %54 : vector<128x64xf32>
    %c5 = arith.constant 5 : index
    %c0_53 = arith.constant 0 : index
    %c0_54 = arith.constant 0 : index
    %56 = vector.load %arg4[%c5, %c0_53, %c0_54] : memref<9x128x128xbf16, #tpu.memory_space<vmem>>, vector<1x128x128xbf16>
    %57 = vector.shape_cast %56 : vector<1x128x128xbf16> to vector<128x128xbf16>
    %cst_55 = arith.constant dense<0.000000e+00> : vector<128x32xf32>
    %58 = tpu.matmul %57, %11, %cst_55 {dimension_numbers = #tpu.dot_dimension_numbers<[1], [0], [0], [1], [0, 0, 1, 1], [], []>} : vector<128x128xbf16>, vector<128x32xbf16>, vector<128x32xf32> -> vector<128x32xf32>
    %59 = arith.truncf %58 : vector<128x32xf32> to vector<128x32xbf16>
    %c0_56 = arith.constant 0 : index
    %c5_57 = arith.constant 5 : index
    %c0_58 = arith.constant 0 : index
    %c0_59 = arith.constant 0 : index
    %60 = vector.load %arg5[%c0_56, %c5_57, %c0_58, %c0_59] : memref<1x9x32x64xbf16, #tpu.memory_space<vmem>>, vector<1x1x32x64xbf16>
    %61 = vector.shape_cast %60 : vector<1x1x32x64xbf16> to vector<32x64xbf16>
    %cst_60 = arith.constant dense<0.000000e+00> : vector<128x64xf32>
    %62 = tpu.matmul %59, %61, %cst_60 {dimension_numbers = #tpu.dot_dimension_numbers<[1], [0], [0], [1], [0, 0, 1, 1], [], []>} : vector<128x32xbf16>, vector<32x64xbf16>, vector<128x64xf32> -> vector<128x64xf32>
    %63 = arith.addf %55, %62 : vector<128x64xf32>
    %c6 = arith.constant 6 : index
    %c0_61 = arith.constant 0 : index
    %c0_62 = arith.constant 0 : index
    %64 = vector.load %arg4[%c6, %c0_61, %c0_62] : memref<9x128x128xbf16, #tpu.memory_space<vmem>>, vector<1x128x128xbf16>
    %65 = vector.shape_cast %64 : vector<1x128x128xbf16> to vector<128x128xbf16>
    %cst_63 = arith.constant dense<0.000000e+00> : vector<128x32xf32>
    %66 = tpu.matmul %65, %11, %cst_63 {dimension_numbers = #tpu.dot_dimension_numbers<[1], [0], [0], [1], [0, 0, 1, 1], [], []>} : vector<128x128xbf16>, vector<128x32xbf16>, vector<128x32xf32> -> vector<128x32xf32>
    %67 = arith.truncf %66 : vector<128x32xf32> to vector<128x32xbf16>
    %c0_64 = arith.constant 0 : index
    %c6_65 = arith.constant 6 : index
    %c0_66 = arith.constant 0 : index
    %c0_67 = arith.constant 0 : index
    %68 = vector.load %arg5[%c0_64, %c6_65, %c0_66, %c0_67] : memref<1x9x32x64xbf16, #tpu.memory_space<vmem>>, vector<1x1x32x64xbf16>
    %69 = vector.shape_cast %68 : vector<1x1x32x64xbf16> to vector<32x64xbf16>
    %cst_68 = arith.constant dense<0.000000e+00> : vector<128x64xf32>
    %70 = tpu.matmul %67, %69, %cst_68 {dimension_numbers = #tpu.dot_dimension_numbers<[1], [0], [0], [1], [0, 0, 1, 1], [], []>} : vector<128x32xbf16>, vector<32x64xbf16>, vector<128x64xf32> -> vector<128x64xf32>
    %71 = arith.addf %63, %70 : vector<128x64xf32>
    %c7 = arith.constant 7 : index
    %c0_69 = arith.constant 0 : index
    %c0_70 = arith.constant 0 : index
    %72 = vector.load %arg4[%c7, %c0_69, %c0_70] : memref<9x128x128xbf16, #tpu.memory_space<vmem>>, vector<1x128x128xbf16>
    %73 = vector.shape_cast %72 : vector<1x128x128xbf16> to vector<128x128xbf16>
    %cst_71 = arith.constant dense<0.000000e+00> : vector<128x32xf32>
    %74 = tpu.matmul %73, %11, %cst_71 {dimension_numbers = #tpu.dot_dimension_numbers<[1], [0], [0], [1], [0, 0, 1, 1], [], []>} : vector<128x128xbf16>, vector<128x32xbf16>, vector<128x32xf32> -> vector<128x32xf32>
    %75 = arith.truncf %74 : vector<128x32xf32> to vector<128x32xbf16>
    %c0_72 = arith.constant 0 : index
    %c7_73 = arith.constant 7 : index
    %c0_74 = arith.constant 0 : index
    %c0_75 = arith.constant 0 : index
    %76 = vector.load %arg5[%c0_72, %c7_73, %c0_74, %c0_75] : memref<1x9x32x64xbf16, #tpu.memory_space<vmem>>, vector<1x1x32x64xbf16>
    %77 = vector.shape_cast %76 : vector<1x1x32x64xbf16> to vector<32x64xbf16>
    %cst_76 = arith.constant dense<0.000000e+00> : vector<128x64xf32>
    %78 = tpu.matmul %75, %77, %cst_76 {dimension_numbers = #tpu.dot_dimension_numbers<[1], [0], [0], [1], [0, 0, 1, 1], [], []>} : vector<128x32xbf16>, vector<32x64xbf16>, vector<128x64xf32> -> vector<128x64xf32>
    %79 = arith.addf %71, %78 : vector<128x64xf32>
    %c8 = arith.constant 8 : index
    %c0_77 = arith.constant 0 : index
    %c0_78 = arith.constant 0 : index
    %80 = vector.load %arg4[%c8, %c0_77, %c0_78] : memref<9x128x128xbf16, #tpu.memory_space<vmem>>, vector<1x128x128xbf16>
    %81 = vector.shape_cast %80 : vector<1x128x128xbf16> to vector<128x128xbf16>
    %cst_79 = arith.constant dense<0.000000e+00> : vector<128x32xf32>
    %82 = tpu.matmul %81, %11, %cst_79 {dimension_numbers = #tpu.dot_dimension_numbers<[1], [0], [0], [1], [0, 0, 1, 1], [], []>} : vector<128x128xbf16>, vector<128x32xbf16>, vector<128x32xf32> -> vector<128x32xf32>
    %83 = arith.truncf %82 : vector<128x32xf32> to vector<128x32xbf16>
    %c0_80 = arith.constant 0 : index
    %c8_81 = arith.constant 8 : index
    %c0_82 = arith.constant 0 : index
    %c0_83 = arith.constant 0 : index
    %84 = vector.load %arg5[%c0_80, %c8_81, %c0_82, %c0_83] : memref<1x9x32x64xbf16, #tpu.memory_space<vmem>>, vector<1x1x32x64xbf16>
    %85 = vector.shape_cast %84 : vector<1x1x32x64xbf16> to vector<32x64xbf16>
    %cst_84 = arith.constant dense<0.000000e+00> : vector<128x64xf32>
    %86 = tpu.matmul %83, %85, %cst_84 {dimension_numbers = #tpu.dot_dimension_numbers<[1], [0], [0], [1], [0, 0, 1, 1], [], []>} : vector<128x32xbf16>, vector<32x64xbf16>, vector<128x64xf32> -> vector<128x64xf32>
    %87 = arith.addf %79, %86 : vector<128x64xf32>
    %cst_85 = arith.constant 0.000000e+00 : f32
    %88 = vector.broadcast %cst_85 : f32 to vector<128x64xf32>
    %89 = arith.maximumf %87, %88 : vector<128x64xf32>
    %c0_86 = arith.constant 0 : index
    %c0_87 = arith.constant 0 : index
    %c0_88 = arith.constant 0 : index
    %90 = vector.load %arg8[%c0_86, %c0_87, %c0_88] : memref<1x1x128xf32, #tpu.memory_space<vmem>>, vector<1x1x128xf32>
    %91 = vector.shape_cast %90 : vector<1x1x128xf32> to vector<1x128xf32>
    %92 = vector.shape_cast %91 : vector<1x128xf32> to vector<1x128xf32>
    %93 = vector.broadcast %92 : vector<1x128xf32> to vector<8x128xf32>
    %94 = vector.extract_strided_slice %89 {offsets = [0, 0], sizes = [8, 64], strides = [1, 1]} : vector<128x64xf32> to vector<8x64xf32>
    %95 = arith.truncf %94 : vector<8x64xf32> to vector<8x64xbf16>
    %c0_89 = arith.constant 0 : index
    %c0_90 = arith.constant 0 : index
    %c0_91 = arith.constant 0 : index
    %c0_92 = arith.constant 0 : index
    %96 = vector.load %arg7[%c0_89, %c0_90, %c0_91, %c0_92] : memref<1x16x64x128xbf16, #tpu.memory_space<vmem>>, vector<1x1x64x128xbf16>
    %97 = vector.shape_cast %96 : vector<1x1x64x128xbf16> to vector<64x128xbf16>
    %cst_93 = arith.constant dense<0.000000e+00> : vector<8x128xf32>
    %98 = tpu.matmul %95, %97, %cst_93 {dimension_numbers = #tpu.dot_dimension_numbers<[1], [0], [0], [1], [0, 0, 1, 1], [], []>} : vector<8x64xbf16>, vector<64x128xbf16>, vector<8x128xf32> -> vector<8x128xf32>
    %99 = arith.addf %93, %98 : vector<8x128xf32>
    %100 = vector.extract_strided_slice %89 {offsets = [8, 0], sizes = [8, 64], strides = [1, 1]} : vector<128x64xf32> to vector<8x64xf32>
    %101 = arith.truncf %100 : vector<8x64xf32> to vector<8x64xbf16>
    %c0_94 = arith.constant 0 : index
    %c1_95 = arith.constant 1 : index
    %c0_96 = arith.constant 0 : index
    %c0_97 = arith.constant 0 : index
    %102 = vector.load %arg7[%c0_94, %c1_95, %c0_96, %c0_97] : memref<1x16x64x128xbf16, #tpu.memory_space<vmem>>, vector<1x1x64x128xbf16>
    %103 = vector.shape_cast %102 : vector<1x1x64x128xbf16> to vector<64x128xbf16>
    %cst_98 = arith.constant dense<0.000000e+00> : vector<8x128xf32>
    %104 = tpu.matmul %101, %103, %cst_98 {dimension_numbers = #tpu.dot_dimension_numbers<[1], [0], [0], [1], [0, 0, 1, 1], [], []>} : vector<8x64xbf16>, vector<64x128xbf16>, vector<8x128xf32> -> vector<8x128xf32>
    %105 = arith.addf %99, %104 : vector<8x128xf32>
    %106 = vector.extract_strided_slice %89 {offsets = [16, 0], sizes = [8, 64], strides = [1, 1]} : vector<128x64xf32> to vector<8x64xf32>
    %107 = arith.truncf %106 : vector<8x64xf32> to vector<8x64xbf16>
    %c0_99 = arith.constant 0 : index
    %c2_100 = arith.constant 2 : index
    %c0_101 = arith.constant 0 : index
    %c0_102 = arith.constant 0 : index
    %108 = vector.load %arg7[%c0_99, %c2_100, %c0_101, %c0_102] : memref<1x16x64x128xbf16, #tpu.memory_space<vmem>>, vector<1x1x64x128xbf16>
    %109 = vector.shape_cast %108 : vector<1x1x64x128xbf16> to vector<64x128xbf16>
    %cst_103 = arith.constant dense<0.000000e+00> : vector<8x128xf32>
    %110 = tpu.matmul %107, %109, %cst_103 {dimension_numbers = #tpu.dot_dimension_numbers<[1], [0], [0], [1], [0, 0, 1, 1], [], []>} : vector<8x64xbf16>, vector<64x128xbf16>, vector<8x128xf32> -> vector<8x128xf32>
    %111 = arith.addf %105, %110 : vector<8x128xf32>
    %112 = vector.extract_strided_slice %89 {offsets = [24, 0], sizes = [8, 64], strides = [1, 1]} : vector<128x64xf32> to vector<8x64xf32>
    %113 = arith.truncf %112 : vector<8x64xf32> to vector<8x64xbf16>
    %c0_104 = arith.constant 0 : index
    %c3_105 = arith.constant 3 : index
    %c0_106 = arith.constant 0 : index
    %c0_107 = arith.constant 0 : index
    %114 = vector.load %arg7[%c0_104, %c3_105, %c0_106, %c0_107] : memref<1x16x64x128xbf16, #tpu.memory_space<vmem>>, vector<1x1x64x128xbf16>
    %115 = vector.shape_cast %114 : vector<1x1x64x128xbf16> to vector<64x128xbf16>
    %cst_108 = arith.constant dense<0.000000e+00> : vector<8x128xf32>
    %116 = tpu.matmul %113, %115, %cst_108 {dimension_numbers = #tpu.dot_dimension_numbers<[1], [0], [0], [1], [0, 0, 1, 1], [], []>} : vector<8x64xbf16>, vector<64x128xbf16>, vector<8x128xf32> -> vector<8x128xf32>
    %117 = arith.addf %111, %116 : vector<8x128xf32>
    %118 = vector.extract_strided_slice %89 {offsets = [32, 0], sizes = [8, 64], strides = [1, 1]} : vector<128x64xf32> to vector<8x64xf32>
    %119 = arith.truncf %118 : vector<8x64xf32> to vector<8x64xbf16>
    %c0_109 = arith.constant 0 : index
    %c4_110 = arith.constant 4 : index
    %c0_111 = arith.constant 0 : index
    %c0_112 = arith.constant 0 : index
    %120 = vector.load %arg7[%c0_109, %c4_110, %c0_111, %c0_112] : memref<1x16x64x128xbf16, #tpu.memory_space<vmem>>, vector<1x1x64x128xbf16>
    %121 = vector.shape_cast %120 : vector<1x1x64x128xbf16> to vector<64x128xbf16>
    %cst_113 = arith.constant dense<0.000000e+00> : vector<8x128xf32>
    %122 = tpu.matmul %119, %121, %cst_113 {dimension_numbers = #tpu.dot_dimension_numbers<[1], [0], [0], [1], [0, 0, 1, 1], [], []>} : vector<8x64xbf16>, vector<64x128xbf16>, vector<8x128xf32> -> vector<8x128xf32>
    %123 = arith.addf %117, %122 : vector<8x128xf32>
    %124 = vector.extract_strided_slice %89 {offsets = [40, 0], sizes = [8, 64], strides = [1, 1]} : vector<128x64xf32> to vector<8x64xf32>
    %125 = arith.truncf %124 : vector<8x64xf32> to vector<8x64xbf16>
    %c0_114 = arith.constant 0 : index
    %c5_115 = arith.constant 5 : index
    %c0_116 = arith.constant 0 : index
    %c0_117 = arith.constant 0 : index
    %126 = vector.load %arg7[%c0_114, %c5_115, %c0_116, %c0_117] : memref<1x16x64x128xbf16, #tpu.memory_space<vmem>>, vector<1x1x64x128xbf16>
    %127 = vector.shape_cast %126 : vector<1x1x64x128xbf16> to vector<64x128xbf16>
    %cst_118 = arith.constant dense<0.000000e+00> : vector<8x128xf32>
    %128 = tpu.matmul %125, %127, %cst_118 {dimension_numbers = #tpu.dot_dimension_numbers<[1], [0], [0], [1], [0, 0, 1, 1], [], []>} : vector<8x64xbf16>, vector<64x128xbf16>, vector<8x128xf32> -> vector<8x128xf32>
    %129 = arith.addf %123, %128 : vector<8x128xf32>
    %130 = vector.extract_strided_slice %89 {offsets = [48, 0], sizes = [8, 64], strides = [1, 1]} : vector<128x64xf32> to vector<8x64xf32>
    %131 = arith.truncf %130 : vector<8x64xf32> to vector<8x64xbf16>
    %c0_119 = arith.constant 0 : index
    %c6_120 = arith.constant 6 : index
    %c0_121 = arith.constant 0 : index
    %c0_122 = arith.constant 0 : index
    %132 = vector.load %arg7[%c0_119, %c6_120, %c0_121, %c0_122] : memref<1x16x64x128xbf16, #tpu.memory_space<vmem>>, vector<1x1x64x128xbf16>
    %133 = vector.shape_cast %132 : vector<1x1x64x128xbf16> to vector<64x128xbf16>
    %cst_123 = arith.constant dense<0.000000e+00> : vector<8x128xf32>
    %134 = tpu.matmul %131, %133, %cst_123 {dimension_numbers = #tpu.dot_dimension_numbers<[1], [0], [0], [1], [0, 0, 1, 1], [], []>} : vector<8x64xbf16>, vector<64x128xbf16>, vector<8x128xf32> -> vector<8x128xf32>
    %135 = arith.addf %129, %134 : vector<8x128xf32>
    %136 = vector.extract_strided_slice %89 {offsets = [56, 0], sizes = [8, 64], strides = [1, 1]} : vector<128x64xf32> to vector<8x64xf32>
    %137 = arith.truncf %136 : vector<8x64xf32> to vector<8x64xbf16>
    %c0_124 = arith.constant 0 : index
    %c7_125 = arith.constant 7 : index
    %c0_126 = arith.constant 0 : index
    %c0_127 = arith.constant 0 : index
    %138 = vector.load %arg7[%c0_124, %c7_125, %c0_126, %c0_127] : memref<1x16x64x128xbf16, #tpu.memory_space<vmem>>, vector<1x1x64x128xbf16>
    %139 = vector.shape_cast %138 : vector<1x1x64x128xbf16> to vector<64x128xbf16>
    %cst_128 = arith.constant dense<0.000000e+00> : vector<8x128xf32>
    %140 = tpu.matmul %137, %139, %cst_128 {dimension_numbers = #tpu.dot_dimension_numbers<[1], [0], [0], [1], [0, 0, 1, 1], [], []>} : vector<8x64xbf16>, vector<64x128xbf16>, vector<8x128xf32> -> vector<8x128xf32>
    %141 = arith.addf %135, %140 : vector<8x128xf32>
    %142 = vector.extract_strided_slice %89 {offsets = [64, 0], sizes = [8, 64], strides = [1, 1]} : vector<128x64xf32> to vector<8x64xf32>
    %143 = arith.truncf %142 : vector<8x64xf32> to vector<8x64xbf16>
    %c0_129 = arith.constant 0 : index
    %c8_130 = arith.constant 8 : index
    %c0_131 = arith.constant 0 : index
    %c0_132 = arith.constant 0 : index
    %144 = vector.load %arg7[%c0_129, %c8_130, %c0_131, %c0_132] : memref<1x16x64x128xbf16, #tpu.memory_space<vmem>>, vector<1x1x64x128xbf16>
    %145 = vector.shape_cast %144 : vector<1x1x64x128xbf16> to vector<64x128xbf16>
    %cst_133 = arith.constant dense<0.000000e+00> : vector<8x128xf32>
    %146 = tpu.matmul %143, %145, %cst_133 {dimension_numbers = #tpu.dot_dimension_numbers<[1], [0], [0], [1], [0, 0, 1, 1], [], []>} : vector<8x64xbf16>, vector<64x128xbf16>, vector<8x128xf32> -> vector<8x128xf32>
    %147 = arith.addf %141, %146 : vector<8x128xf32>
    %148 = vector.extract_strided_slice %89 {offsets = [72, 0], sizes = [8, 64], strides = [1, 1]} : vector<128x64xf32> to vector<8x64xf32>
    %149 = arith.truncf %148 : vector<8x64xf32> to vector<8x64xbf16>
    %c0_134 = arith.constant 0 : index
    %c9 = arith.constant 9 : index
    %c0_135 = arith.constant 0 : index
    %c0_136 = arith.constant 0 : index
    %150 = vector.load %arg7[%c0_134, %c9, %c0_135, %c0_136] : memref<1x16x64x128xbf16, #tpu.memory_space<vmem>>, vector<1x1x64x128xbf16>
    %151 = vector.shape_cast %150 : vector<1x1x64x128xbf16> to vector<64x128xbf16>
    %cst_137 = arith.constant dense<0.000000e+00> : vector<8x128xf32>
    %152 = tpu.matmul %149, %151, %cst_137 {dimension_numbers = #tpu.dot_dimension_numbers<[1], [0], [0], [1], [0, 0, 1, 1], [], []>} : vector<8x64xbf16>, vector<64x128xbf16>, vector<8x128xf32> -> vector<8x128xf32>
    %153 = arith.addf %147, %152 : vector<8x128xf32>
    %154 = vector.extract_strided_slice %89 {offsets = [80, 0], sizes = [8, 64], strides = [1, 1]} : vector<128x64xf32> to vector<8x64xf32>
    %155 = arith.truncf %154 : vector<8x64xf32> to vector<8x64xbf16>
    %c0_138 = arith.constant 0 : index
    %c10 = arith.constant 10 : index
    %c0_139 = arith.constant 0 : index
    %c0_140 = arith.constant 0 : index
    %156 = vector.load %arg7[%c0_138, %c10, %c0_139, %c0_140] : memref<1x16x64x128xbf16, #tpu.memory_space<vmem>>, vector<1x1x64x128xbf16>
    %157 = vector.shape_cast %156 : vector<1x1x64x128xbf16> to vector<64x128xbf16>
    %cst_141 = arith.constant dense<0.000000e+00> : vector<8x128xf32>
    %158 = tpu.matmul %155, %157, %cst_141 {dimension_numbers = #tpu.dot_dimension_numbers<[1], [0], [0], [1], [0, 0, 1, 1], [], []>} : vector<8x64xbf16>, vector<64x128xbf16>, vector<8x128xf32> -> vector<8x128xf32>
    %159 = arith.addf %153, %158 : vector<8x128xf32>
    %160 = vector.extract_strided_slice %89 {offsets = [88, 0], sizes = [8, 64], strides = [1, 1]} : vector<128x64xf32> to vector<8x64xf32>
    %161 = arith.truncf %160 : vector<8x64xf32> to vector<8x64xbf16>
    %c0_142 = arith.constant 0 : index
    %c11 = arith.constant 11 : index
    %c0_143 = arith.constant 0 : index
    %c0_144 = arith.constant 0 : index
    %162 = vector.load %arg7[%c0_142, %c11, %c0_143, %c0_144] : memref<1x16x64x128xbf16, #tpu.memory_space<vmem>>, vector<1x1x64x128xbf16>
    %163 = vector.shape_cast %162 : vector<1x1x64x128xbf16> to vector<64x128xbf16>
    %cst_145 = arith.constant dense<0.000000e+00> : vector<8x128xf32>
    %164 = tpu.matmul %161, %163, %cst_145 {dimension_numbers = #tpu.dot_dimension_numbers<[1], [0], [0], [1], [0, 0, 1, 1], [], []>} : vector<8x64xbf16>, vector<64x128xbf16>, vector<8x128xf32> -> vector<8x128xf32>
    %165 = arith.addf %159, %164 : vector<8x128xf32>
    %166 = vector.extract_strided_slice %89 {offsets = [96, 0], sizes = [8, 64], strides = [1, 1]} : vector<128x64xf32> to vector<8x64xf32>
    %167 = arith.truncf %166 : vector<8x64xf32> to vector<8x64xbf16>
    %c0_146 = arith.constant 0 : index
    %c12 = arith.constant 12 : index
    %c0_147 = arith.constant 0 : index
    %c0_148 = arith.constant 0 : index
    %168 = vector.load %arg7[%c0_146, %c12, %c0_147, %c0_148] : memref<1x16x64x128xbf16, #tpu.memory_space<vmem>>, vector<1x1x64x128xbf16>
    %169 = vector.shape_cast %168 : vector<1x1x64x128xbf16> to vector<64x128xbf16>
    %cst_149 = arith.constant dense<0.000000e+00> : vector<8x128xf32>
    %170 = tpu.matmul %167, %169, %cst_149 {dimension_numbers = #tpu.dot_dimension_numbers<[1], [0], [0], [1], [0, 0, 1, 1], [], []>} : vector<8x64xbf16>, vector<64x128xbf16>, vector<8x128xf32> -> vector<8x128xf32>
    %171 = arith.addf %165, %170 : vector<8x128xf32>
    %172 = vector.extract_strided_slice %89 {offsets = [104, 0], sizes = [8, 64], strides = [1, 1]} : vector<128x64xf32> to vector<8x64xf32>
    %173 = arith.truncf %172 : vector<8x64xf32> to vector<8x64xbf16>
    %c0_150 = arith.constant 0 : index
    %c13 = arith.constant 13 : index
    %c0_151 = arith.constant 0 : index
    %c0_152 = arith.constant 0 : index
    %174 = vector.load %arg7[%c0_150, %c13, %c0_151, %c0_152] : memref<1x16x64x128xbf16, #tpu.memory_space<vmem>>, vector<1x1x64x128xbf16>
    %175 = vector.shape_cast %174 : vector<1x1x64x128xbf16> to vector<64x128xbf16>
    %cst_153 = arith.constant dense<0.000000e+00> : vector<8x128xf32>
    %176 = tpu.matmul %173, %175, %cst_153 {dimension_numbers = #tpu.dot_dimension_numbers<[1], [0], [0], [1], [0, 0, 1, 1], [], []>} : vector<8x64xbf16>, vector<64x128xbf16>, vector<8x128xf32> -> vector<8x128xf32>
    %177 = arith.addf %171, %176 : vector<8x128xf32>
    %178 = vector.extract_strided_slice %89 {offsets = [112, 0], sizes = [8, 64], strides = [1, 1]} : vector<128x64xf32> to vector<8x64xf32>
    %179 = arith.truncf %178 : vector<8x64xf32> to vector<8x64xbf16>
    %c0_154 = arith.constant 0 : index
    %c14 = arith.constant 14 : index
    %c0_155 = arith.constant 0 : index
    %c0_156 = arith.constant 0 : index
    %180 = vector.load %arg7[%c0_154, %c14, %c0_155, %c0_156] : memref<1x16x64x128xbf16, #tpu.memory_space<vmem>>, vector<1x1x64x128xbf16>
    %181 = vector.shape_cast %180 : vector<1x1x64x128xbf16> to vector<64x128xbf16>
    %cst_157 = arith.constant dense<0.000000e+00> : vector<8x128xf32>
    %182 = tpu.matmul %179, %181, %cst_157 {dimension_numbers = #tpu.dot_dimension_numbers<[1], [0], [0], [1], [0, 0, 1, 1], [], []>} : vector<8x64xbf16>, vector<64x128xbf16>, vector<8x128xf32> -> vector<8x128xf32>
    %183 = arith.addf %177, %182 : vector<8x128xf32>
    %184 = vector.extract_strided_slice %89 {offsets = [120, 0], sizes = [8, 64], strides = [1, 1]} : vector<128x64xf32> to vector<8x64xf32>
    %185 = arith.truncf %184 : vector<8x64xf32> to vector<8x64xbf16>
    %c0_158 = arith.constant 0 : index
    %c15 = arith.constant 15 : index
    %c0_159 = arith.constant 0 : index
    %c0_160 = arith.constant 0 : index
    %186 = vector.load %arg7[%c0_158, %c15, %c0_159, %c0_160] : memref<1x16x64x128xbf16, #tpu.memory_space<vmem>>, vector<1x1x64x128xbf16>
    %187 = vector.shape_cast %186 : vector<1x1x64x128xbf16> to vector<64x128xbf16>
    %cst_161 = arith.constant dense<0.000000e+00> : vector<8x128xf32>
    %188 = tpu.matmul %185, %187, %cst_161 {dimension_numbers = #tpu.dot_dimension_numbers<[1], [0], [0], [1], [0, 0, 1, 1], [], []>} : vector<8x64xbf16>, vector<64x128xbf16>, vector<8x128xf32> -> vector<8x128xf32>
    %189 = arith.addf %183, %188 : vector<8x128xf32>
    %cst_162 = arith.constant 0.000000e+00 : f32
    %190 = vector.broadcast %cst_162 : f32 to vector<8x128xf32>
    %191 = arith.maximumf %189, %190 : vector<8x128xf32>
    %192 = vector.extract_strided_slice %191 {offsets = [0, 0], sizes = [2, 128], strides = [1, 1]} : vector<8x128xf32> to vector<2x128xf32>
    %c0_163 = arith.constant 0 : index
    %c0_164 = arith.constant 0 : index
    %c0_165 = arith.constant 0 : index
    %193 = vector.load %arg9[%c0_163, %c0_164, %c0_165] : memref<1x2x128xf32, #tpu.memory_space<vmem>>, vector<1x2x128xf32>
    %194 = vector.shape_cast %193 : vector<1x2x128xf32> to vector<2x128xf32>
    %195 = vector.shape_cast %192 : vector<2x128xf32> to vector<1x2x128xf32>
    tpu.vector_store %arg9[%c0_163, %c0_164, %c0_165], %195 {strides = array<i32>} : memref<1x2x128xf32, #tpu.memory_space<vmem>>, vector<1x2x128xf32>,
    return
  }
  func.func @transform_0(%arg0: i32) -> (i32, i32, i32) {
    %c0_i32 = arith.constant 0 : i32
    %c0_i32_0 = arith.constant 0 : i32
    %c0_i32_1 = arith.constant 0 : i32
    return %arg0, %c0_i32, %c0_i32_0 : i32, i32, i32
  }
  func.func @transform_1(%arg0: i32) -> (i32, i32, i32) {
    %c0_i32 = arith.constant 0 : i32
    %c0_i32_0 = arith.constant 0 : i32
    %c0_i32_1 = arith.constant 0 : i32
    return %arg0, %c0_i32, %c0_i32_0 : i32, i32, i32
  }
  func.func @transform_2(%arg0: i32) -> (i32, i32, i32) {
    %c0_i32 = arith.constant 0 : i32
    %c0_i32_0 = arith.constant 0 : i32
    %c0_i32_1 = arith.constant 0 : i32
    return %arg0, %c0_i32, %c0_i32_0 : i32, i32, i32
  }
  func.func @transform_3(%arg0: i32) -> (i32, i32, i32) {
    %c0_i32 = arith.constant 0 : i32
    %c0_i32_0 = arith.constant 0 : i32
    %c0_i32_1 = arith.constant 0 : i32
    %c0_i32_2 = arith.constant 0 : i32
    return %c0_i32, %c0_i32_0, %c0_i32_1 : i32, i32, i32
  }
  func.func @transform_4(%arg0: i32) -> (i32, i32, i32, i32) {
    %c0_i32 = arith.constant 0 : i32
    %c0_i32_0 = arith.constant 0 : i32
    %c0_i32_1 = arith.constant 0 : i32
    %c0_i32_2 = arith.constant 0 : i32
    return %arg0, %c0_i32, %c0_i32_0, %c0_i32_1 : i32, i32, i32, i32
  }
  func.func @transform_5(%arg0: i32) -> (i32, i32, i32) {
    %c0_i32 = arith.constant 0 : i32
    %c0_i32_0 = arith.constant 0 : i32
    %c0_i32_1 = arith.constant 0 : i32
    return %arg0, %c0_i32, %c0_i32_0 : i32, i32, i32
  }
  func.func @transform_6(%arg0: i32) -> (i32, i32, i32, i32) {
    %c0_i32 = arith.constant 0 : i32
    %c0_i32_0 = arith.constant 0 : i32
    %c0_i32_1 = arith.constant 0 : i32
    %c0_i32_2 = arith.constant 0 : i32
    return %arg0, %c0_i32, %c0_i32_0, %c0_i32_1 : i32, i32, i32, i32
  }
  func.func @transform_7(%arg0: i32) -> (i32, i32, i32) {
    %c0_i32 = arith.constant 0 : i32
    %c0_i32_0 = arith.constant 0 : i32
    %c0_i32_1 = arith.constant 0 : i32
    return %arg0, %c0_i32, %c0_i32_0 : i32, i32, i32
  }
  func.func @transform_8(%arg0: i32) -> (i32, i32, i32) {
    %c0_i32 = arith.constant 0 : i32
    %c0_i32_0 = arith.constant 0 : i32
    %c0_i32_1 = arith.constant 0 : i32
    return %arg0, %c0_i32, %c0_i32_0 : i32, i32, i32
  }
}

module attributes {stable_mosaic.version = 11 : i64} {
  func.func @_head_kernel(%arg0: memref<2x2x128xf32, #tpu.memory_space<vmem>>, %arg1: memref<2x256xf32, #tpu.memory_space<vmem>>, %arg2: memref<128x128xbf16, #tpu.memory_space<vmem>>, %arg3: memref<128x128xbf16, #tpu.memory_space<vmem>>, %arg4: memref<1x128xf32, #tpu.memory_space<vmem>>, %arg5: memref<128x512xbf16, #tpu.memory_space<vmem>>, %arg6: memref<1x512xf32, #tpu.memory_space<vmem>>, %arg7: memref<128x128xbf16, #tpu.memory_space<vmem>>, %arg8: memref<256x128xbf16, #tpu.memory_space<vmem>>, %arg9: memref<1x128xf32, #tpu.memory_space<vmem>>, %arg10: memref<128x128xbf16, #tpu.memory_space<vmem>>, %arg11: memref<1x128xf32, #tpu.memory_space<vmem>>, %arg12: memref<2x256xf32, #tpu.memory_space<vmem>>, %arg13: memref<2x256xf32, #tpu.memory_space<vmem>>, %arg14: memref<2x256xf32, #tpu.memory_space<vmem>>, %arg15: memref<1x1xf32, #tpu.memory_space<vmem>>, %arg16: memref<2x128xf32, #tpu.memory_space<vmem>>) attributes {dimension_semantics = [], scalar_prefetch = 0 : i64, scratch_operands = 0 : i64, tpu.core_type = #tpu.core_type<tc>} {
    %c0 = arith.constant 0 : index
    %c0_0 = arith.constant 0 : index
    %c0_1 = arith.constant 0 : index
    %0 = vector.load %arg0[%c0, %c0_0, %c0_1] : memref<2x2x128xf32, #tpu.memory_space<vmem>>, vector<1x2x128xf32>
    %1 = vector.shape_cast %0 : vector<1x2x128xf32> to vector<2x128xf32>
    %2 = arith.truncf %1 : vector<2x128xf32> to vector<2x128xbf16>
    %c1 = arith.constant 1 : index
    %c0_2 = arith.constant 0 : index
    %c0_3 = arith.constant 0 : index
    %3 = vector.load %arg0[%c1, %c0_2, %c0_3] : memref<2x2x128xf32, #tpu.memory_space<vmem>>, vector<1x2x128xf32>
    %4 = vector.shape_cast %3 : vector<1x2x128xf32> to vector<2x128xf32>
    %5 = arith.truncf %4 : vector<2x128xf32> to vector<2x128xbf16>
    %c0_4 = arith.constant 0 : index
    %c0_5 = arith.constant 0 : index
    %6 = vector.load %arg2[%c0_4, %c0_5] : memref<128x128xbf16, #tpu.memory_space<vmem>>, vector<128x128xbf16>
    %cst = arith.constant dense<0.000000e+00> : vector<2x128xf32>
    %7 = tpu.matmul %2, %6, %cst {dimension_numbers = #tpu.dot_dimension_numbers<[1], [0], [0], [1], [0, 0, 1, 1], [], []>} : vector<2x128xbf16>, vector<128x128xbf16>, vector<2x128xf32> -> vector<2x128xf32>
    %c0_6 = arith.constant 0 : index
    %c0_7 = arith.constant 0 : index
    %8 = vector.load %arg3[%c0_6, %c0_7] : memref<128x128xbf16, #tpu.memory_space<vmem>>, vector<128x128xbf16>
    %cst_8 = arith.constant dense<0.000000e+00> : vector<2x128xf32>
    %9 = tpu.matmul %5, %8, %cst_8 {dimension_numbers = #tpu.dot_dimension_numbers<[1], [0], [0], [1], [0, 0, 1, 1], [], []>} : vector<2x128xbf16>, vector<128x128xbf16>, vector<2x128xf32> -> vector<2x128xf32>
    %10 = arith.addf %7, %9 : vector<2x128xf32>
    %c0_9 = arith.constant 0 : index
    %c0_10 = arith.constant 0 : index
    %11 = vector.load %arg4[%c0_9, %c0_10] : memref<1x128xf32, #tpu.memory_space<vmem>>, vector<1x128xf32>
    %12 = vector.broadcast %11 : vector<1x128xf32> to vector<2x128xf32>
    %13 = arith.addf %10, %12 : vector<2x128xf32>
    %cst_11 = arith.constant 0.000000e+00 : f32
    %14 = vector.broadcast %cst_11 : f32 to vector<2x128xf32>
    %15 = arith.maximumf %13, %14 : vector<2x128xf32>
    %16 = arith.truncf %15 : vector<2x128xf32> to vector<2x128xbf16>
    %c0_12 = arith.constant 0 : index
    %c0_13 = arith.constant 0 : index
    %17 = vector.load %arg5[%c0_12, %c0_13] : memref<128x512xbf16, #tpu.memory_space<vmem>>, vector<128x512xbf16>
    %cst_14 = arith.constant dense<0.000000e+00> : vector<2x512xf32>
    %18 = tpu.matmul %16, %17, %cst_14 {dimension_numbers = #tpu.dot_dimension_numbers<[1], [0], [0], [1], [0, 0, 1, 1], [], []>} : vector<2x128xbf16>, vector<128x512xbf16>, vector<2x512xf32> -> vector<2x512xf32>
    %c0_15 = arith.constant 0 : index
    %c0_16 = arith.constant 0 : index
    %19 = vector.load %arg6[%c0_15, %c0_16] : memref<1x512xf32, #tpu.memory_space<vmem>>, vector<1x512xf32>
    %20 = vector.broadcast %19 : vector<1x512xf32> to vector<2x512xf32>
    %21 = arith.addf %18, %20 : vector<2x512xf32>
    %22 = vector.extract_strided_slice %21 {offsets = [0, 0], sizes = [2, 256], strides = [1, 1]} : vector<2x512xf32> to vector<2x256xf32>
    %23 = vector.extract_strided_slice %21 {offsets = [0, 256], sizes = [2, 256], strides = [1, 1]} : vector<2x512xf32> to vector<2x256xf32>
    %c0_17 = arith.constant 0 : index
    %c0_18 = arith.constant 0 : index
    %24 = vector.load %arg12[%c0_17, %c0_18] : memref<2x256xf32, #tpu.memory_space<vmem>>, vector<2x256xf32>
    tpu.vector_store %arg12[%c0_17, %c0_18], %22 {strides = array<i32>} : memref<2x256xf32, #tpu.memory_space<vmem>>, vector<2x256xf32>,
    %c0_19 = arith.constant 0 : index
    %c0_20 = arith.constant 0 : index
    %25 = vector.load %arg13[%c0_19, %c0_20] : memref<2x256xf32, #tpu.memory_space<vmem>>, vector<2x256xf32>
    tpu.vector_store %arg13[%c0_19, %c0_20], %23 {strides = array<i32>} : memref<2x256xf32, #tpu.memory_space<vmem>>, vector<2x256xf32>,
    %cst_21 = arith.constant 1.000000e+00 : f32
    %26 = vector.broadcast %cst_21 : f32 to vector<2x256xf32>
    %27 = arith.addf %26, %23 : vector<2x256xf32>
    %28 = arith.mulf %22, %22 : vector<2x256xf32>
    %29 = arith.subf %27, %28 : vector<2x256xf32>
    %30 = math.exp %23 : vector<2x256xf32>
    %31 = arith.subf %29, %30 : vector<2x256xf32>
    %cst_22 = arith.constant -5.000000e-01 : f32
    %32 = vector.broadcast %cst_22 : f32 to vector<2x256xf32>
    %33 = arith.mulf %32, %31 : vector<2x256xf32>
    %cst_23 = arith.constant dense<0.000000e+00> : vector<256xf32>
    %34 = vector.multi_reduction <add>, %33, %cst_23 [0] : vector<2x256xf32> to vector<256xf32>
    %35 = vector.shape_cast %34 : vector<256xf32> to vector<1x256xf32>
    %cst_24 = arith.constant dense<0.000000e+00> : vector<1xf32>
    %36 = vector.multi_reduction <add>, %35, %cst_24 [1] : vector<1x256xf32> to vector<1xf32>
    %37 = vector.shape_cast %36 : vector<1xf32> to vector<1x1xf32>
    %cst_25 = arith.constant 0.001953125 : f32
    %38 = vector.broadcast %cst_25 : f32 to vector<1x1xf32>
    %39 = arith.mulf %37, %38 : vector<1x1xf32>
    %c0_26 = arith.constant 0 : index
    %c0_27 = arith.constant 0 : index
    %40 = vector.load %arg15[%c0_26, %c0_27] : memref<1x1xf32, #tpu.memory_space<vmem>>, vector<1x1xf32>
    tpu.vector_store %arg15[%c0_26, %c0_27], %39 {strides = array<i32>} : memref<1x1xf32, #tpu.memory_space<vmem>>, vector<1x1xf32>,
    %cst_28 = arith.constant 5.000000e-01 : f32
    %41 = vector.broadcast %cst_28 : f32 to vector<2x256xf32>
    %42 = arith.mulf %41, %23 : vector<2x256xf32>
    %43 = math.exp %42 : vector<2x256xf32>
    %c0_29 = arith.constant 0 : index
    %c0_30 = arith.constant 0 : index
    %44 = vector.load %arg1[%c0_29, %c0_30] : memref<2x256xf32, #tpu.memory_space<vmem>>, vector<2x256xf32>
    %45 = arith.mulf %43, %44 : vector<2x256xf32>
    %46 = arith.addf %22, %45 : vector<2x256xf32>
    %c0_31 = arith.constant 0 : index
    %c0_32 = arith.constant 0 : index
    %47 = vector.load %arg14[%c0_31, %c0_32] : memref<2x256xf32, #tpu.memory_space<vmem>>, vector<2x256xf32>
    tpu.vector_store %arg14[%c0_31, %c0_32], %46 {strides = array<i32>} : memref<2x256xf32, #tpu.memory_space<vmem>>, vector<2x256xf32>,
    %c0_33 = arith.constant 0 : index
    %c0_34 = arith.constant 0 : index
    %48 = vector.load %arg7[%c0_33, %c0_34] : memref<128x128xbf16, #tpu.memory_space<vmem>>, vector<128x128xbf16>
    %cst_35 = arith.constant dense<0.000000e+00> : vector<2x128xf32>
    %49 = tpu.matmul %2, %48, %cst_35 {dimension_numbers = #tpu.dot_dimension_numbers<[1], [0], [0], [1], [0, 0, 1, 1], [], []>} : vector<2x128xbf16>, vector<128x128xbf16>, vector<2x128xf32> -> vector<2x128xf32>
    %50 = arith.truncf %46 : vector<2x256xf32> to vector<2x256xbf16>
    %c0_36 = arith.constant 0 : index
    %c0_37 = arith.constant 0 : index
    %51 = vector.load %arg8[%c0_36, %c0_37] : memref<256x128xbf16, #tpu.memory_space<vmem>>, vector<256x128xbf16>
    %cst_38 = arith.constant dense<0.000000e+00> : vector<2x128xf32>
    %52 = tpu.matmul %50, %51, %cst_38 {dimension_numbers = #tpu.dot_dimension_numbers<[1], [0], [0], [1], [0, 0, 1, 1], [], []>} : vector<2x256xbf16>, vector<256x128xbf16>, vector<2x128xf32> -> vector<2x128xf32>
    %53 = arith.addf %49, %52 : vector<2x128xf32>
    %c0_39 = arith.constant 0 : index
    %c0_40 = arith.constant 0 : index
    %54 = vector.load %arg9[%c0_39, %c0_40] : memref<1x128xf32, #tpu.memory_space<vmem>>, vector<1x128xf32>
    %55 = vector.broadcast %54 : vector<1x128xf32> to vector<2x128xf32>
    %56 = arith.addf %53, %55 : vector<2x128xf32>
    %cst_41 = arith.constant 0.000000e+00 : f32
    %57 = vector.broadcast %cst_41 : f32 to vector<2x128xf32>
    %58 = arith.maximumf %56, %57 : vector<2x128xf32>
    %59 = arith.truncf %58 : vector<2x128xf32> to vector<2x128xbf16>
    %c0_42 = arith.constant 0 : index
    %c0_43 = arith.constant 0 : index
    %60 = vector.load %arg10[%c0_42, %c0_43] : memref<128x128xbf16, #tpu.memory_space<vmem>>, vector<128x128xbf16>
    %cst_44 = arith.constant dense<0.000000e+00> : vector<2x128xf32>
    %61 = tpu.matmul %59, %60, %cst_44 {dimension_numbers = #tpu.dot_dimension_numbers<[1], [0], [0], [1], [0, 0, 1, 1], [], []>} : vector<2x128xbf16>, vector<128x128xbf16>, vector<2x128xf32> -> vector<2x128xf32>
    %c0_45 = arith.constant 0 : index
    %c0_46 = arith.constant 0 : index
    %62 = vector.load %arg11[%c0_45, %c0_46] : memref<1x128xf32, #tpu.memory_space<vmem>>, vector<1x128xf32>
    %63 = vector.broadcast %62 : vector<1x128xf32> to vector<2x128xf32>
    %64 = arith.addf %61, %63 : vector<2x128xf32>
    %c0_47 = arith.constant 0 : index
    %c0_48 = arith.constant 0 : index
    %65 = vector.load %arg16[%c0_47, %c0_48] : memref<2x128xf32, #tpu.memory_space<vmem>>, vector<2x128xf32>
    tpu.vector_store %arg16[%c0_47, %c0_48], %64 {strides = array<i32>} : memref<2x128xf32, #tpu.memory_space<vmem>>, vector<2x128xf32>,
    return
  }
}

</mosaic_0001>

<bundles_post_ra>
// kernel: task_cvae_forward.3
= control target key start
LH: loop header
LB: loop body
LE: loop exit
PB: predicated region body
PF: predicated region fallthrough
CT: control target
= control target key end

     0   :  { %s1996_s0 = inlined_call_operand.vmem [shape: f32[2,2,128], index: 0, kind: input, shape index: {}]   ;;  %s1997_s1 = inlined_call_operand.vmem [shape: f32[2,256], index: 1, kind: input, shape index: {}]   ;;  %s1998_s2 = inlined_call_operand.vmem [shape: bf16[128,128], index: 2, kind: input, shape index: {}]   ;;  %s1999_s3 = inlined_call_operand.vmem [shape: bf16[128,128], index: 3, kind: input, shape index: {}]   ;;  %s2000_s4 = inlined_call_operand.vmem [shape: f32[1,128], index: 4, kind: input, shape index: {}]   ;;  %s2001_s5 = inlined_call_operand.vmem [shape: bf16[128,512], index: 5, kind: input, shape index: {}]   ;;  %s2002_s6 = inlined_call_operand.vmem [shape: f32[1,512], index: 6, kind: input, shape index: {}]   ;;  %s2003_s7 = inlined_call_operand.vmem [shape: bf16[128,128], index: 7, kind: input, shape index: {}]   ;;  %s2004_s8 = inlined_call_operand.vmem [shape: bf16[256,128], index: 8, kind: input, shape index: {}]   ;;  %s2005_s9 = inlined_call_operand.vmem [shape: f32[1,128], index: 9, kind: input, shape index: {}]   ;;  %s2006_s10 = inlined_call_operand.vmem [shape: bf16[128,128], index: 10, kind: input, shape index: {}]   ;;  %s2007_s11 = inlined_call_operand.vmem [shape: f32[1,128], index: 11, kind: input, shape index: {}]   ;;  %s2008_s12 = inlined_call_operand.hbm [shape: f32[2,256], index: 12, kind: output, shape index: {0}]   ;;  %s2009_s13 = inlined_call_operand.hbm [shape: f32[2,256], index: 13, kind: output, shape index: {1}]   ;;  %s2010_s14 = inlined_call_operand.hbm [shape: f32[2,256], index: 14, kind: output, shape index: {2}]   ;;  %s2011_s15 = inlined_call_operand.hbm [shape: f32[1,1], index: 15, kind: output, shape index: {3}]   ;;  %s2012_s16 = inlined_call_operand.vmem [shape: f32[2,128], index: 16, kind: output, shape index: {4}]  }
   0x1   :  { %2014 = sst [smem:[#allocation12_spill]] %s1996_s0 }
   0x2   :  { %22 = vsyncpa [#allocation3], 0 }
   0x3   :  { %23 = vsyncpa [#allocation5], 0  ;;  %v1350_v0 = vld [vmem:[%s1999_s3] sm:$0xff]   ;;  %v1548_v1 = vmov 0.0   ;;  %v1352_v3 = vld [vmem:[%s1999_s3 + $0x8] sm:$0xff]   ;;  %vm1549_vm0 = vmmov 0  }
   0x4   :  { %1263 = vmatprep.subr.bf16.mxu0 %v1548_v1  ;;  %1283 = vmatprep.subr.bf16.mxu1 %v1548_v1  ;;  %v1351_v2 = vld [vmem:[%s1998_s2] sm:$0xff]   ;;  %v1353_v4 = vld [vmem:[%s1998_s2 + $0x8] sm:$0xff]   ;;  %v1354_v5 = vld [vmem:[%s1999_s3 + $0x10] sm:$0xff]   ;;  %s2015_s25 = sld [smem:[#allocation12_spill]] }
   0x5   :  { %1264 = vmatpush3.bf16.msra.mxu0 %v1350_v0  ;;  %1279 = vmatprep.mubr.msk.bf16.mxu0 %vm1549_vm0, %v1548_v1  ;;  %v1355_v6 = vld [vmem:[%s1998_s2 + $0x10] sm:$0xff]   ;;  %v1356_v7 = vld [vmem:[%s1999_s3 + $0x18] sm:$0xff]   ;;  %v1358_v9 = vld [vmem:[%s1999_s3 + $0x20] sm:$0xff]  }
   0x6   :  { %1284 = vmatpush3.bf16.msra.mxu1 %v1351_v2  ;;  %1265 = vmatprep.subr.bf16.mxu0 %v1548_v1  ;;  %v1357_v8 = vld [vmem:[%s1998_s2 + $0x18] sm:$0xff]   ;;  %v1359_v10 = vld [vmem:[%s1998_s2 + $0x20] sm:$0xff]   ;;  %v1360_v11 = vld [vmem:[%s1999_s3 + $0x28] sm:$0xff]  }
   0x7   :  { %1285 = vmatprep.subr.bf16.mxu1 %v1548_v1  ;;  %1299 = vmatprep.mubr.msk.bf16.mxu1 %vm1549_vm0, %v1548_v1  ;;  %v1361_v12 = vld [vmem:[%s1998_s2 + $0x28] sm:$0xff]   ;;  %v1362_v13 = vld [vmem:[%s1999_s3 + $0x30] sm:$0xff]   ;;  %v1364_v15 = vld [vmem:[%s1999_s3 + $0x38] sm:$0xff]  }
   0x8   :  { %v1363_v14 = vld [vmem:[%s1998_s2 + $0x30] sm:$0xff]   ;;  %v1365_v16 = vld [vmem:[%s1998_s2 + $0x38] sm:$0xff]  }
   0x9   :  { %1266 = vmatpush3.bf16.msra.mxu0 %v1352_v3  ;;  %v1368_v19 = vld [vmem:[%s2001_s5 + $0x4] ss:$16 sps:$4 sm:$0xff]   ;;  %v1371_v20 = vld [vmem:[%s2001_s5 + $0xc] ss:$16 sps:$4 sm:$0xff]   ;;  %v1366_v22 = vld [vmem:[%s2001_s5] ss:$16 sps:$4 sm:$0xff]  }
   0xa   :  { %1286 = vmatpush3.bf16.msra.mxu1 %v1353_v4  ;;  %1267 = vmatprep.subr.bf16.mxu0 %v1548_v1  ;;  %v1117_v17 = vld [vmem:[%s2015_s25 + $0x2] sm:$0x3]  ;;  %v50_v18 = vld [vmem:[%s2015_s25] sm:$0x3]  ;;  %v1369_v24 = vld [vmem:[%s2001_s5 + $0x8] ss:$16 sps:$4 sm:$0xff]  }
   0xb   :  { %1287 = vmatprep.subr.bf16.mxu1 %v1548_v1  ;;  %v54_v21 = vpack.c.bf16 %v1117_v17, %v1117_v17  ;;  %v1723_v23 = vpack.c.bf16 %v50_v18, %v50_v18  ;;  %v1374_v25 = vld [vmem:[%s2001_s5 + $0x24] ss:$16 sps:$4 sm:$0xff]   ;;  %v1372_v26 = vld [vmem:[%s2001_s5 + $0x20] ss:$16 sps:$4 sm:$0xff]   ;;  %v1377_v27 = vld [vmem:[%s2001_s5 + $0x2c] ss:$16 sps:$4 sm:$0xff]  }
   0xc   :  { %v1375_v28 = vld [vmem:[%s2001_s5 + $0x28] ss:$16 sps:$4 sm:$0xff]   ;;  %v1380_v29 = vld [vmem:[%s2001_s5 + $0x44] ss:$16 sps:$4 sm:$0xff]   ;;  %v1383_v30 = vld [vmem:[%s2001_s5 + $0x4c] ss:$16 sps:$4 sm:$0xff]  }
   0xd   :  { %1268 = vmatpush3.bf16.msra.mxu0 %v1354_v5  ;;  %v1378_v31 = vld [vmem:[%s2001_s5 + $0x40] ss:$16 sps:$4 sm:$0xff]   ;;  %v1381_v32 = vld [vmem:[%s2001_s5 + $0x48] ss:$16 sps:$4 sm:$0xff]   ;;  %v1386_v33 = vld [vmem:[%s2001_s5 + $0x64] ss:$16 sps:$4 sm:$0xff]  }
   0xe   :  { %1288 = vmatpush3.bf16.msra.mxu1 %v1355_v6  ;;  %1269 = vmatprep.subr.bf16.mxu0 %v1548_v1  ;;  %v1389_v34 = vld [vmem:[%s2001_s5 + $0x6c] ss:$16 sps:$4 sm:$0xff]   ;;  %v1384_v35 = vld [vmem:[%s2001_s5 + $0x60] ss:$16 sps:$4 sm:$0xff]   ;;  %v1387_v36 = vld [vmem:[%s2001_s5 + $0x68] ss:$16 sps:$4 sm:$0xff]  }
   0xf   :  { %1289 = vmatprep.subr.bf16.mxu1 %v1548_v1  ;;  %v1392_v37 = vld [vmem:[%s2001_s5 + $0x84] ss:$16 sps:$4 sm:$0xff]   ;;  %v1395_v38 = vld [vmem:[%s2001_s5 + $0x8c] ss:$16 sps:$4 sm:$0xff]   ;;  %v1390_v39 = vld [vmem:[%s2001_s5 + $0x80] ss:$16 sps:$4 sm:$0xff]  }
  0x10   :  { %v1393_v40 = vld [vmem:[%s2001_s5 + $0x88] ss:$16 sps:$4 sm:$0xff]   ;;  %v1398_v41 = vld [vmem:[%s2001_s5 + $0xa4] ss:$16 sps:$4 sm:$0xff]   ;;  %v1401_v42 = vld [vmem:[%s2001_s5 + $0xac] ss:$16 sps:$4 sm:$0xff]  }
  0x11   :  { %1270 = vmatpush3.bf16.msra.mxu0 %v1356_v7  ;;  %v1396_v43 = vld [vmem:[%s2001_s5 + $0xa0] ss:$16 sps:$4 sm:$0xff]   ;;  %v1399_v44 = vld [vmem:[%s2001_s5 + $0xa8] ss:$16 sps:$4 sm:$0xff]  }
  0x12   :  { %1290 = vmatpush3.bf16.msra.mxu1 %v1357_v8  ;;  %1271 = vmatprep.subr.bf16.mxu0 %v1548_v1 }
  0x13   :  { %1291 = vmatprep.subr.bf16.mxu1 %v1548_v1 }
  0x15   :  { %1272 = vmatpush3.bf16.msra.mxu0 %v1358_v9 }
  0x16   :  { %1292 = vmatpush3.bf16.msra.mxu1 %v1359_v10  ;;  %1273 = vmatprep.subr.bf16.mxu0 %v1548_v1 }
  0x17   :  { %1293 = vmatprep.subr.bf16.mxu1 %v1548_v1 }
  0x19   :  { %1274 = vmatpush3.bf16.msra.mxu0 %v1360_v11 }
  0x1a   :  { %1294 = vmatpush3.bf16.msra.mxu1 %v1361_v12  ;;  %1275 = vmatprep.subr.bf16.mxu0 %v1548_v1 }
  0x1b   :  { %1295 = vmatprep.subr.bf16.mxu1 %v1548_v1 }
  0x1d   :  { %1276 = vmatpush3.bf16.msra.mxu0 %v1362_v13 }
  0x1e   :  { %1296 = vmatpush3.bf16.msra.mxu1 %v1363_v14  ;;  %1277 = vmatprep.subr.bf16.mxu0 %v1548_v1 }
  0x1f   :  { %1297 = vmatprep.subr.bf16.mxu1 %v1548_v1 }
  0x21   :  { %1278 = vmatpush3.bf16.msra.mxu0 %v1364_v15 }
  0x22   :  { %1298 = vmatpush3.bf16.msra.mxu1 %v1365_v16  ;;  %487 = vmatprep.subr.bf16.mxu0 %v1368_v19 }
  0x23   :  { %528 = vmatprep.subr.bf16.mxu1 %v1371_v20 }
  0x24   :  { %1280 = vmatmul.mubr.bf16.vlgmr.msra.gmra.mrb[0].mxu0 %v54_v21 }
  0x25   :  { %1300 = vmatmul.mubr.bf16.vlgmr.msra.gmra.mrb[0].mxu1 %v1723_v23  ;;  %488 = vmatpush1.bf16.msra.mxu0 %v1366_v22 }
  0x26   :  { %529 = vmatpush1.bf16.msra.mxu1 %v1369_v24  ;;  %489 = vmatprep.subr.bf16.mxu0 %v1374_v25 }
  0x27   :  { %530 = vmatprep.subr.bf16.mxu1 %v1377_v27 }
  0x29   :  { %490 = vmatpush1.bf16.msra.mxu0 %v1372_v26 }
  0x2a   :  { %531 = vmatpush1.bf16.msra.mxu1 %v1375_v28  ;;  %491 = vmatprep.subr.bf16.mxu0 %v1380_v29 }
  0x2b   :  { %532 = vmatprep.subr.bf16.mxu1 %v1383_v30 }
  0x2d   :  { %492 = vmatpush1.bf16.msra.mxu0 %v1378_v31 }
  0x2e   :  { %533 = vmatpush1.bf16.msra.mxu1 %v1381_v32  ;;  %493 = vmatprep.subr.bf16.mxu0 %v1386_v33 }
  0x2f   :  { %534 = vmatprep.subr.bf16.mxu1 %v1389_v34 }
  0x31   :  { %494 = vmatpush1.bf16.msra.mxu0 %v1384_v35 }
  0x32   :  { %535 = vmatpush1.bf16.msra.mxu1 %v1387_v36  ;;  %495 = vmatprep.subr.bf16.mxu0 %v1392_v37 }
  0x33   :  { %536 = vmatprep.subr.bf16.mxu1 %v1395_v38 }
  0x35   :  { %496 = vmatpush1.bf16.msra.mxu0 %v1390_v39 }
  0x36   :  { %537 = vmatpush1.bf16.msra.mxu1 %v1393_v40  ;;  %497 = vmatprep.subr.bf16.mxu0 %v1398_v41 }
  0x37   :  { %538 = vmatprep.subr.bf16.mxu1 %v1401_v42 }
  0x39   :  { %498 = vmatpush1.bf16.msra.mxu0 %v1396_v43 }
  0x3a   :  { %539 = vmatpush1.bf16.msra.mxu1 %v1399_v44 }
  0x3b   :  { %24 = vsyncpa [#allocation8], 0  ;;  %v1404_v45 = vld [vmem:[%s2001_s5 + $0xc4] ss:$16 sps:$4 sm:$0xff]   ;;  %v1407_v46 = vld [vmem:[%s2001_s5 + $0xcc] ss:$16 sps:$4 sm:$0xff]   ;;  %v307_v29 = vlaneseq }
  0x3c   :  { %v1402_v47 = vld [vmem:[%s2001_s5 + $0xc0] ss:$16 sps:$4 sm:$0xff]   ;;  %v1405_v48 = vld [vmem:[%s2001_s5 + $0xc8] ss:$16 sps:$4 sm:$0xff]   ;;  %499 = vmatprep.subr.bf16.mxu0 %v1404_v45  ;;  %540 = vmatprep.subr.bf16.mxu1 %v1407_v46  ;;  %v1410_v49 = vld [vmem:[%s2001_s5 + $0xe4] ss:$16 sps:$4 sm:$0xff]  }
  0x3d   :  { %500 = vmatpush1.bf16.msra.mxu0 %v1402_v47  ;;  %v1413_v50 = vld [vmem:[%s2001_s5 + $0xec] ss:$16 sps:$4 sm:$0xff]   ;;  %v1408_v51 = vld [vmem:[%s2001_s5 + $0xe0] ss:$16 sps:$4 sm:$0xff]   ;;  %v1411_v52 = vld [vmem:[%s2001_s5 + $0xe8] ss:$16 sps:$4 sm:$0xff]  }
  0x3e   :  { %541 = vmatpush1.bf16.msra.mxu1 %v1405_v48  ;;  %501 = vmatprep.subr.bf16.mxu0 %v1410_v49  ;;  %v1550_v53 = vmov 0   ;;  %v1414_v54 = vld [vmem:[%s2004_s8 + $0x40] sm:$0xff]   ;;  %v1417_v7 = vld [vmem:[%s2004_s8 + $0x48] sm:$0xff]   ;;  %v1420_v10 = vld [vmem:[%s2004_s8 + $0x50] sm:$0xff]   ;;  %v308_v30 = vshrl.u32 %v307_v29, 7  ;;  %vm607_vm1 = vcmask 1041408  }
  0x3f   :  { %542 = vmatprep.subr.bf16.mxu1 %v1413_v50  ;;  %519 = vmatprep.mubr.bf16.mxu0 %v1550_v53  ;;  %v1134_v57 = vld [vmem:[%s2000_s4] ss:$0 sm:$0xff]  ;;  %v1418_v8 = vld [vmem:[%s2004_s8 + $0x8] sm:$0xff]   ;;  %v1421_v11 = vld [vmem:[%s2004_s8 + $0x10] sm:$0xff]   ;;  %vm626_vm2 = vcmask 0  }
  0x40   :  { %560 = vmatprep.mubr.bf16.mxu1 %v1550_v53  ;;  %v1415_v4 = vld [vmem:[%s2004_s8] sm:$0xff]   ;;  %v1419_v9 = vld [vmem:[%s2003_s7 + $0x8] sm:$0xff]   ;;  %v1422_v12 = vld [vmem:[%s2003_s7 + $0x10] sm:$0xff]   ;;  %v309_v31 = vsub.s32 0, %v308_v30  ;;  %v317_v32 = vsub.s32 2, %v308_v30  ;;  %v313_v34 = vsub.s32 1, %v308_v30 }
  0x41   :  { %502 = vmatpush1.bf16.msra.mxu0 %v1408_v51  ;;  %v1416_v5 = vld [vmem:[%s2003_s7] sm:$0xff]   ;;  %v1423_v13 = vld [vmem:[%s2004_s8 + $0x58] sm:$0xff]   ;;  %v1429_v19 = vld [vmem:[%s2004_s8 + $0x68] sm:$0xff]   ;;  %v321_v35 = vsub.s32 3, %v308_v30 }
  0x42   :  { %543 = vmatpush1.bf16.msra.mxu1 %v1411_v52  ;;  %1223 = vmatprep.subr.bf16.mxu0 %v1414_v54  ;;  %v1424_v14 = vld [vmem:[%s2004_s8 + $0x18] sm:$0xff]   ;;  %v1426_v16 = vld [vmem:[%s2004_s8 + $0x60] sm:$0xff]   ;;  %v1430_v20 = vld [vmem:[%s2004_s8 + $0x28] sm:$0xff]  }
  0x43   :  { %1303 = vmatprep.subr.bf16.mxu1 %v1548_v1  ;;  %v1425_v15 = vld [vmem:[%s2003_s7 + $0x18] sm:$0xff]   ;;  %v1427_v17 = vld [vmem:[%s2004_s8 + $0x20] sm:$0xff]   ;;  %v1431_v21 = vld [vmem:[%s2003_s7 + $0x28] sm:$0xff]  }
  0x44   :  { %v1428_v18 = vld [vmem:[%s2003_s7 + $0x20] sm:$0xff]   ;;  %v1432_v22 = vld [vmem:[%s2004_s8 + $0x70] sm:$0xff]   ;;  %v1435_v26 = vld [vmem:[%s2004_s8 + $0x78] sm:$0xff]  }
  0x45   :  { %v1433_v24 = vld [vmem:[%s2004_s8 + $0x30] sm:$0xff]   ;;  %v1436_v27 = vld [vmem:[%s2004_s8 + $0x38] sm:$0xff]   ;;  %v305_v33 = vld [vmem:[%s2002_s6] sm:$0xf] }
  0x46   :  { %v1434_v25 = vld [vmem:[%s2003_s7 + $0x30] sm:$0xff]   ;;  %v1437_v28 = vld [vmem:[%s2003_s7 + $0x38] sm:$0xff]   ;;  %v310_v36 = vrot.slane %v305_v33, %v309_v31  ;;  %v318_v37 = vrot.slane %v305_v33, %v317_v32  ;;  %v314_v38 = vrot.slane %v305_v33, %v313_v34  ;;  %v322_v39 = vrot.slane %v305_v33, %v321_v35  ;;  %v1438_v35 = vld [vmem:[%s2006_s10] sm:$0xff]  }
  0xf7   :  { %v169_v55 = vpop.f32.mrb[0].mxu0 }
  0xf8   :  { %v257_v56 = vpop.f32.mrb[0].mxu1  ;;  %v1281_v58 = vpop.f32.mrb[1].mxu0 }
  0xf9   :  { %v258_v59 = vadd.f32 %v257_v56, %v169_v55  ;;  %v1301_v60 = vpop.f32.mrb[1].mxu1  ;;  %v172_v61 = vpop.f32.mrb[2].mxu0 }
  0xfa   :  { %v260_v62 = vpop.f32.mrb[2].mxu1  ;;  %v1282_v63 = vpop.f32.mrb[3].mxu0 }
  0xfb   :  { %v270_v0 = vadd.f32 %v1134_v57, %v258_v59  ;;  %v1302_v2 = vpop.f32.mrb[3].mxu1 }
  0xfc   :  { %v1169_v2 = vld.sshfl [vmem:[%s1997_s1] sm:$0x33 pattern:$0x76325410] }
  0xfd   :  { %v271_v3 = vmax.f32 %v270_v0, 0.0 }
  0xff   :  { %v272_v6 = vpack.c.bf16 %v271_v3, %v271_v3 }
 0x101   :  { %520 = vmatmul.mubr.bf16.vlgmr.msra.gmra.mrb[4].mxu0 %v272_v6  ;;  %561 = vmatmul.mubr.bf16.vlgmr.msra.gmra.mrb[4].mxu1 %v272_v6 }
 0x102   :  { %1224 = vmatpush3.bf16.msra.mxu0 %v1415_v4  ;;  %1304 = vmatpush3.bf16.msra.mxu1 %v1416_v5  ;;  %v643_v4 = vcombine.high %v1169_v2, %v1169_v2 }
 0x103   :  { %1225 = vmatprep.subr.bf16.mxu0 %v1417_v7  ;;  %1305 = vmatprep.subr.bf16.mxu1 %v1548_v1 }
 0x104   :  { %1319 = vmatprep.mubr.msk.bf16.mxu1 %vm1549_vm0, %v1548_v1 }
 0x106   :  { %1226 = vmatpush3.bf16.msra.mxu0 %v1418_v8  ;;  %1306 = vmatpush3.bf16.msra.mxu1 %v1419_v9 }
 0x107   :  { %1307 = vmatprep.subr.bf16.mxu1 %v1548_v1  ;;  %1227 = vmatprep.subr.bf16.mxu0 %v1420_v10 }
 0x10a   :  { %1228 = vmatpush3.bf16.msra.mxu0 %v1421_v11  ;;  %1308 = vmatpush3.bf16.msra.mxu1 %v1422_v12 }
 0x10b   :  { %1309 = vmatprep.subr.bf16.mxu1 %v1548_v1  ;;  %1229 = vmatprep.subr.bf16.mxu0 %v1423_v13 }
 0x10e   :  { %1230 = vmatpush3.bf16.msra.mxu0 %v1424_v14  ;;  %1310 = vmatpush3.bf16.msra.mxu1 %v1425_v15 }
 0x10f   :  { %1311 = vmatprep.subr.bf16.mxu1 %v1548_v1  ;;  %1231 = vmatprep.subr.bf16.mxu0 %v1426_v16 }
 0x112   :  { %1232 = vmatpush3.bf16.msra.mxu0 %v1427_v17  ;;  %1312 = vmatpush3.bf16.msra.mxu1 %v1428_v18 }
 0x113   :  { %1233 = vmatprep.subr.bf16.mxu0 %v1429_v19  ;;  %1313 = vmatprep.subr.bf16.mxu1 %v1548_v1 }
 0x116   :  { %1234 = vmatpush3.bf16.msra.mxu0 %v1430_v20  ;;  %1314 = vmatpush3.bf16.msra.mxu1 %v1431_v21 }
 0x117   :  { %1235 = vmatprep.subr.bf16.mxu0 %v1432_v22  ;;  %1315 = vmatprep.subr.bf16.mxu1 %v1548_v1 }
 0x11a   :  { %1236 = vmatpush3.bf16.msra.mxu0 %v1433_v24  ;;  %1316 = vmatpush3.bf16.msra.mxu1 %v1434_v25 }
 0x11b   :  { %1237 = vmatprep.subr.bf16.mxu0 %v1435_v26  ;;  %1317 = vmatprep.subr.bf16.mxu1 %v1548_v1 }
 0x11e   :  { %1238 = vmatpush3.bf16.msra.mxu0 %v1436_v27  ;;  %1318 = vmatpush3.bf16.msra.mxu1 %v1437_v28 }
 0x11f   :  { %1323 = vmatprep.subr.bf16.mxu0 %v1548_v1 }
 0x121   :  { %1320 = vmatmul.mubr.bf16.vlgmr.msra.gmra.mrb[8].mxu1 %v1723_v23 }
 0x1d4   :  { %v521_v40 = vpop.f32.mrb[4].mxu0  ;;  %v562_v41 = vpop.f32.mrb[4].mxu1 }
 0x1d5   :  { %v522_v42 = vadd.f32 %v521_v40, %v310_v36  ;;  %v563_v43 = vadd.f32 %v562_v41, %v318_v37  ;;  %v523_v44 = vpop.f32.mrb[5].mxu0  ;;  %v564_v23 = vpop.f32.mrb[5].mxu1  ;;  %v1439_v36 = vld [vmem:[%s2006_s10 + $0x8] sm:$0xff]   ;;  %v1440_v37 = vld [vmem:[%s2006_s10 + $0x10] sm:$0xff]  }
 0x1d6   :  { %v524_v45 = vadd.f32 %v523_v44, %v314_v38  ;;  %v565_v46 = vadd.f32 %v564_v23, %v322_v39  ;;  %v525_v47 = vpop.f32.mrb[6].mxu0  ;;  %v566_v48 = vpop.f32.mrb[6].mxu1  ;;  %v1441_v38 = vld [vmem:[%s2006_s10 + $0x18] sm:$0xff]   ;;  %v1442_v39 = vld [vmem:[%s2006_s10 + $0x20] sm:$0xff]   ;;  %v1443_v40 = vld [vmem:[%s2006_s10 + $0x28] sm:$0xff]  }
 0x1d7   :  { %v595_v49 = vmul.f32 %v522_v42, %v522_v42  ;;  %v593_v50 = vadd.f32 1.0, %v563_v43  ;;  %v599_v51 = vmul.f32 1.442695, %v563_v43  ;;  %v628_v52 = vmul.f32 0.5, %v563_v43  ;;  %v526_v53 = vpop.f32.mrb[7].mxu0  ;;  %v567_v54 = vpop.f32.mrb[7].mxu1 }
 0x1d8   :  { %v596_v55 = vmul.f32 %v524_v45, %v524_v45  ;;  %v594_v56 = vadd.f32 1.0, %v565_v46  ;;  %v601_v57 = vmul.f32 1.442695, %v565_v46  ;;  %v629_v58 = vmul.f32 0.5, %v565_v46  ;;  %v1444_v23 = vld [vmem:[%s2006_s10 + $0x30] sm:$0xff]  }
 0x1d9   :  { %v597_v59 = vsub.f32 %v593_v50, %v595_v49  ;;  %1446 = vpow2.f32 %v599_v51  ;;  %v630_v60 = vmul.f32 1.442695, %v628_v52  ;;  %v583_v61 = vcombine.low %v563_v43, %v565_v46  ;;  %v1195_v52 = vld [vmem:[%s2005_s9] ss:$0 sm:$0xff] }
 0x1da   :  { %v598_v62 = vsub.f32 %v594_v56, %v596_v55  ;;  %1448 = vpow2.f32 %v601_v57  ;;  %v632_v63 = vmul.f32 1.442695, %v629_v58  ;;  %v571_v0 = vcombine.low %v522_v42, %v524_v45 }
 0x1db   :  { %1450 = vpow2.f32 %v630_v60  ;;  %1168 = vst.sshfl [vmem:[#allocation4] sm:$0x33 pattern:$0x76325410] %v583_v61 }
 0x1dc   :  { %1452 = vpow2.f32 %v632_v63  ;;  %1167 = vst.sshfl [vmem:[#allocation2] sm:$0x33 pattern:$0x76325410] %v571_v0 }
 0x1e3   :  { %v1447_v3 = vpop.eup %1446 }
 0x1e4   :  { %v1449_v5 = vpop.eup %1448  ;;  %v603_v6 = vsub.f32 %v597_v59, %v1447_v3 }
 0x1e5   :  { %v1451_v7 = vpop.eup %1450  ;;  %v604_v8 = vsub.f32 %v598_v62, %v1449_v5 }
 0x1e6   :  { %v1453_v9 = vpop.eup %1452  ;;  %v646_v10 = vmul.f32 %v1451_v7, %v1169_v2  ;;  %v605_v11 = vmul.f32 -0.5, %v603_v6 }
 0x1e7   :  { %v647_v12 = vmul.f32 %v1453_v9, %v643_v4  ;;  %v606_v13 = vmul.f32 -0.5, %v604_v8 }
 0x1e8   :  { %v648_v14 = vadd.f32 %v646_v10, %v522_v42  ;;  %v608_v15 = vsel %vm607_vm1, %v605_v11, 0.0 }
 0x1e9   :  { %v649_v16 = vadd.f32 %v647_v12, %v524_v45  ;;  %v609_v17 = vrot.slane %v608_v15, 4  ;;  %v615_v18 = vsel %vm607_vm1, %v606_v13, 0.0  ;;  %v1445_v45 = vld [vmem:[%s2006_s10 + $0x38] sm:$0xff]   ;;  %s1551_s10 = smov [#allocation4]  }
 0x1ea   :  { %v616_v19 = vrot.slane %v615_v18, 4  ;;  %v678_v24 = vpack.c.bf16 %v648_v14, %v648_v14  ;;  %s1074_s0 = sshll.u32 %s1551_s10, 4  ;;  %s1075_s0 = int_to_ptr.vmem [resolvable:$true] %s1074_s0 }
 0x1eb   :  { %v679_v20 = vpack.c.bf16 %v649_v16, %v649_v16  ;;  %v610_v21 = vadd.f32 %v609_v17, %v608_v15  ;;  %v652_v22 = vcombine.low %v648_v14, %v649_v16  ;;  %s1454_s17 = scalar_lea.vmem %s1075_s0, 64  ;;  %p1459_p1 = scmp.lt.s32.totalorder %s1075_s0, %s1075_s0 }
 0x1ec   :  { %v617_v25 = vadd.f32 %v616_v19, %v615_v18  ;;  %p1455_p0 = scmp.ne.s32.totalorder %s1075_s0, %s1454_s17  ;;  %p1460_p2 = scmp.lt.s32.totalorder %s1454_s17, %s1454_s17 }
 0x1ed   :  { %840 = vmatprep.mubr.bf16.mxu0 %v679_v20  ;;  %v611_v26 = vrot.slane %v610_v21, 2  ;;  %1170 = vst.sshfl [vmem:[#allocation6] sm:$0x33 pattern:$0x76325410] %v652_v22 }
 0x1ee   :  { %841 = vmatmul.mubr.bf16.vlgmr.msra.gmra.mrb[8].mxu0 %v678_v24  ;;  %v618_v27 = vrot.slane %v617_v25, 2  ;;  %p1461_p3 = por %p1460_p2, %p1459_p1 }
 0x1ef   :  { %v612_v28 = vadd.f32 %v611_v26, %v610_v21  ;;  %1339 = vmatprep.mubr.msk.bf16.mxu0 %vm1549_vm0, %v1548_v1  ;;  %1324 = vmatpush3.bf16.msra.mxu0 %v1438_v35 }
 0x1f0   :  { %v619_v29 = vadd.f32 %v618_v27, %v617_v25  ;;  %1325 = vmatprep.subr.bf16.mxu0 %v1548_v1  ;;  %p1462_p4 = pnand %p1461_p3, %p1455_p0 }
 0x1f1   :  { %v613_v30 = vrot.slane %v612_v28, 1 }
 0x1f2   :  { %v620_v31 = vrot.slane %v619_v29, 1 }
 0x1f3   :  { %v614_v32 = vadd.f32 %v613_v30, %v612_v28  ;;  %1326 = vmatpush3.bf16.msra.mxu0 %v1439_v36 }
 0x1f4   :  { %v621_v33 = vadd.f32 %v620_v31, %v619_v29  ;;  %1327 = vmatprep.subr.bf16.mxu0 %v1548_v1  ;;  %v930_v41 = vpop.f32.mrb[8].mxu1 }
 0x1f5   :  { %v1321_v42 = vpop.f32.mrb[9].mxu1 }
 0x1f6   :  { %v622_v34 = vadd.f32 %v621_v33, %v614_v32  ;;  %v933_v43 = vpop.f32.mrb[10].mxu1 }
 0x1f7   :  { %1328 = vmatpush3.bf16.msra.mxu0 %v1440_v37  ;;  %v1322_v44 = vpop.f32.mrb[11].mxu1 }
 0x1f8   :  { %623 = vadd.xlane.f32.xlu0 %v622_v34  ;;  %1329 = vmatprep.subr.bf16.mxu0 %v1548_v1 }
 0x1fb   :  { %1330 = vmatpush3.bf16.msra.mxu0 %v1441_v38 }
 0x1fc   :  { %1331 = vmatprep.subr.bf16.mxu0 %v1548_v1 }
 0x1ff   :  { %1332 = vmatpush3.bf16.msra.mxu0 %v1442_v39 }
 0x200   :  { %1333 = vmatprep.subr.bf16.mxu0 %v1548_v1 }
 0x203   :  { %1334 = vmatpush3.bf16.msra.mxu0 %v1443_v40 }
 0x204   :  { %1335 = vmatprep.subr.bf16.mxu0 %v1548_v1 }
 0x207   :  { %1336 = vmatpush3.bf16.msra.mxu0 %v1444_v23 }
 0x208   :  { %1337 = vmatprep.subr.bf16.mxu0 %v1548_v1 }
 0x20b   :  { %1338 = vmatpush3.bf16.msra.mxu0 %v1445_v45 }
 0x285   :  { %v624_v46 = vpop.xlane.xlu0 %623 }
 0x286   :  { %v625_v47 = vmul.f32 0.001953125, %v624_v46 }
 0x288   :  { %627 = vst.msk [vmem:[#allocation7] sm:$0x1] %vm626_vm2, %v625_v47 }
 0x2c1   :  { %v1239_v48 = vpop.f32.mrb[8].mxu0 }
 0x2c2   :  { %v1240_v49 = vpop.f32.mrb[9].mxu0 }
 0x2c3   :  { %v1241_v50 = vadd.f32 %v1240_v49, %v1239_v48  ;;  %v1242_v51 = vpop.f32.mrb[10].mxu0 }
 0x2c4   :  { %v1243_v53 = vpop.f32.mrb[11].mxu0 }
 0x2c5   :  { %v931_v54 = vadd.f32 %v1241_v50, %v930_v41 }
 0x2c7   :  { %v943_v1 = vadd.f32 %v1195_v52, %v931_v54 }
 0x2c9   :  { %v944_v55 = vmax.f32 %v943_v1, 0.0 }
 0x2cb   :  { %v945_v56 = vpack.c.bf16 %v944_v55, %v944_v55 }
 0x2cd   :  { %1340 = vmatmul.mubr.bf16.vlgmr.msra.gmra.mrb[12].mxu0 %v945_v56 }
 0x2ce   :  { %1465 = shalt.err (!%p1462_p4)
}
 0x2cf   :  { %s1466_s9 = scalar_lea.hbm %s2009_s13, 64 }
 0x2d0   :  { %p1467_p5 = scmp.ne.s32.totalorder %s2009_s13, %s1466_s9  ;;  %p1470_p6 = scmp.lt.u32.totalorder %s1466_s9, %s2009_s13 }
 0x2d2   :  { %p1472_p7 = pnand %p1470_p6, %p1467_p5 }
 0x2d4   :  { %1475 = shalt.err (!%p1472_p7)
}
 0x2d5   :  { %1077 = dma.vmem_to_hbm [thread:$0]  %s1075_s0, 64, %s2009_s13, [#allocation5]  }
 0x2d6   :  { %s1552_s22 = smov [#allocation2]   ;;  %s1553_s24 = smov [#allocation6]  }
 0x2d7   :  { %s1064_s23 = sshll.u32 %s1552_s22, 4  ;;  %s1084_s25 = sshll.u32 %s1553_s24, 4  ;;  %s1065_s23 = int_to_ptr.vmem [resolvable:$true] %s1064_s23  ;;  %s1085_s25 = int_to_ptr.vmem [resolvable:$true] %s1084_s25 }
 0x2d8   :  { %s1476_s26 = scalar_lea.vmem %s1065_s23, 64  ;;  %p1481_p9 = scmp.lt.s32.totalorder %s1065_s23, %s1065_s23 }
 0x2d9   :  { %p1477_p8 = scmp.ne.s32.totalorder %s1065_s23, %s1476_s26  ;;  %p1482_p10 = scmp.lt.s32.totalorder %s1476_s26, %s1476_s26 }
 0x2db   :  { %p1483_p11 = por %p1482_p10, %p1481_p9 }
 0x2dd   :  { %p1484_p12 = pnand %p1483_p11, %p1477_p8 }
 0x2df   :  { %1487 = shalt.err (!%p1484_p12)
}
 0x2e0   :  { %s1488_s28 = scalar_lea.hbm %s2008_s12, 64 }
 0x2e1   :  { %p1489_p13 = scmp.ne.s32.totalorder %s2008_s12, %s1488_s28  ;;  %p1492_p0 = scmp.lt.u32.totalorder %s1488_s28, %s2008_s12 }
 0x2e3   :  { %p1494_p1 = pnand %p1492_p0, %p1489_p13 }
 0x2e5   :  { %1497 = shalt.err (!%p1494_p1)
}
 0x2e6   :  { %1067 = dma.vmem_to_hbm [thread:$0]  %s1065_s23, 64, %s2008_s12, [#allocation3]  }
 0x2e7   :  { %s1498_s10 = scalar_lea.vmem %s1085_s25, 64  ;;  %p1503_p3 = scmp.lt.s32.totalorder %s1085_s25, %s1085_s25 }
 0x2e8   :  { %p1499_p2 = scmp.ne.s32.totalorder %s1085_s25, %s1498_s10  ;;  %p1504_p4 = scmp.lt.s32.totalorder %s1498_s10, %s1498_s10 }
 0x2ea   :  { %p1505_p5 = por %p1504_p4, %p1503_p3 }
 0x2ec   :  { %p1506_p6 = pnand %p1505_p5, %p1499_p2 }
 0x2ee   :  { %1509 = shalt.err (!%p1506_p6)
}
 0x2ef   :  { %s1510_s18 = scalar_lea.hbm %s2010_s14, 64 }
 0x2f0   :  { %p1511_p7 = scmp.ne.s32.totalorder %s2010_s14, %s1510_s18  ;;  %p1514_p8 = scmp.lt.u32.totalorder %s1510_s18, %s2010_s14 }
 0x2f2   :  { %p1516_p9 = pnand %p1514_p8, %p1511_p7 }
 0x2f4   :  { %1519 = shalt.err (!%p1516_p9)
}
 0x2f5   :  { %1087 = dma.vmem_to_hbm [thread:$0]  %s1085_s25, 64, %s2010_s14, [#allocation5]  }
 0x2f6   :  { %s1554_s19 = smov [#allocation7]  }
 0x2f7   :  { %s1094_s20 = sshll.u32 %s1554_s19, 4  ;;  %s1095_s20 = int_to_ptr.vmem [resolvable:$true] %s1094_s20 }
 0x2f8   :  { %s1520_s21 = scalar_lea.vmem %s1095_s20, 16  ;;  %s1524_s22 = scalar_lea.vmem %s1095_s20, 32 }
 0x2f9   :  { %p1521_p10 = scmp.ne.s32.totalorder %s1095_s20, %s1520_s21  ;;  %p1525_p11 = scmp.lt.s32.totalorder %s1095_s20, %s1095_s20 }
 0x2fa   :  { %p1526_p12 = scmp.lt.s32.totalorder %s1524_s22, %s1520_s21 }
 0x2fc   :  { %p1527_p13 = por %p1526_p12, %p1525_p11 }
 0x2fe   :  { %p1528_p0 = pnand %p1527_p13, %p1521_p10 }
 0x300   :  { %1531 = shalt.err (!%p1528_p0)
}
 0x301   :  { %s1532_s26 = scalar_lea.hbm %s2011_s15, 16 }
 0x302   :  { %p1533_p1 = scmp.ne.s32.totalorder %s2011_s15, %s1532_s26  ;;  %p1536_p2 = scmp.lt.u32.totalorder %s1532_s26, %s2011_s15 }
 0x304   :  { %p1538_p3 = pnand %p1536_p2, %p1533_p1 }
 0x306   :  { %1541 = shalt.err (!%p1538_p3)
}
 0x307   :  { %1097 = dma.vmem_to_hbm [thread:$0]  %s1095_s20, 16, %s2011_s15, [#allocation8]   ;;  %v1196_v57 = vld [vmem:[%s2007_s11] ss:$0 sm:$0xff] }
 0x3a0   :  { %v1051_v58 = vpop.f32.mrb[12].mxu0 }
 0x3a1   :  { %v1052_v59 = vadd.f32 %v1196_v57, %v1051_v58  ;;  %v1341_v60 = vpop.f32.mrb[13].mxu0 }
 0x3a2   :  { %v1054_v61 = vpop.f32.mrb[14].mxu0 }
 0x3a3   :  { %1057 = vst [vmem:[%s2012_s16] sm:$0x3] %v1052_v59  ;;  %v1342_v62 = vpop.f32.mrb[15].mxu0 }
 0x3a4   :  { %1542 = dma.done.wait [#allocation3], 64  }
 0x3a5   :  { %1543 = vsyncadd [#allocation3], 4294967232 }
 0x3a6   :  { %1544 = dma.done.wait [#allocation5], 128  }
 0x3a7   :  { %1545 = vsyncadd [#allocation5], 4294967168 }
 0x3a8   :  { %1546 = dma.done.wait [#allocation8], 16  }
 0x3a9   :  { %1547 = vsyncadd [#allocation8], 4294967280 }
 0x3aa   :  { %1114 = vsyncpa [#allocation3], 1 }
 0x3ab   :  { %1115 = vsyncpa [#allocation5], 1 }
 0x3ac   :  { %1116 = vsyncpa [#allocation8], 1 }

// kernel: task_cvae_forward.2
= control target key start
LH: loop header
LB: loop body
LE: loop exit
PB: predicated region body
PF: predicated region fallthrough
CT: control target
= control target key end

     0   :  { %13 = vsyncpa [#allocation3], 0  ;;  %s8045_s0 = inlined_call_operand.vmem [shape: bf16[2,128,16], index: 0, kind: input, shape index: {}]   ;;  %s8046_s1 = inlined_call_operand.vmem [shape: bf16[2,16,32], index: 1, kind: input, shape index: {}]   ;;  %s8047_s2 = inlined_call_operand.vmem [shape: f32[2,1,32], index: 2, kind: input, shape index: {}]   ;;  %s8048_s3 = inlined_call_operand.hbm [shape: bf16[9,128,128], index: 3, kind: input, shape index: {}]   ;;  %s8049_s4 = inlined_call_operand.hbm [shape: bf16[2,9,32,64], index: 4, kind: input, shape index: {}]   ;;  %s8050_s5 = inlined_call_operand.vmem [shape: f32[2,1,64], index: 5, kind: input, shape index: {}]   ;;  %s8051_s6 = inlined_call_operand.vmem [shape: bf16[2,16,64,128], index: 6, kind: input, shape index: {}]   ;;  %s8052_s7 = inlined_call_operand.vmem [shape: f32[2,1,128], index: 7, kind: input, shape index: {}]   ;;  %s8053_s8 = inlined_call_operand.vmem [shape: f32[2,2,128], index: 8, kind: output, shape index: {}]  }
   0x1   :  { %14 = vsyncpa [#allocation5], 0 }
   0x2   :  { %16 = vsyncpa [#allocation5 + $0x1], 0  ;;  %s7002_s27 = smov 0   ;;  %s7004_s28 = smov 0  }
   0x3   :  { %s7006_s29 = smov 0   ;;  %s7008_s30 = smov 0  }
   0x4 LB: > { %s7021_s9 = sadd.s32 4294967295, %s6949_s30   ;;  %p141_p0 = scmp.ne.s32.totalorder %s6941_s28, %s6937_s27  ;;  %s6949_s30 = sphi %s7008_s30, %s8142_s30   ;;  %s6945_s29 = sphi %s7006_s29, %s8141_s29   ;;  %s6941_s28 = sphi %s7004_s28, %s8140_s28   ;;  %s6937_s27 = sphi %s7002_s27, %s8139_s27  }
   0x5   : > { %p8054_p1 = scmp.eq.s32.totalorder %s7021_s9, 0  ;;  %p4995_p2 = scmp.ge.s32.totalorder %s6949_s30, 1 }
   0x6   : > { %p256_p3 = scmp.lt.s32.totalorder %s6949_s30, 3  ;;  %s6951_s12 = smov [#allocation2]  }
   0x7   : > { %p7029_p4 = por %p8054_p1, %p141_p0  ;;  %s268_s13 = sshll.u32 %s6951_s12, 4  ;;  %s269_s13 = int_to_ptr.vmem [resolvable:$true] %s268_s13 }
   0x8   : > { %p7033_p5 = pnand %p4995_p2, %p256_p3  ;;  %s7046_s15 = sadd.s32 1, %s6949_s30  }
   0x9   : > { %s8070_s10 = scalar_select %p7029_p4, 1, 0 }
   0xa   : > { %s8071_s11 = scalar_select %p7033_p5, 1, 0 }
   0xb   : > { %p6642_p6 = pneg %p7033_p5  ;;  %s128_s16 = sadd.s32 1, %s6945_s29 }
   0xc   : > { %s125_s17 = ssub.s32 %s6949_s30, %s7046_s15  ;;  %s6853_s20 = scalar_lea.hbm %s8048_s3, 9216 }
   0xd   : > { %p7041_p7 = pnand %p6642_p6, %p8054_p1  ;;  %p6854_p8 = scmp.ne.s32.totalorder %s8048_s3, %s6853_s20 }
   0xe   : > { %p6860_p12 = scmp.lt.u32.totalorder %s6853_s20, %s8048_s3 }
   0xf   : > { %p6855_p9 = pneg %p7041_p7 }
  0x11   : > { %p6856_p10 = pnand %p6855_p9, %p6854_p8 }
  0x13   : > { %p6857_p11 = pneg %p6856_p10 }
  0x15   : > { %p6862_p13 = pnand %p6860_p12, %p6857_p11 }
  0x17   : > { %6865 = shalt.err (!%p6862_p13)
}
  0x18   : > { %s6866_s25 = scalar_lea.vmem %s269_s13, 9216  ;;  %p6874_p6 = scmp.lt.s32.totalorder %s269_s13, %s269_s13 }
  0x19   : > { %p6867_p0 = scmp.ne.s32.totalorder %s269_s13, %s6866_s25  ;;  %p6875_p1 = scmp.lt.s32.totalorder %s6866_s25, %s6866_s25 }
  0x1b   : > { %p6869_p2 = pnand %p6867_p0, %p6855_p9  ;;  %p6876_p4 = por %p6875_p1, %p6874_p6 }
  0x1d   : > { %p6870_p3 = pneg %p6869_p2 }
  0x1f   : > { %p6877_p5 = pnand %p6876_p4, %p6870_p3 }
  0x21   : > { %6880 = shalt.err (!%p6877_p5)
}
  0x22   : > { %s6952_s26 = smov 64   ;;  %s6953_s27 = smov 4  }
  0x23   : > { %6645 = dma.hbm_to_vmem [thread:$0]  (!%p7041_p7), %s8048_s3, 9216, %s269_s13, [#allocation3], %s6952_s26, %s6952_s26, %s6953_s27  }
  0x24   : > { %p126_p1 = scmp.eq.s32.totalorder %s125_s17, 0  ;;  %p135_p4 = scmp.ne.s32.totalorder %s6945_s29, %s6941_s28 }
  0x25   : > { %p136_p5 = scmp.eq.s32.totalorder %s6949_s30, 0  ;;  %p6651_p8 = scmp.lt.s32.totalorder %s6949_s30, 2 }
  0x26   : > { %s7075_s19 = scalar_select %p126_p1, %s6945_s29, %s128_s16  }
  0x27   : > { %p137_p9 = por %p136_p5, %p135_p4  ;;  %s304_s20 = sand.u32 1, %s6945_s29  }
  0x28   : > { %s6633_s21 = smul.u32 144, %s304_s20 }
  0x29   : > { %s6634_s22 = smul.u32 2304, %s6949_s30  ;;  %p7079_p10 = pnand %p6651_p8, %p137_p9 }
  0x2a   : > { %s308_s16 = scalar_lea.vmem [#allocation4], %s6633_s21  ;;  %s7090_s30 = scalar_lea.sflag [#allocation5], %s304_s20 }
  0x2b   : > { %s7086_s13 = scalar_lea.hbm %s8049_s4, %s6634_s22  ;;  %s315_s17 = sshll.u32 %s308_s16, 4  ;;  %s7088_s17 = int_to_ptr.vmem [resolvable:$true] %s315_s17 }
  0x2c   : > { %s6881_s25 = scalar_lea.hbm %s7086_s13, 2304  ;;  %p6883_p11 = pneg %p7079_p10 }
  0x2d   : > { %p6882_p7 = scmp.ne.s32.totalorder %s7086_s13, %s6881_s25  ;;  %s6886_s22 = scalar_lea.hbm %s8049_s4, 4608 }
  0x2e   : > { %p6887_p0 = scmp.lt.u32.totalorder %s7086_s13, %s8049_s4  ;;  %p6888_p2 = scmp.lt.u32.totalorder %s6886_s22, %s6881_s25 }
  0x2f   : > { %p6884_p12 = pnand %p6883_p11, %p6882_p7  ;;  %p6890_p6 = scmp.lt.u32.totalorder %s6881_s25, %s7086_s13 }
  0x30   : > { %p6889_p3 = por %p6888_p2, %p6887_p0 }
  0x31   : > { %p6885_p13 = pneg %p6884_p12 }
  0x32   : > { %p6891_p1 = por %p6890_p6, %p6889_p3 }
  0x34   : > { %p6892_p4 = pnand %p6891_p1, %p6885_p13 }
  0x36   : > { %6895 = shalt.err (!%p6892_p4)
}
  0x37   : > { %s6896_s20 = scalar_lea.vmem %s7088_s17, 2304  ;;  %s6954_s21 = smov [#allocation4]  }
  0x38   : > { %p6897_p5 = scmp.ne.s32.totalorder %s7088_s17, %s6896_s20  ;;  %s6901_s16 = sshll.u32 %s6954_s21, 4  ;;  %s6902_s16 = int_to_ptr.vmem [resolvable:$false] %s6901_s16 }
  0x39   : > { %s6903_s12 = scalar_lea.vmem %s6902_s16, 4608  ;;  %p6904_p7 = scmp.lt.s32.totalorder %s7088_s17, %s6902_s16 }
  0x3a   : > { %p6899_p8 = pnand %p6897_p5, %p6883_p11  ;;  %p6905_p12 = scmp.lt.s32.totalorder %s6903_s12, %s6896_s20 }
  0x3c   : > { %p6900_p9 = pneg %p6899_p8  ;;  %p6906_p0 = por %p6905_p12, %p6904_p7 }
  0x3e   : > { %p6907_p2 = pnand %p6906_p0, %p6900_p9 }
  0x40   : > { %6910 = shalt.err (!%p6907_p2)
}
  0x41   : > { %6649 = dma.hbm_to_vmem [thread:$0]  (!%p7079_p10), %s7086_s13, 2304, %s7088_s17, %s7090_s30, %s6952_s26, %s6952_s26, %s6953_s27  }
  0x42   : > { %p8074_p11 = scmp.ne.s32.totalorder %s8071_s11, 0 }
  0x44   : > { %347 = sbr.rel (%p8074_p11) target bundleno = 2150 (0x866), region = 52 }
  0x4b   : > { %p8075_p13 = scmp.eq.s32.totalorder %s7021_s9, 0 }
  0x4d   : > { %6928 = dma.done.wait (%p8075_p13), [#allocation3], 9216   ;;  %p8076_p3 = pmov %p8075_p13 }
  0x4e   : > { %s353_s25 = sand.u32 1, %s6941_s28   ;;  %p8077_p6 = scmp.ne.s32.totalorder %s8070_s10, 0 }
  0x4f   : > { %6930 = vsyncadd (%p8076_p3), [#allocation3], 4294958080  ;;  %s6635_s23 = smul.u32 144, %s353_s25  ;;  %s354_s18 = scalar_lea.sflag [#allocation5], %s353_s25 }
  0x51   : > { %s7128_s22 = scalar_lea.vmem [#allocation4], %s6635_s23 }
  0x52   : > { %6932 = dma.done.wait (%p8077_p6), %s354_s18, 2304  }
  0x53   : > { %6934 = vsyncadd (%p8077_p6), %s354_s18, 4294964992  ;;  %p413_p10 = scmp.lt.s32.totalorder %s7021_s9, 1  ;;  %vm513_vm0 = vcmask 130048   ;;  %v6699_v9 = vld [vmem:[#allocation2] sm:$0xff]   ;;  %vm851_vm1 = vcmask 261120   ;;  %vm6956_vm2 = vmmov 0  }
  0x54   : > { %v6702_v10 = vld [vmem:[#allocation2 + $0x100] sm:$0xff]   ;;  %5784 = vmatprep.mubr.bf16.mxu0 %v6699_v9  ;;  %v6707_v9 = vld [vmem:[#allocation2 + $0x110] sm:$0xff]   ;;  %vm3637_vm3 = vcmask 523264  }
  0x55   : > { %s8144_s9 = smov (!%p413_p10, %s7021_s9), 1 }
  0x56   : > { %s5424_s11 = sshll.u32 %s8144_s9, 6  ;;  %s5425_s26 = sshll.u32 %s8144_s9, 3 }
  0x57   : > { %s422_s17 = scalar_lea.vmem %s8046_s1, %s5425_s26  ;;  %s417_s24 = scalar_lea.vmem %s8045_s0, %s5424_s11 }
  0x58   : > { %v6690_v0 = vld [vmem:[%s422_s17] sm:$0xff]   ;;  %v6692_v2 = vld [vmem:[%s417_s24 + $0x8] sm:$0xff]   ;;  %v6693_v3 = vld [vmem:[%s417_s24 + $0x10] sm:$0xff]   ;;  %s5426_s10 = sshll.u32 %s8144_s9, 9  ;;  %s425_s23 = scalar_lea.vmem %s8047_s2, %s8144_s9 }
  0x59   : > { %5750 = vmatprep.subr.bf16.mxu1 %v6690_v0  ;;  %v6691_v1 = vld [vmem:[%s417_s24] sm:$0xff]   ;;  %v6694_v4 = vld [vmem:[%s417_s24 + $0x18] sm:$0xff]   ;;  %v6696_v6 = vld [vmem:[%s417_s24 + $0x28] sm:$0xff]   ;;  %s7158_s16 = scalar_lea.vmem %s8051_s6, %s5426_s10  ;;  %s428_s11 = scalar_lea.vmem %s8050_s5, %s8144_s9 }
  0x5a   : > { %5751 = vmatpush3.bf16.msra.mxu1 %v6690_v0  ;;  %5752 = vmatprep.mubr.msk.bf16.mxu1 %vm513_vm0, %v6691_v1  ;;  %v6695_v5 = vld [vmem:[%s417_s24 + $0x20] sm:$0xff]   ;;  %v6697_v7 = vld [vmem:[%s417_s24 + $0x30] sm:$0xff]   ;;  %v6698_v8 = vld [vmem:[%s417_s24 + $0x38] sm:$0xff]   ;;  %s436_s13 = scalar_lea.vmem %s8052_s7, %s8144_s9  ;;  %s5007_s17 = sshll.u32 %s8144_s9, 1 }
  0x5b   : > { %v7164_v11 = vld [vmem:[%s425_s23] ss:$0 sm:$0xff]  ;;  %s440_s24 = scalar_lea.vmem %s8053_s8, %s5007_s17 }
  0x5d   : > { %5753 = vmatmul.mubr.msk.bf16.vlgmr.msra.gmra.mrb[0].mxu1 %vm513_vm0, %v6692_v2 }
  0x5e   : > { %5756 = vmatprep.mubr.msk.bf16.mxu1 %vm513_vm0, %v6693_v3 }
  0x65   : > { %5757 = vmatmul.mubr.msk.bf16.gmra.mrb[4].mxu1 %vm513_vm0, %v6694_v4  ;;  %v6701_v4 = vld [vmem:[%s7128_s22] sm:$0xff]  }
  0x66   : > { %5760 = vmatprep.mubr.msk.bf16.mxu1 %vm513_vm0, %v6695_v5  ;;  %v6700_v5 = vld [vmem:[#allocation2 + $0x8] sm:$0xff]  }
  0x6d   : > { %5761 = vmatmul.mubr.msk.bf16.gmra.mrb[8].mxu1 %vm513_vm0, %v6696_v6  ;;  %v6703_v6 = vld [vmem:[#allocation2 + $0x108] sm:$0xff]  }
  0x6e   : > { %5764 = vmatprep.mubr.msk.bf16.mxu1 %vm513_vm0, %v6697_v7  ;;  %v6704_v7 = vld [vmem:[%s7128_s22 + $0x8] sm:$0xff]  }
  0x75   : > { %5765 = vmatmul.mubr.msk.bf16.gmra.mrb[12].mxu1 %vm513_vm0, %v6698_v8  ;;  %v6705_v8 = vld [vmem:[#allocation2 + $0x10] sm:$0xff]  }
  0x76   : > { %5992 = vmatprep.mubr.bf16.mxu1 %v6702_v10  ;;  %v6706_v10 = vld [vmem:[#allocation2 + $0x18] sm:$0xff]  }
 0x130   : > { %v5754_v12 = vpop.f32.mrb[0].mxu1 }
 0x131   : > { %v581_v13 = vadd.f32 %v5754_v12, %v7164_v11  ;;  %v572_v14 = vpop.f32.mrb[1].mxu1  ;;  %v6709_v12 = vld [vmem:[#allocation2 + $0x20] sm:$0xff]  }
 0x132   : > { %v573_v15 = vadd.f32 %v7164_v11, %v572_v14  ;;  %v5755_v16 = vpop.f32.mrb[2].mxu1  ;;  %v6710_v14 = vld [vmem:[#allocation2 + $0x28] sm:$0xff]  }
 0x133   : > { %v584_v17 = vadd.f32 %v5755_v16, %v7164_v11  ;;  %v575_v18 = vpop.f32.mrb[3].mxu1  ;;  %v637_v20 = vmax.f32 %v581_v13, 0.0  ;;  %v6711_v13 = vld [vmem:[#allocation2 + $0x120] sm:$0xff]   ;;  %v6713_v16 = vld [vmem:[#allocation2 + $0x30] sm:$0xff]  }
 0x134   : > { %v576_v19 = vadd.f32 %v7164_v11, %v575_v18  ;;  %v635_v22 = vmax.f32 %v573_v15, 0.0  ;;  %v6712_v15 = vld [vmem:[#allocation2 + $0x128] sm:$0xff]   ;;  %v6714_v18 = vld [vmem:[#allocation2 + $0x38] sm:$0xff]  }
 0x135   : > { %v638_v21 = vmax.f32 %v584_v17, 0.0  ;;  %v6715_v17 = vld [vmem:[#allocation2 + $0x130] sm:$0xff]  }
 0x136   : > { %v636_v23 = vmax.f32 %v576_v19, 0.0  ;;  %v6716_v19 = vld [vmem:[#allocation2 + $0x138] sm:$0xff]  }
 0x137   : > { %v7170_v24 = vpack.c.bf16 %v638_v21, %v637_v20  ;;  %v6717_v20 = vld [vmem:[#allocation2 + $0x140] sm:$0xff]   ;;  %v6718_v21 = vld [vmem:[#allocation2 + $0x148] sm:$0xff]  }
 0x138   : > { %v7172_v25 = vpack.c.bf16 %v636_v23, %v635_v22  ;;  %v5758_v26 = vpop.f32.mrb[4].mxu1  ;;  %v6719_v22 = vld [vmem:[#allocation2 + $0x150] sm:$0xff]   ;;  %v6720_v23 = vld [vmem:[#allocation2 + $0x158] sm:$0xff]  }
 0x139   : > { %v597_v27 = vadd.f32 %v5758_v26, %v7164_v11  ;;  %v588_v28 = vpop.f32.mrb[5].mxu1  ;;  %v6721_v26 = vld [vmem:[#allocation2 + $0x160] sm:$0xff]  }
 0x13a   : > { %v589_v29 = vadd.f32 %v7164_v11, %v588_v28  ;;  %v5759_v30 = vpop.f32.mrb[6].mxu1  ;;  %5768 = vmatprep.subr.bf16.mxu0 %v7172_v25  ;;  %5976 = vmatprep.subr.bf16.mxu1 %v7172_v25  ;;  %v6723_v28 = vld [vmem:[#allocation2 + $0x170] sm:$0xff]  }
 0x13b   : > { %v600_v31 = vadd.f32 %v5759_v30, %v7164_v11  ;;  %v591_v32 = vpop.f32.mrb[7].mxu1  ;;  %5769 = vmatpush3.bf16.msra.mxu0 %v7172_v25  ;;  %5977 = vmatpush3.bf16.msra.mxu1 %v7172_v25  ;;  %v641_v34 = vmax.f32 %v597_v27, 0.0  ;;  %v6722_v27 = vld [vmem:[#allocation2 + $0x168] sm:$0xff]   ;;  %v6725_v30 = vld [vmem:[#allocation2 + $0x180] sm:$0xff]  }
 0x13c   : > { %v592_v33 = vadd.f32 %v7164_v11, %v591_v32  ;;  %5770 = vmatprep.subr.bf16.mxu0 %v7170_v24  ;;  %5978 = vmatprep.subr.bf16.mxu1 %v7170_v24  ;;  %v639_v36 = vmax.f32 %v589_v29, 0.0  ;;  %v6724_v29 = vld [vmem:[#allocation2 + $0x178] sm:$0xff]   ;;  %v6727_v32 = vld [vmem:[#allocation2 + $0x190] sm:$0xff]  }
 0x13d   : > { %v642_v35 = vmax.f32 %v600_v31, 0.0  ;;  %v6726_v31 = vld [vmem:[#allocation2 + $0x188] sm:$0xff]  }
 0x13e   : > { %v640_v37 = vmax.f32 %v592_v33, 0.0  ;;  %v6728_v33 = vld [vmem:[#allocation2 + $0x198] sm:$0xff]  }
 0x13f   : > { %v7184_v38 = vpack.c.bf16 %v642_v35, %v641_v34  ;;  %5771 = vmatpush3.bf16.msra.mxu0 %v7170_v24  ;;  %5979 = vmatpush3.bf16.msra.mxu1 %v7170_v24  ;;  %v6729_v34 = vld [vmem:[#allocation2 + $0x1a0] sm:$0xff]   ;;  %v6730_v35 = vld [vmem:[#allocation2 + $0x1a8] sm:$0xff]  }
 0x140   : > { %v7188_v39 = vpack.c.bf16 %v640_v37, %v639_v36  ;;  %v5762_v40 = vpop.f32.mrb[8].mxu1  ;;  %v6731_v36 = vld [vmem:[#allocation2 + $0x1b0] sm:$0xff]   ;;  %v6732_v37 = vld [vmem:[#allocation2 + $0x1b8] sm:$0xff]  }
 0x141   : > { %v613_v41 = vadd.f32 %v5762_v40, %v7164_v11  ;;  %v604_v42 = vpop.f32.mrb[9].mxu1  ;;  %v6733_v40 = vld [vmem:[#allocation2 + $0x1c0] sm:$0xff]  }
 0x142   : > { %v605_v43 = vadd.f32 %v7164_v11, %v604_v42  ;;  %v5763_v44 = vpop.f32.mrb[10].mxu1  ;;  %5772 = vmatprep.subr.bf16.mxu0 %v7188_v39  ;;  %5980 = vmatprep.subr.bf16.mxu1 %v7188_v39 }
 0x143   : > { %v616_v45 = vadd.f32 %v5763_v44, %v7164_v11  ;;  %v607_v46 = vpop.f32.mrb[11].mxu1  ;;  %5773 = vmatpush3.bf16.msra.mxu0 %v7188_v39  ;;  %5981 = vmatpush3.bf16.msra.mxu1 %v7188_v39  ;;  %v645_v48 = vmax.f32 %v613_v41, 0.0  ;;  %v6734_v41 = vld [vmem:[#allocation2 + $0x1c8] sm:$0xff]  }
 0x144   : > { %v608_v47 = vadd.f32 %v7164_v11, %v607_v46  ;;  %5774 = vmatprep.subr.bf16.mxu0 %v7184_v38  ;;  %5982 = vmatprep.subr.bf16.mxu1 %v7184_v38  ;;  %v643_v50 = vmax.f32 %v605_v43, 0.0 }
 0x145   : > { %v646_v49 = vmax.f32 %v616_v45, 0.0 }
 0x146   : > { %v644_v51 = vmax.f32 %v608_v47, 0.0 }
 0x147   : > { %v7200_v52 = vpack.c.bf16 %v646_v49, %v645_v48  ;;  %5775 = vmatpush3.bf16.msra.mxu0 %v7184_v38  ;;  %5983 = vmatpush3.bf16.msra.mxu1 %v7184_v38 }
 0x148   : > { %v7204_v53 = vpack.c.bf16 %v644_v51, %v643_v50  ;;  %v5766_v54 = vpop.f32.mrb[12].mxu1 }
 0x149   : > { %v629_v55 = vadd.f32 %v5766_v54, %v7164_v11  ;;  %v620_v56 = vpop.f32.mrb[13].mxu1 }
 0x14a   : > { %v621_v57 = vadd.f32 %v7164_v11, %v620_v56  ;;  %v5767_v58 = vpop.f32.mrb[14].mxu1  ;;  %5776 = vmatprep.subr.bf16.mxu0 %v7204_v53  ;;  %5984 = vmatprep.subr.bf16.mxu1 %v7204_v53 }
 0x14b   : > { %v632_v59 = vadd.f32 %v5767_v58, %v7164_v11  ;;  %v623_v60 = vpop.f32.mrb[15].mxu1  ;;  %5777 = vmatpush3.bf16.msra.mxu0 %v7204_v53  ;;  %5985 = vmatpush3.bf16.msra.mxu1 %v7204_v53  ;;  %v649_v62 = vmax.f32 %v629_v55, 0.0 }
 0x14c   : > { %v624_v61 = vadd.f32 %v7164_v11, %v623_v60  ;;  %5778 = vmatprep.subr.bf16.mxu0 %v7200_v52  ;;  %5986 = vmatprep.subr.bf16.mxu1 %v7200_v52  ;;  %v647_v0 = vmax.f32 %v621_v57, 0.0  ;;  %v6708_v11 = vld [vmem:[#allocation2 + $0x118] sm:$0xff]  }
 0x14d   : > { %v650_v63 = vmax.f32 %v632_v59, 0.0 }
 0x14e   : > { %v648_v1 = vmax.f32 %v624_v61, 0.0 }
 0x14f   : > { %v7216_v2 = vpack.c.bf16 %v650_v63, %v649_v62  ;;  %5779 = vmatpush3.bf16.msra.mxu0 %v7200_v52  ;;  %5987 = vmatpush3.bf16.msra.mxu1 %v7200_v52 }
 0x150   : > { %v7220_v3 = vpack.c.bf16 %v648_v1, %v647_v0 }
 0x152   : > { %5780 = vmatprep.subr.bf16.mxu0 %v7220_v3  ;;  %5988 = vmatprep.subr.bf16.mxu1 %v7220_v3 }
 0x153   : > { %5781 = vmatpush3.bf16.msra.mxu0 %v7220_v3  ;;  %5989 = vmatpush3.bf16.msra.mxu1 %v7220_v3 }
 0x154   : > { %5782 = vmatprep.subr.bf16.mxu0 %v7216_v2  ;;  %5990 = vmatprep.subr.bf16.mxu1 %v7216_v2 }
 0x157   : > { %5783 = vmatpush3.bf16.msra.mxu0 %v7216_v2  ;;  %5991 = vmatpush3.bf16.msra.mxu1 %v7216_v2 }
 0x158   : > { %6028 = vmatprep.subr.bf16.mxu1 %v7172_v25  ;;  %5800 = vmatprep.subr.bf16.mxu0 %v6701_v4 }
 0x15a   : > { %5785 = vmatmul.mubr.bf16.vlgmr.msra.gmra.mrb[0].mxu0 %v6700_v5  ;;  %5993 = vmatmul.mubr.bf16.vlgmr.msra.gmra.mrb[16].mxu1 %v6703_v6  ;;  %v6735_v6 = vld [vmem:[#allocation2 + $0x40] sm:$0xff]  }
 0x15b   : > { %5801 = vmatpush3.bf16.msra.mxu0 %v6701_v4  ;;  %6029 = vmatpush3.bf16.msra.mxu1 %v7172_v25 }
 0x15c   : > { %6030 = vmatprep.subr.bf16.mxu1 %v7170_v24  ;;  %5802 = vmatprep.subr.bf16.mxu0 %v6704_v7 }
 0x15d   : > { %5788 = vmatprep.mubr.bf16.mxu0 %v6705_v8  ;;  %5996 = vmatprep.mubr.bf16.mxu1 %v6707_v9  ;;  %v6737_v8 = vld [vmem:[#allocation2 + $0x48] sm:$0xff]   ;;  %v6739_v9 = vld [vmem:[#allocation2 + $0x50] sm:$0xff]  }
 0x15f   : > { %5803 = vmatpush3.bf16.msra.mxu0 %v6704_v7  ;;  %6031 = vmatpush3.bf16.msra.mxu1 %v7170_v24  ;;  %v6736_v7 = vld [vmem:[%s7128_s22 + $0x10] sm:$0xff]  }
 0x160   : > { %5820 = vmatprep.subr.bf16.mxu0 %v7172_v25  ;;  %6032 = vmatprep.subr.bf16.mxu1 %v7188_v39 }
 0x162   : > { %5789 = vmatmul.mubr.bf16.gmra.mrb[4].mxu0 %v6706_v10  ;;  %5997 = vmatmul.mubr.bf16.gmra.mrb[20].mxu1 %v6708_v11  ;;  %v6738_v10 = vld [vmem:[%s7128_s22 + $0x18] sm:$0xff]  }
 0x163   : > { %6033 = vmatpush3.bf16.msra.mxu1 %v7188_v39  ;;  %5792 = vmatprep.mubr.bf16.mxu0 %v6709_v12  ;;  %v6740_v11 = vld [vmem:[#allocation2 + $0x58] sm:$0xff]   ;;  %v6741_v12 = vld [vmem:[#allocation2 + $0x60] sm:$0xff]  }
 0x164   : > { %6034 = vmatprep.subr.bf16.mxu1 %v7184_v38  ;;  %6000 = vmatprep.mubr.bf16.mxu1 %v6711_v13  ;;  %v6742_v13 = vld [vmem:[#allocation2 + $0x68] sm:$0xff]  }
 0x167   : > { %6035 = vmatpush3.bf16.msra.mxu1 %v7184_v38 }
 0x168   : > { %6036 = vmatprep.subr.bf16.mxu1 %v7204_v53 }
 0x16a   : > { %5793 = vmatmul.mubr.bf16.gmra.mrb[8].mxu0 %v6710_v14  ;;  %6001 = vmatmul.mubr.bf16.gmra.mrb[24].mxu1 %v6712_v15  ;;  %v6743_v14 = vld [vmem:[#allocation2 + $0x70] sm:$0xff]   ;;  %v6744_v15 = vld [vmem:[#allocation2 + $0x78] sm:$0xff]  }
 0x16b   : > { %6037 = vmatpush3.bf16.msra.mxu1 %v7204_v53  ;;  %5796 = vmatprep.mubr.bf16.mxu0 %v6713_v16 }
 0x16c   : > { %6038 = vmatprep.subr.bf16.mxu1 %v7200_v52  ;;  %6004 = vmatprep.mubr.bf16.mxu1 %v6715_v17 }
 0x16f   : > { %6039 = vmatpush3.bf16.msra.mxu1 %v7200_v52 }
 0x170   : > { %6040 = vmatprep.subr.bf16.mxu1 %v7220_v3 }
 0x172   : > { %5797 = vmatmul.mubr.bf16.gmra.mrb[12].mxu0 %v6714_v18  ;;  %6005 = vmatmul.mubr.bf16.gmra.mrb[28].mxu1 %v6716_v19 }
 0x173   : > { %6041 = vmatpush3.bf16.msra.mxu1 %v7220_v3  ;;  %6044 = vmatprep.mubr.bf16.mxu1 %v6717_v20 }
 0x174   : > { %6042 = vmatprep.subr.bf16.mxu1 %v7216_v2 }
 0x177   : > { %6043 = vmatpush3.bf16.msra.mxu1 %v7216_v2 }
 0x178   : > { %6080 = vmatprep.subr.bf16.mxu1 %v7172_v25 }
 0x17a   : > { %6045 = vmatmul.mubr.bf16.vlgmr.msra.gmra.mrb[32].mxu1 %v6718_v21 }
 0x17b   : > { %6081 = vmatpush3.bf16.msra.mxu1 %v7172_v25  ;;  %6048 = vmatprep.mubr.bf16.mxu1 %v6719_v22 }
 0x17c   : > { %6082 = vmatprep.subr.bf16.mxu1 %v7170_v24 }
 0x17f   : > { %6083 = vmatpush3.bf16.msra.mxu1 %v7170_v24 }
 0x180   : > { %6084 = vmatprep.subr.bf16.mxu1 %v7188_v39 }
 0x182   : > { %6049 = vmatmul.mubr.bf16.gmra.mrb[36].mxu1 %v6720_v23 }
 0x183   : > { %6085 = vmatpush3.bf16.msra.mxu1 %v7188_v39  ;;  %6052 = vmatprep.mubr.bf16.mxu1 %v6721_v26 }
 0x184   : > { %6086 = vmatprep.subr.bf16.mxu1 %v7184_v38 }
 0x187   : > { %6087 = vmatpush3.bf16.msra.mxu1 %v7184_v38 }
 0x188   : > { %6088 = vmatprep.subr.bf16.mxu1 %v7204_v53 }
 0x18a   : > { %6053 = vmatmul.mubr.bf16.gmra.mrb[40].mxu1 %v6722_v27 }
 0x18b   : > { %6089 = vmatpush3.bf16.msra.mxu1 %v7204_v53  ;;  %6056 = vmatprep.mubr.bf16.mxu1 %v6723_v28 }
 0x18c   : > { %6090 = vmatprep.subr.bf16.mxu1 %v7200_v52 }
 0x18f   : > { %6091 = vmatpush3.bf16.msra.mxu1 %v7200_v52 }
 0x190   : > { %6092 = vmatprep.subr.bf16.mxu1 %v7220_v3 }
 0x192   : > { %6057 = vmatmul.mubr.bf16.gmra.mrb[44].mxu1 %v6724_v29 }
 0x193   : > { %6093 = vmatpush3.bf16.msra.mxu1 %v7220_v3  ;;  %6096 = vmatprep.mubr.bf16.mxu1 %v6725_v30 }
 0x194   : > { %6094 = vmatprep.subr.bf16.mxu1 %v7216_v2 }
 0x197   : > { %6095 = vmatpush3.bf16.msra.mxu1 %v7216_v2 }
 0x198   : > { %6132 = vmatprep.subr.bf16.mxu1 %v7172_v25 }
 0x19a   : > { %6097 = vmatmul.mubr.bf16.vlgmr.msra.gmra.mrb[48].mxu1 %v6726_v31 }
 0x19b   : > { %6133 = vmatpush3.bf16.msra.mxu1 %v7172_v25  ;;  %6100 = vmatprep.mubr.bf16.mxu1 %v6727_v32 }
 0x19c   : > { %6134 = vmatprep.subr.bf16.mxu1 %v7170_v24 }
 0x19f   : > { %6135 = vmatpush3.bf16.msra.mxu1 %v7170_v24 }
 0x1a0   : > { %6136 = vmatprep.subr.bf16.mxu1 %v7188_v39 }
 0x1a2   : > { %6101 = vmatmul.mubr.bf16.gmra.mrb[52].mxu1 %v6728_v33 }
 0x1a3   : > { %6137 = vmatpush3.bf16.msra.mxu1 %v7188_v39  ;;  %6104 = vmatprep.mubr.bf16.mxu1 %v6729_v34 }
 0x1a4   : > { %6138 = vmatprep.subr.bf16.mxu1 %v7184_v38 }
 0x1a7   : > { %6139 = vmatpush3.bf16.msra.mxu1 %v7184_v38 }
 0x1a8   : > { %6140 = vmatprep.subr.bf16.mxu1 %v7204_v53 }
 0x1aa   : > { %6105 = vmatmul.mubr.bf16.gmra.mrb[56].mxu1 %v6730_v35 }
 0x1ab   : > { %6141 = vmatpush3.bf16.msra.mxu1 %v7204_v53  ;;  %6108 = vmatprep.mubr.bf16.mxu1 %v6731_v36 }
 0x1ac   : > { %6142 = vmatprep.subr.bf16.mxu1 %v7200_v52 }
 0x1af   : > { %6143 = vmatpush3.bf16.msra.mxu1 %v7200_v52 }
 0x1b0   : > { %6144 = vmatprep.subr.bf16.mxu1 %v7220_v3 }
 0x1b2   : > { %6109 = vmatmul.mubr.bf16.gmra.mrb[60].mxu1 %v6732_v37 }
 0x1b3   : > { %6145 = vmatpush3.bf16.msra.mxu1 %v7220_v3  ;;  %6148 = vmatprep.mubr.bf16.mxu1 %v6733_v40 }
 0x1b4   : > { %6146 = vmatprep.subr.bf16.mxu1 %v7216_v2 }
 0x1b7   : > { %6147 = vmatpush3.bf16.msra.mxu1 %v7216_v2 }
 0x1b8   : > { %6184 = vmatprep.subr.bf16.mxu1 %v7172_v25 }
 0x1ba   : > { %6149 = vmatmul.mubr.bf16.vlgmr.msra.gmra.mrb[64].mxu1 %v6734_v41 }
 0x1bb   : > { %6185 = vmatpush3.bf16.msra.mxu1 %v7172_v25 }
 0x1bc   : > { %6186 = vmatprep.subr.bf16.mxu1 %v7170_v24 }
 0x1bf   : > { %6187 = vmatpush3.bf16.msra.mxu1 %v7170_v24 }
 0x1c0   : > { %6188 = vmatprep.subr.bf16.mxu1 %v7188_v39 }
 0x1c3   : > { %6189 = vmatpush3.bf16.msra.mxu1 %v7188_v39 }
 0x1c4   : > { %6190 = vmatprep.subr.bf16.mxu1 %v7184_v38 }
 0x1c7   : > { %6191 = vmatpush3.bf16.msra.mxu1 %v7184_v38 }
 0x1c8   : > { %6192 = vmatprep.subr.bf16.mxu1 %v7204_v53 }
 0x1cb   : > { %6193 = vmatpush3.bf16.msra.mxu1 %v7204_v53 }
 0x1cc   : > { %6194 = vmatprep.subr.bf16.mxu1 %v7200_v52 }
 0x1cf   : > { %6195 = vmatpush3.bf16.msra.mxu1 %v7200_v52 }
 0x1d0   : > { %6196 = vmatprep.subr.bf16.mxu1 %v7220_v3 }
 0x1d3   : > { %6197 = vmatpush3.bf16.msra.mxu1 %v7220_v3 }
 0x1d4   : > { %6198 = vmatprep.subr.bf16.mxu1 %v7216_v2 }
 0x1d7   : > { %6199 = vmatpush3.bf16.msra.mxu1 %v7216_v2 }
 0x22d   : > { %v5786_v42 = vpop.f32.mrb[0].mxu0 }
 0x22e   : > { %v764_v43 = vpop.f32.mrb[1].mxu0 }
 0x22f   : > { %v5787_v44 = vpop.f32.mrb[2].mxu0 }
 0x230   : > { %v828_v45 = vpack.c.bf16 %v5787_v44, %v5786_v42  ;;  %v767_v46 = vpop.f32.mrb[3].mxu0  ;;  %v6745_v44 = vld [vmem:[#allocation2 + $0x80] sm:$0xff]  }
 0x231   : > { %v827_v47 = vpack.c.bf16 %v767_v46, %v764_v43  ;;  %v6747_v46 = vld [vmem:[#allocation2 + $0x88] sm:$0xff]  }
 0x233   : > { %5804 = vmatprep.mubr.msk.bf16.mxu0 %vm851_vm1, %v827_v47  ;;  %v6749_v47 = vld [vmem:[#allocation2 + $0x90] sm:$0xff]  }
 0x234   : > { %5805 = vmatmul.mubr.msk.bf16.vlgmr.msra.gmra.mrb[16].mxu0 %vm851_vm1, %v828_v45  ;;  %v6746_v45 = vld [vmem:[%s7128_s22 + $0x20] sm:$0xff]  }
 0x235   : > { %5821 = vmatpush3.bf16.msra.mxu0 %v7172_v25  ;;  %v5790_v48 = vpop.f32.mrb[4].mxu0 }
 0x236   : > { %5822 = vmatprep.subr.bf16.mxu0 %v7170_v24  ;;  %v780_v49 = vpop.f32.mrb[5].mxu0 }
 0x237   : > { %v5791_v50 = vpop.f32.mrb[6].mxu0 }
 0x238   : > { %v830_v51 = vpack.c.bf16 %v5791_v50, %v5790_v48  ;;  %v783_v54 = vpop.f32.mrb[7].mxu0  ;;  %v6748_v48 = vld [vmem:[%s7128_s22 + $0x28] sm:$0xff]   ;;  %v6751_v50 = vld [vmem:[#allocation2 + $0xa0] sm:$0xff]  }
 0x239   : > { %v829_v55 = vpack.c.bf16 %v783_v54, %v780_v49  ;;  %5823 = vmatpush3.bf16.msra.mxu0 %v7170_v24  ;;  %v6750_v49 = vld [vmem:[#allocation2 + $0x98] sm:$0xff]   ;;  %v6753_v54 = vld [vmem:[#allocation2 + $0xb0] sm:$0xff]  }
 0x23a   : > { %5824 = vmatprep.subr.bf16.mxu0 %v7188_v39 }
 0x23b   : > { %5808 = vmatprep.mubr.msk.bf16.mxu0 %vm851_vm1, %v829_v55  ;;  %v6754_v55 = vld [vmem:[#allocation2 + $0xb8] sm:$0xff]  }
 0x23c   : > { %5809 = vmatmul.mubr.msk.bf16.gmra.mrb[20].mxu0 %vm851_vm1, %v830_v51  ;;  %v6752_v51 = vld [vmem:[#allocation2 + $0xa8] sm:$0xff]  }
 0x23d   : > { %5825 = vmatpush3.bf16.msra.mxu0 %v7188_v39  ;;  %v5794_v56 = vpop.f32.mrb[8].mxu0 }
 0x23e   : > { %5826 = vmatprep.subr.bf16.mxu0 %v7184_v38  ;;  %v796_v57 = vpop.f32.mrb[9].mxu0 }
 0x23f   : > { %v5795_v58 = vpop.f32.mrb[10].mxu0 }
 0x240   : > { %v832_v59 = vpack.c.bf16 %v5795_v58, %v5794_v56  ;;  %v799_v60 = vpop.f32.mrb[11].mxu0  ;;  %v6763_v56 = vld [vmem:[#allocation2 + $0x1d0] sm:$0xff]   ;;  %v6765_v58 = vld [vmem:[#allocation2 + $0x1e0] sm:$0xff]  }
 0x241   : > { %v831_v61 = vpack.c.bf16 %v799_v60, %v796_v57  ;;  %5827 = vmatpush3.bf16.msra.mxu0 %v7184_v38  ;;  %v6764_v57 = vld [vmem:[#allocation2 + $0x1d8] sm:$0xff]   ;;  %6152 = vmatprep.mubr.bf16.mxu1 %v6763_v56  ;;  %v6767_v60 = vld [vmem:[#allocation2 + $0x1f0] sm:$0xff]  }
 0x242   : > { %5828 = vmatprep.subr.bf16.mxu0 %v7204_v53  ;;  %6153 = vmatmul.mubr.bf16.gmra.mrb[68].mxu1 %v6764_v57 }
 0x243   : > { %5812 = vmatprep.mubr.msk.bf16.mxu0 %vm851_vm1, %v831_v61  ;;  %6156 = vmatprep.mubr.bf16.mxu1 %v6765_v58  ;;  %v6768_v61 = vld [vmem:[#allocation2 + $0x1f8] sm:$0xff]  }
 0x244   : > { %5813 = vmatmul.mubr.msk.bf16.gmra.mrb[24].mxu0 %vm851_vm1, %v832_v59  ;;  %v6766_v59 = vld [vmem:[#allocation2 + $0x1e8] sm:$0xff]  }
 0x245   : > { %5829 = vmatpush3.bf16.msra.mxu0 %v7204_v53  ;;  %v5798_v62 = vpop.f32.mrb[12].mxu0 }
 0x246   : > { %5830 = vmatprep.subr.bf16.mxu0 %v7200_v52  ;;  %v812_v63 = vpop.f32.mrb[13].mxu0 }
 0x247   : > { %v5799_v0 = vpop.f32.mrb[14].mxu0 }
 0x248   : > { %v834_v1 = vpack.c.bf16 %v5799_v0, %v5798_v62  ;;  %v815_v4 = vpop.f32.mrb[15].mxu0  ;;  %v6769_v62 = vld [vmem:[#allocation2 + $0x200] sm:$0xff]   ;;  %v6771_v0 = vld [vmem:[#allocation2 + $0x210] sm:$0xff]  }
 0x249   : > { %v833_v5 = vpack.c.bf16 %v815_v4, %v812_v63  ;;  %5831 = vmatpush3.bf16.msra.mxu0 %v7200_v52  ;;  %v6770_v63 = vld [vmem:[#allocation2 + $0x208] sm:$0xff]   ;;  %v6773_v4 = vld [vmem:[#allocation2 + $0x220] sm:$0xff]  }
 0x24a   : > { %5832 = vmatprep.subr.bf16.mxu0 %v7220_v3  ;;  %6157 = vmatmul.mubr.bf16.gmra.mrb[72].mxu1 %v6766_v59 }
 0x24b   : > { %5816 = vmatprep.mubr.msk.bf16.mxu0 %vm851_vm1, %v833_v5  ;;  %6160 = vmatprep.mubr.bf16.mxu1 %v6767_v60  ;;  %v6774_v5 = vld [vmem:[#allocation2 + $0x228] sm:$0xff]  }
 0x24c   : > { %5817 = vmatmul.mubr.msk.bf16.gmra.mrb[28].mxu0 %vm851_vm1, %v834_v1  ;;  %v6772_v1 = vld [vmem:[#allocation2 + $0x218] sm:$0xff]  }
 0x24d   : > { %5833 = vmatpush3.bf16.msra.mxu0 %v7220_v3  ;;  %5836 = vmatprep.mubr.bf16.mxu0 %v6735_v6  ;;  %v6775_v6 = vld [vmem:[#allocation2 + $0x230] sm:$0xff]  }
 0x24e   : > { %5834 = vmatprep.subr.bf16.mxu0 %v7216_v2 }
 0x251   : > { %5835 = vmatpush3.bf16.msra.mxu0 %v7216_v2 }
 0x252   : > { %5852 = vmatprep.subr.bf16.mxu0 %v6736_v7  ;;  %6161 = vmatmul.mubr.bf16.gmra.mrb[76].mxu1 %v6768_v61 }
 0x253   : > { %6200 = vmatprep.mubr.bf16.mxu1 %v6769_v62 }
 0x254   : > { %5837 = vmatmul.mubr.bf16.vlgmr.msra.gmra.mrb[32].mxu0 %v6737_v8 }
 0x255   : > { %5853 = vmatpush3.bf16.msra.mxu0 %v6736_v7  ;;  %5840 = vmatprep.mubr.bf16.mxu0 %v6739_v9  ;;  %v6776_v7 = vld [vmem:[#allocation2 + $0x238] sm:$0xff]  }
 0x256   : > { %5854 = vmatprep.subr.bf16.mxu0 %v6738_v10 }
 0x259   : > { %5855 = vmatpush3.bf16.msra.mxu0 %v6738_v10 }
 0x25a   : > { %5872 = vmatprep.subr.bf16.mxu0 %v7172_v25  ;;  %6201 = vmatmul.mubr.bf16.vlgmr.msra.gmra.mrb[80].mxu1 %v6770_v63 }
 0x25b   : > { %6204 = vmatprep.mubr.bf16.mxu1 %v6771_v0 }
 0x25c   : > { %5841 = vmatmul.mubr.bf16.gmra.mrb[36].mxu0 %v6740_v11 }
 0x25d   : > { %5844 = vmatprep.mubr.bf16.mxu0 %v6741_v12 }
 0x262   : > { %6205 = vmatmul.mubr.bf16.gmra.mrb[84].mxu1 %v6772_v1 }
 0x263   : > { %6208 = vmatprep.mubr.bf16.mxu1 %v6773_v4 }
 0x264   : > { %5845 = vmatmul.mubr.bf16.gmra.mrb[40].mxu0 %v6742_v13 }
 0x265   : > { %5848 = vmatprep.mubr.bf16.mxu0 %v6743_v14 }
 0x26a   : > { %6209 = vmatmul.mubr.bf16.gmra.mrb[88].mxu1 %v6774_v5 }
 0x26b   : > { %6212 = vmatprep.mubr.bf16.mxu1 %v6775_v6 }
 0x26c   : > { %5849 = vmatmul.mubr.bf16.gmra.mrb[44].mxu0 %v6744_v15 }
 0x272   : > { %6213 = vmatmul.mubr.bf16.gmra.mrb[92].mxu1 %v6776_v7 }
 0x327   : > { %v5838_v16 = vpop.f32.mrb[32].mxu0 }
 0x328   : > { %v1088_v17 = vpop.f32.mrb[33].mxu0 }
 0x329   : > { %v5839_v18 = vpop.f32.mrb[34].mxu0 }
 0x32a   : > { %v1152_v19 = vpack.c.bf16 %v5839_v18, %v5838_v16  ;;  %v1091_v20 = vpop.f32.mrb[35].mxu0 }
 0x32b   : > { %v1151_v21 = vpack.c.bf16 %v1091_v20, %v1088_v17 }
 0x32d   : > { %5856 = vmatprep.mubr.msk.bf16.mxu0 %vm851_vm1, %v1151_v21 }
 0x32e   : > { %5857 = vmatmul.mubr.msk.bf16.vlgmr.msra.gmra.mrb[16].mxu0 %vm851_vm1, %v1152_v19 }
 0x32f   : > { %5873 = vmatpush3.bf16.msra.mxu0 %v7172_v25  ;;  %v5842_v22 = vpop.f32.mrb[36].mxu0 }
 0x330   : > { %5874 = vmatprep.subr.bf16.mxu0 %v7170_v24  ;;  %v1104_v23 = vpop.f32.mrb[37].mxu0 }
 0x331   : > { %v5843_v26 = vpop.f32.mrb[38].mxu0 }
 0x332   : > { %v1154_v27 = vpack.c.bf16 %v5843_v26, %v5842_v22  ;;  %v1107_v28 = vpop.f32.mrb[39].mxu0 }
 0x333   : > { %v1153_v29 = vpack.c.bf16 %v1107_v28, %v1104_v23  ;;  %5875 = vmatpush3.bf16.msra.mxu0 %v7170_v24 }
 0x334   : > { %5876 = vmatprep.subr.bf16.mxu0 %v7188_v39 }
 0x335   : > { %5860 = vmatprep.mubr.msk.bf16.mxu0 %vm851_vm1, %v1153_v29 }
 0x336   : > { %5861 = vmatmul.mubr.msk.bf16.gmra.mrb[20].mxu0 %vm851_vm1, %v1154_v27 }
 0x337   : > { %5877 = vmatpush3.bf16.msra.mxu0 %v7188_v39  ;;  %v5846_v30 = vpop.f32.mrb[40].mxu0 }
 0x338   : > { %5878 = vmatprep.subr.bf16.mxu0 %v7184_v38  ;;  %v1120_v31 = vpop.f32.mrb[41].mxu0 }
 0x339   : > { %v5847_v32 = vpop.f32.mrb[42].mxu0 }
 0x33a   : > { %v1156_v33 = vpack.c.bf16 %v5847_v32, %v5846_v30  ;;  %v1123_v34 = vpop.f32.mrb[43].mxu0  ;;  %v6757_v32 = vld [vmem:[#allocation2 + $0xd0] sm:$0xff]  }
 0x33b   : > { %v1155_v35 = vpack.c.bf16 %v1123_v34, %v1120_v31  ;;  %5879 = vmatpush3.bf16.msra.mxu0 %v7184_v38  ;;  %v6756_v31 = vld [vmem:[#allocation2 + $0xc8] sm:$0xff]   ;;  %v6759_v34 = vld [vmem:[#allocation2 + $0xe0] sm:$0xff]  }
 0x33c   : > { %5880 = vmatprep.subr.bf16.mxu0 %v7204_v53 }
 0x33d   : > { %5864 = vmatprep.mubr.msk.bf16.mxu0 %vm851_vm1, %v1155_v35  ;;  %v6761_v35 = vld [vmem:[#allocation2 + $0xf0] sm:$0xff]  }
 0x33e   : > { %5865 = vmatmul.mubr.msk.bf16.gmra.mrb[24].mxu0 %vm851_vm1, %v1156_v33  ;;  %v6778_v33 = vld [vmem:[%s7128_s22 + $0x38] sm:$0xff]  }
 0x33f   : > { %5881 = vmatpush3.bf16.msra.mxu0 %v7204_v53  ;;  %v5850_v36 = vpop.f32.mrb[44].mxu0 }
 0x340   : > { %5882 = vmatprep.subr.bf16.mxu0 %v7200_v52  ;;  %v1136_v37 = vpop.f32.mrb[45].mxu0 }
 0x341   : > { %v5851_v40 = vpop.f32.mrb[46].mxu0 }
 0x342   : > { %v1158_v41 = vpack.c.bf16 %v5851_v40, %v5850_v36  ;;  %v1139_v42 = vpop.f32.mrb[47].mxu0  ;;  %v6762_v36 = vld [vmem:[#allocation2 + $0xf8] sm:$0xff]  }
 0x343   : > { %v1157_v43 = vpack.c.bf16 %v1139_v42, %v1136_v37  ;;  %5883 = vmatpush3.bf16.msra.mxu0 %v7200_v52  ;;  %v7378_v37 = vpop.f32.mrb[16].mxu1 }
 0x344   : > { %5884 = vmatprep.subr.bf16.mxu0 %v7220_v3  ;;  %v7380_v40 = vpop.f32.mrb[17].mxu1 }
 0x345   : > { %5868 = vmatprep.mubr.msk.bf16.mxu0 %vm851_vm1, %v1157_v43 }
 0x346   : > { %5869 = vmatmul.mubr.msk.bf16.gmra.mrb[28].mxu0 %vm851_vm1, %v1158_v41  ;;  %v7382_v41 = vpop.f32.mrb[18].mxu1 }
 0x347   : > { %5885 = vmatpush3.bf16.msra.mxu0 %v7220_v3  ;;  %5888 = vmatprep.mubr.bf16.mxu0 %v6745_v44  ;;  %v7386_v43 = vpop.f32.mrb[19].mxu1 }
 0x348   : > { %5886 = vmatprep.subr.bf16.mxu0 %v7216_v2 }
 0x34b   : > { %5887 = vmatpush3.bf16.msra.mxu0 %v7216_v2 }
 0x34c   : > { %5904 = vmatprep.subr.bf16.mxu0 %v6746_v45 }
 0x34e   : > { %5889 = vmatmul.mubr.bf16.vlgmr.msra.gmra.mrb[48].mxu0 %v6747_v46 }
 0x34f   : > { %5905 = vmatpush3.bf16.msra.mxu0 %v6746_v45  ;;  %5892 = vmatprep.mubr.bf16.mxu0 %v6749_v47  ;;  %v7390_v45 = vpop.f32.mrb[20].mxu1 }
 0x350   : > { %5906 = vmatprep.subr.bf16.mxu0 %v6748_v48  ;;  %v7392_v46 = vpop.f32.mrb[21].mxu1 }
 0x351   : > { %v7394_v47 = vpop.f32.mrb[22].mxu1 }
 0x353   : > { %5907 = vmatpush3.bf16.msra.mxu0 %v6748_v48 }
 0x354   : > { %5924 = vmatprep.subr.bf16.mxu0 %v7172_v25 }
 0x356   : > { %5893 = vmatmul.mubr.bf16.gmra.mrb[52].mxu0 %v6750_v49  ;;  %v7398_v49 = vpop.f32.mrb[23].mxu1 }
 0x357   : > { %5896 = vmatprep.mubr.bf16.mxu0 %v6751_v50 }
 0x35e   : > { %5897 = vmatmul.mubr.bf16.gmra.mrb[56].mxu0 %v6752_v51  ;;  %v7402_v51 = vpop.f32.mrb[24].mxu1 }
 0x35f   : > { %5900 = vmatprep.mubr.bf16.mxu0 %v6753_v54  ;;  %v7404_v54 = vpop.f32.mrb[25].mxu1 }
 0x366   : > { %5901 = vmatmul.mubr.bf16.gmra.mrb[60].mxu0 %v6754_v55  ;;  %v7406_v55 = vpop.f32.mrb[26].mxu1 }
 0x367   : > { %v7410_v57 = vpop.f32.mrb[27].mxu1 }
 0x368   : > { %v7414_v59 = vpop.f32.mrb[28].mxu1 }
 0x369   : > { %v7416_v60 = vpop.f32.mrb[29].mxu1 }
 0x36a   : > { %v7418_v61 = vpop.f32.mrb[30].mxu1 }
 0x36b   : > { %v7422_v63 = vpop.f32.mrb[31].mxu1 }
 0x36c   : > { %v7426_v1 = vpop.f32.mrb[32].mxu1 }
 0x36d   : > { %v7428_v4 = vpop.f32.mrb[33].mxu1 }
 0x36e   : > { %v7430_v5 = vpop.f32.mrb[34].mxu1 }
 0x36f   : > { %v7434_v7 = vpop.f32.mrb[35].mxu1 }
 0x421   : > { %v5890_v8 = vpop.f32.mrb[48].mxu0 }
 0x422   : > { %v1412_v9 = vpop.f32.mrb[49].mxu0 }
 0x423   : > { %v5891_v10 = vpop.f32.mrb[50].mxu0 }
 0x424   : > { %v1476_v11 = vpack.c.bf16 %v5891_v10, %v5890_v8  ;;  %v1415_v12 = vpop.f32.mrb[51].mxu0 }
 0x425   : > { %v1475_v13 = vpack.c.bf16 %v1415_v12, %v1412_v9  ;;  %v7438_v9 = vpop.f32.mrb[36].mxu1 }
 0x426   : > { %v7440_v10 = vpop.f32.mrb[37].mxu1 }
 0x427   : > { %5908 = vmatprep.mubr.msk.bf16.mxu0 %vm851_vm1, %v1475_v13 }
 0x428   : > { %5909 = vmatmul.mubr.msk.bf16.vlgmr.msra.gmra.mrb[16].mxu0 %vm851_vm1, %v1476_v11  ;;  %v7442_v11 = vpop.f32.mrb[38].mxu1 }
 0x429   : > { %5925 = vmatpush3.bf16.msra.mxu0 %v7172_v25  ;;  %v5894_v14 = vpop.f32.mrb[52].mxu0  ;;  %v7446_v13 = vpop.f32.mrb[39].mxu1 }
 0x42a   : > { %5926 = vmatprep.subr.bf16.mxu0 %v7170_v24  ;;  %v1428_v15 = vpop.f32.mrb[53].mxu0 }
 0x42b   : > { %v5895_v16 = vpop.f32.mrb[54].mxu0 }
 0x42c   : > { %v1478_v17 = vpack.c.bf16 %v5895_v16, %v5894_v14  ;;  %v1431_v18 = vpop.f32.mrb[55].mxu0 }
 0x42d   : > { %v1477_v19 = vpack.c.bf16 %v1431_v18, %v1428_v15  ;;  %5927 = vmatpush3.bf16.msra.mxu0 %v7170_v24  ;;  %v7450_v15 = vpop.f32.mrb[40].mxu1 }
 0x42e   : > { %5928 = vmatprep.subr.bf16.mxu0 %v7188_v39  ;;  %v7452_v16 = vpop.f32.mrb[41].mxu1 }
 0x42f   : > { %5912 = vmatprep.mubr.msk.bf16.mxu0 %vm851_vm1, %v1477_v19 }
 0x430   : > { %5913 = vmatmul.mubr.msk.bf16.gmra.mrb[20].mxu0 %vm851_vm1, %v1478_v17  ;;  %v7454_v17 = vpop.f32.mrb[42].mxu1 }
 0x431   : > { %5929 = vmatpush3.bf16.msra.mxu0 %v7188_v39  ;;  %v5898_v20 = vpop.f32.mrb[56].mxu0  ;;  %v7458_v19 = vpop.f32.mrb[43].mxu1 }
 0x432   : > { %5930 = vmatprep.subr.bf16.mxu0 %v7184_v38  ;;  %v1444_v25 = vpop.f32.mrb[57].mxu0 }
 0x433   : > { %v5899_v21 = vpop.f32.mrb[58].mxu0 }
 0x434   : > { %v1480_v22 = vpack.c.bf16 %v5899_v21, %v5898_v20  ;;  %v1447_v23 = vpop.f32.mrb[59].mxu0 }
 0x435   : > { %v1479_v26 = vpack.c.bf16 %v1447_v23, %v1444_v25  ;;  %5931 = vmatpush3.bf16.msra.mxu0 %v7184_v38  ;;  %v6755_v38 = vld [vmem:[#allocation2 + $0xc0] sm:$0xff]   ;;  %v7462_v25 = vpop.f32.mrb[44].mxu1 }
 0x436   : > { %5932 = vmatprep.subr.bf16.mxu0 %v7204_v53  ;;  %v7464_v21 = vpop.f32.mrb[45].mxu1 }
 0x437   : > { %5916 = vmatprep.mubr.msk.bf16.mxu0 %vm851_vm1, %v1479_v26 }
 0x438   : > { %5917 = vmatmul.mubr.msk.bf16.gmra.mrb[24].mxu0 %vm851_vm1, %v1480_v22  ;;  %v7466_v22 = vpop.f32.mrb[46].mxu1 }
 0x439   : > { %5933 = vmatpush3.bf16.msra.mxu0 %v7204_v53  ;;  %v5902_v24 = vpop.f32.mrb[60].mxu0  ;;  %v6777_v53 = vld [vmem:[%s7128_s22 + $0x30] sm:$0xff]   ;;  %v7470_v26 = vpop.f32.mrb[47].mxu1 }
 0x43a   : > { %5934 = vmatprep.subr.bf16.mxu0 %v7200_v52  ;;  %v1460_v39 = vpop.f32.mrb[61].mxu0 }
 0x43b   : > { %v5903_v27 = vpop.f32.mrb[62].mxu0 }
 0x43c   : > { %v1482_v28 = vpack.c.bf16 %v5903_v27, %v5902_v24  ;;  %v1463_v29 = vpop.f32.mrb[63].mxu0 }
 0x43d   : > { %v1481_v30 = vpack.c.bf16 %v1463_v29, %v1460_v39  ;;  %5935 = vmatpush3.bf16.msra.mxu0 %v7200_v52  ;;  %v6758_v52 = vld [vmem:[#allocation2 + $0xd8] sm:$0xff]   ;;  %v7474_v39 = vpop.f32.mrb[48].mxu1 }
 0x43e   : > { %5936 = vmatprep.subr.bf16.mxu0 %v7220_v3  ;;  %v7476_v27 = vpop.f32.mrb[49].mxu1 }
 0x43f   : > { %5920 = vmatprep.mubr.msk.bf16.mxu0 %vm851_vm1, %v1481_v30 }
 0x440   : > { %5921 = vmatmul.mubr.msk.bf16.gmra.mrb[28].mxu0 %vm851_vm1, %v1482_v28  ;;  %v7478_v28 = vpop.f32.mrb[50].mxu1 }
 0x441   : > { %5937 = vmatpush3.bf16.msra.mxu0 %v7220_v3  ;;  %5940 = vmatprep.mubr.bf16.mxu0 %v6755_v38  ;;  %v6760_v3 = vld [vmem:[#allocation2 + $0xe8] sm:$0xff]   ;;  %v7482_v30 = vpop.f32.mrb[51].mxu1 }
 0x442   : > { %5938 = vmatprep.subr.bf16.mxu0 %v7216_v2 }
 0x445   : > { %5939 = vmatpush3.bf16.msra.mxu0 %v7216_v2  ;;  %v7375_v2 = vld [vmem:[%s7128_s22 + $0x40] sm:$0xff]  }
 0x446   : > { %5956 = vmatprep.subr.bf16.mxu0 %v6777_v53 }
 0x448   : > { %5941 = vmatmul.mubr.bf16.vlgmr.msra.gmra.mrb[64].mxu0 %v6756_v31 }
 0x449   : > { %5944 = vmatprep.mubr.bf16.mxu0 %v6757_v32  ;;  %5957 = vmatpush3.bf16.msra.mxu0 %v6777_v53  ;;  %v7486_v53 = vpop.f32.mrb[52].mxu1 }
 0x44a   : > { %5958 = vmatprep.subr.bf16.mxu0 %v6778_v33  ;;  %v7488_v31 = vpop.f32.mrb[53].mxu1 }
 0x44b   : > { %v7490_v32 = vpop.f32.mrb[54].mxu1 }
 0x44d   : > { %5959 = vmatpush3.bf16.msra.mxu0 %v6778_v33 }
 0x44e   : > { %6008 = vmatprep.subr.bf16.mxu0 %v7375_v2 }
 0x450   : > { %5945 = vmatmul.mubr.bf16.gmra.mrb[68].mxu0 %v6758_v52  ;;  %v7494_v52 = vpop.f32.mrb[55].mxu1 }
 0x451   : > { %5948 = vmatprep.mubr.bf16.mxu0 %v6759_v34 }
 0x458   : > { %5949 = vmatmul.mubr.bf16.gmra.mrb[72].mxu0 %v6760_v3  ;;  %v7498_v3 = vpop.f32.mrb[56].mxu1 }
 0x459   : > { %5952 = vmatprep.mubr.bf16.mxu0 %v6761_v35  ;;  %v7500_v35 = vpop.f32.mrb[57].mxu1 }
 0x460   : > { %5953 = vmatmul.mubr.bf16.gmra.mrb[76].mxu0 %v6762_v36  ;;  %v7502_v36 = vpop.f32.mrb[58].mxu1 }
 0x461   : > { %v7506_v38 = vpop.f32.mrb[59].mxu1 }
 0x462   : > { %v7510_v33 = vpop.f32.mrb[60].mxu1 }
 0x463   : > { %8078 = vst [vmem:[#allocation8_spill] sm:$0xff] %v7510_v33  ;;  %v7512_v24 = vpop.f32.mrb[61].mxu1 }
 0x464   : > { %v7514_v18 = vpop.f32.mrb[62].mxu1 }
 0x465   : > { %v7518_v20 = vpop.f32.mrb[63].mxu1 }
 0x466   : > { %v7522_v29 = vpop.f32.mrb[64].mxu1 }
 0x467   : > { %8079 = vst [vmem:[#allocation9_spill] sm:$0xff] %v7522_v29  ;;  %v7524_v14 = vpop.f32.mrb[65].mxu1  ;;  %v6780_v29 = vld [vmem:[%s7128_s22 + $0x48] sm:$0xff]  }
 0x468   : > { %8080 = vst [vmem:[#allocation10_spill] sm:$0xff] %v7524_v14  ;;  %v7526_v23 = vpop.f32.mrb[66].mxu1 }
 0x469   : > { %8081 = vst [vmem:[#allocation11_spill] sm:$0xff] %v7526_v23  ;;  %v7530_v62 = vpop.f32.mrb[67].mxu1 }
 0x46a   : > { %8082 = vst [vmem:[#allocation12_spill] sm:$0xff] %v7530_v62  ;;  %v7534_v56 = vpop.f32.mrb[68].mxu1 }
 0x46b   : > { %8083 = vst [vmem:[#allocation13_spill] sm:$0xff] %v7534_v56  ;;  %v7536_v58 = vpop.f32.mrb[69].mxu1 }
 0x46c   : > { %8084 = vst [vmem:[#allocation14_spill] sm:$0xff] %v7536_v58  ;;  %v7538_v42 = vpop.f32.mrb[70].mxu1 }
 0x46d   : > { %8085 = vst [vmem:[#allocation15_spill] sm:$0xff] %v7538_v42  ;;  %v7546_v23 = vpop.f32.mrb[71].mxu1 }
 0x46e   : > { %8086 = vst [vmem:[#allocation16_spill] sm:$0xff] %v7546_v23 }
 0x51b   : > { %v5942_v6 = vpop.f32.mrb[64].mxu0 }
 0x51c   : > { %v1736_v0 = vpop.f32.mrb[65].mxu0 }
 0x51d   : > { %v5943_v12 = vpop.f32.mrb[66].mxu0 }
 0x51e   : > { %v1800_v48 = vpack.c.bf16 %v5943_v12, %v5942_v6  ;;  %v1739_v50 = vpop.f32.mrb[67].mxu0  ;;  %v6781_v6 = vld [vmem:[%s7128_s22 + $0x50] sm:$0xff]  }
 0x51f   : > { %v1799_v44 = vpack.c.bf16 %v1739_v50, %v1736_v0  ;;  %v7551_v50 = vpop.f32.mrb[72].mxu1 }
 0x520   : > { %8087 = vst [vmem:[#allocation17_spill] sm:$0xff] %v7551_v50  ;;  %v7553_v8 = vpop.f32.mrb[73].mxu1 }
 0x521   : > { %5960 = vmatprep.mubr.msk.bf16.mxu0 %vm851_vm1, %v1799_v44  ;;  %8088 = vst [vmem:[#allocation18_spill] sm:$0xff] %v7553_v8  ;;  %v7555_v42 = vpop.f32.mrb[74].mxu1 }
 0x522   : > { %5961 = vmatmul.mubr.msk.bf16.vlgmr.msra.gmra.mrb[16].mxu0 %vm851_vm1, %v1800_v48  ;;  %8089 = vst [vmem:[#allocation19_spill] sm:$0xff] %v7555_v42  ;;  %v7561_v12 = vpop.f32.mrb[75].mxu1 }
 0x523   : > { %6009 = vmatpush3.bf16.msra.mxu0 %v7375_v2  ;;  %v5946_v34 = vpop.f32.mrb[68].mxu0  ;;  %8090 = vst [vmem:[#allocation20_spill] sm:$0xff] %v7561_v12 }
 0x524   : > { %v1752_v14 = vpop.f32.mrb[69].mxu0  ;;  %6010 = vmatprep.subr.bf16.mxu0 %v6780_v29 }
 0x525   : > { %v5947_v0 = vpop.f32.mrb[70].mxu0 }
 0x526   : > { %v1802_v56 = vpack.c.bf16 %v5947_v0, %v5946_v34  ;;  %v1755_v44 = vpop.f32.mrb[71].mxu0  ;;  %v7565_v34 = vpop.f32.mrb[76].mxu1 }
 0x527   : > { %v1801_v48 = vpack.c.bf16 %v1755_v44, %v1752_v14  ;;  %6011 = vmatpush3.bf16.msra.mxu0 %v6780_v29  ;;  %v7567_v62 = vpop.f32.mrb[77].mxu1 }
 0x528   : > { %6060 = vmatprep.subr.bf16.mxu0 %v6781_v6  ;;  %v7569_v29 = vpop.f32.mrb[78].mxu1 }
 0x529   : > { %5964 = vmatprep.mubr.msk.bf16.mxu0 %vm851_vm1, %v1801_v48  ;;  %v7575_v50 = vpop.f32.mrb[79].mxu1 }
 0x52a   : > { %5965 = vmatmul.mubr.msk.bf16.gmra.mrb[20].mxu0 %vm851_vm1, %v1802_v56  ;;  %v7579_v8 = vpop.f32.mrb[80].mxu1 }
 0x52b   : > { %v5950_v58 = vpop.f32.mrb[72].mxu0 }
 0x52c   : > { %v1768_v0 = vpop.f32.mrb[73].mxu0 }
 0x52d   : > { %v5951_v14 = vpop.f32.mrb[74].mxu0 }
 0x52e   : > { %v1804_v44 = vpack.c.bf16 %v5951_v14, %v5950_v58  ;;  %v1771_v2 = vpop.f32.mrb[75].mxu0  ;;  %v7581_v58 = vpop.f32.mrb[81].mxu1 }
 0x52f   : > { %v1803_v56 = vpack.c.bf16 %v1771_v2, %v1768_v0  ;;  %v7585_v0 = vpop.f32.mrb[82].mxu1 }
 0x530   : > { %v7593_v42 = vpop.f32.mrb[83].mxu1 }
 0x531   : > { %5968 = vmatprep.mubr.msk.bf16.mxu0 %vm851_vm1, %v1803_v56  ;;  %v3420_v56 = vpack.c.bf16 %v7585_v0, %v7579_v8 }
 0x532   : > { %5969 = vmatmul.mubr.msk.bf16.gmra.mrb[24].mxu0 %vm851_vm1, %v1804_v44  ;;  %v8091_v44 = vpack.c.bf16 %v7386_v43, %v7380_v40  ;;  %v8093_v40 = vpack.c.bf16 %v7398_v49, %v7392_v46  ;;  %v8094_v46 = vpack.c.bf16 %v7394_v47, %v7390_v45  ;;  %v8096_v47 = vpack.c.bf16 %v7406_v55, %v7402_v51 }
 0x533   : > { %v5954_v23 = vpop.f32.mrb[76].mxu0  ;;  %v8098_v55 = vpack.c.bf16 %v7418_v61, %v7414_v59  ;;  %v8100_v59 = vpack.c.bf16 %v7430_v5, %v7426_v1  ;;  %v8101_v61 = vpack.c.bf16 %v7446_v13, %v7440_v10  ;;  %v8102_v1 = vpack.c.bf16 %v7442_v11, %v7438_v9  ;;  %v6786_v13 = vld [vmem:[%s7128_s22 + $0x78] sm:$0xff]  }
 0x534   : > { %v1784_v12 = vpop.f32.mrb[77].mxu0  ;;  %v8103_v5 = vpack.c.bf16 %v7458_v19, %v7452_v16  ;;  %v8105_v10 = vpack.c.bf16 %v7470_v26, %v7464_v21  ;;  %v8106_v9 = vpack.c.bf16 %v7466_v22, %v7462_v25  ;;  %v8107_v11 = vpack.c.bf16 %v7482_v30, %v7476_v27  ;;  %v8114_v26 = vld [vmem:[#allocation8_spill] sm:$0xff] }
 0x535   : > { %v5955_v14 = vpop.f32.mrb[78].mxu0  ;;  %v8109_v16 = vpack.c.bf16 %v7494_v52, %v7488_v31  ;;  %v8110_v19 = vpack.c.bf16 %v7490_v32, %v7486_v53  ;;  %v8111_v25 = vpack.c.bf16 %v7506_v38, %v7500_v35  ;;  %v8112_v21 = vpack.c.bf16 %v7502_v36, %v7498_v3  ;;  %v8116_v27 = vld [vmem:[#allocation12_spill] sm:$0xff]  ;;  %v6788_v38 = vld [vmem:[%s7128_s22 + $0x88] sm:$0xff]  }
 0x536   : > { %v1806_v33 = vpack.c.bf16 %v5955_v14, %v5954_v23  ;;  %v1787_v48 = vpop.f32.mrb[79].mxu0  ;;  %v3419_v23 = vpack.c.bf16 %v7593_v42, %v7581_v58  ;;  %v6783_v14 = vld [vmem:[%s7128_s22 + $0x60] sm:$0xff]   ;;  %v8113_v22 = vpack.c.bf16 %v7518_v20, %v7512_v24  ;;  %v8119_v53 = vld [vmem:[#allocation11_spill] sm:$0xff]  ;;  %v8120_v31 = vld [vmem:[#allocation9_spill] sm:$0xff] }
 0x537   : > { %v1805_v2 = vpack.c.bf16 %v1787_v48, %v1784_v12  ;;  %v6782_v12 = vld [vmem:[%s7128_s22 + $0x58] sm:$0xff]   ;;  %v8092_v48 = vpack.c.bf16 %v7382_v41, %v7378_v37  ;;  %v8121_v32 = vpack.c.bf16 %v8119_v53, %v8120_v31  ;;  %v8122_v20 = vld [vmem:[#allocation16_spill] sm:$0xff]  ;;  %v8123_v24 = vld [vmem:[#allocation14_spill] sm:$0xff] }
 0x538   : > { %v8124_v52 = vpack.c.bf16 %v8122_v20, %v8123_v24  ;;  %v8126_v3 = vld [vmem:[#allocation13_spill] sm:$0xff]  ;;  %v8128_v36 = vld [vmem:[#allocation20_spill] sm:$0xff]  ;;  %v6800_v31 = vld [vmem:[%s7158_s16 + $0x58] sm:$0xff]  }
 0x539   : > { %5972 = vmatprep.mubr.msk.bf16.mxu0 %vm851_vm1, %v1805_v2  ;;  %v6801_v20 = vld [vmem:[%s7158_s16 + $0x60] sm:$0xff]  }
 0x53a   : > { %5973 = vmatmul.mubr.msk.bf16.gmra.mrb[28].mxu0 %vm851_vm1, %v1806_v33  ;;  %v7602_v33 = vpop.f32.mrb[84].mxu1 }
 0x53b   : > { %6012 = vmatprep.mubr.msk.bf16.mxu0 %vm851_vm1, %v8091_v44  ;;  %v7608_v43 = vpop.f32.mrb[85].mxu1 }
 0x53c   : > { %v7611_v2 = vpop.f32.mrb[86].mxu1 }
 0x53d   : > { %v7615_v37 = vpop.f32.mrb[87].mxu1 }
 0x53e   : > { %v3421_v41 = vpack.c.bf16 %v7615_v37, %v7608_v43  ;;  %v7623_v49 = vpop.f32.mrb[88].mxu1  ;;  %v6793_v43 = vld [vmem:[%s7158_s16 + $0x20] sm:$0xff]  }
 0x542   : > { %6013 = vmatmul.mubr.msk.bf16.vlgmr.msra.gmra.mrb[16].mxu0 %vm851_vm1, %v8092_v48  ;;  %v7629_v48 = vpop.f32.mrb[89].mxu1 }
 0x543   : > { %6061 = vmatpush3.bf16.msra.mxu0 %v6781_v6  ;;  %6016 = vmatprep.mubr.msk.bf16.mxu0 %vm851_vm1, %v8093_v40  ;;  %v8095_v6 = vpack.c.bf16 %v7410_v57, %v7404_v54  ;;  %v7631_v40 = vpop.f32.mrb[90].mxu1  ;;  %v8097_v57 = vpack.c.bf16 %v7422_v63, %v7416_v60  ;;  %v6789_v60 = vld [vmem:[%s7158_s16] sm:$0xff]   ;;  %v8099_v63 = vpack.c.bf16 %v7434_v7, %v7428_v4 }
 0x544   : > { %6062 = vmatprep.subr.bf16.mxu0 %v6782_v12  ;;  %v7635_v44 = vpop.f32.mrb[91].mxu1  ;;  %v6785_v4 = vld [vmem:[%s7128_s22 + $0x70] sm:$0xff]   ;;  %v8104_v7 = vpack.c.bf16 %v7454_v17, %v7450_v15  ;;  %v8108_v15 = vpack.c.bf16 %v7478_v28, %v7474_v39  ;;  %v6787_v17 = vld [vmem:[%s7128_s22 + $0x80] sm:$0xff]   ;;  %v8115_v39 = vpack.c.bf16 %v7514_v18, %v8114_v26  ;;  %v8125_v18 = vld [vmem:[#allocation15_spill] sm:$0xff]  ;;  %v8138_v8 = vpack.c.bf16 %v7631_v40, %v7623_v49 }
 0x545   : > { %v7643_v54 = vpop.f32.mrb[92].mxu1  ;;  %v8117_v28 = vld [vmem:[#allocation10_spill] sm:$0xff]  ;;  %v8127_v35 = vpack.c.bf16 %v8125_v18, %v8126_v3  ;;  %v8137_v42 = vpack.c.bf16 %v7635_v44, %v7629_v48  ;;  %v6794_v49 = vld [vmem:[%s7158_s16 + $0x28] sm:$0xff]  }
 0x546   : > { %v8118_v30 = vpack.c.bf16 %v8116_v27, %v8117_v28  ;;  %v6803_v18 = vld [vmem:[%s7158_s16 + $0x70] sm:$0xff]  }
 0x547   : > { %6063 = vmatpush3.bf16.msra.mxu0 %v6782_v12 }
 0x548   : > { %6112 = vmatprep.subr.bf16.mxu0 %v6783_v14 }
 0x54a   : > { %6017 = vmatmul.mubr.msk.bf16.gmra.mrb[20].mxu0 %vm851_vm1, %v8094_v46  ;;  %v7649_v46 = vpop.f32.mrb[93].mxu1 }
 0x54b   : > { %6020 = vmatprep.mubr.msk.bf16.mxu0 %vm851_vm1, %v8095_v6  ;;  %v7651_v6 = vpop.f32.mrb[94].mxu1 }
 0x54c   : > { %v3426_v12 = vpack.c.bf16 %v7651_v6, %v7643_v54  ;;  %v3407_v45 = vpop.f32.mrb[95].mxu1  ;;  %v6790_v54 = vld [vmem:[%s7158_s16 + $0x8] sm:$0xff]   ;;  %v8131_v6 = vld [vmem:[#allocation19_spill] sm:$0xff] }
 0x54d   : > { %v3425_v51 = vpack.c.bf16 %v3407_v45, %v7649_v46  ;;  %v6784_v45 = vld [vmem:[%s7128_s22 + $0x68] sm:$0xff]  }
 0x552   : > { %6021 = vmatmul.mubr.msk.bf16.gmra.mrb[24].mxu0 %vm851_vm1, %v8096_v47  ;;  %v6955_v47 = vmov 0.0  }
 0x553   : > { %6024 = vmatprep.mubr.msk.bf16.mxu0 %vm851_vm1, %v8097_v57  ;;  %6236 = vmatprep.subr.bf16.mxu1 %v6955_v47  ;;  %v6791_v57 = vld [vmem:[%s7158_s16 + $0x10] sm:$0xff]  }
 0x554   : > { %6237 = vmatpush3.bf16.msra.mxu1 %v6789_v60  ;;  %6244 = vmatprep.mubr.msk.bf16.mxu1 %vm6956_vm2, %v6955_v47 }
 0x555   : > { %6238 = vmatprep.subr.bf16.mxu1 %v6955_v47 }
 0x558   : > { %6239 = vmatpush3.bf16.msra.mxu1 %v6790_v54  ;;  %v8135_v54 = vpack.c.bf16 %v7569_v29, %v7565_v34  ;;  %v7802_v34 = vld [vmem:[%s428_s11] ss:$0 sm:$0xff] }
 0x559   : > { %6240 = vmatprep.subr.bf16.mxu1 %v6955_v47 }
 0x55a   : > { %6025 = vmatmul.mubr.msk.bf16.gmra.mrb[28].mxu0 %vm851_vm1, %v8098_v55  ;;  %v8132_v55 = vld [vmem:[#allocation17_spill] sm:$0xff] }
 0x55b   : > { %6064 = vmatprep.mubr.msk.bf16.mxu0 %vm851_vm1, %v8099_v63  ;;  %v8133_v60 = vpack.c.bf16 %v8131_v6, %v8132_v55  ;;  %v8134_v63 = vpack.c.bf16 %v7575_v50, %v7567_v62  ;;  %v8136_v62 = vpack.c.bf16 %v7611_v2, %v7602_v33  ;;  %v6792_v50 = vld [vmem:[%s7158_s16 + $0x18] sm:$0xff]   ;;  %v6806_v6 = vld [vmem:[%s7158_s16 + $0x88] sm:$0xff]   ;;  %v6807_v55 = vld [vmem:[%s7158_s16 + $0x90] sm:$0xff]  }
 0x55c   : > { %6241 = vmatpush3.bf16.msra.mxu1 %v6791_v57  ;;  %v6795_v57 = vld [vmem:[%s7158_s16 + $0x30] sm:$0xff]  }
 0x55d   : > { %6242 = vmatprep.subr.bf16.mxu1 %v6955_v47 }
 0x560   : > { %6243 = vmatpush3.bf16.msra.mxu1 %v6792_v50  ;;  %v6812_v50 = vld [vmem:[%s7158_s16 + $0xb8] sm:$0xff]  }
 0x561   : > { %6248 = vmatprep.subr.bf16.mxu1 %v6955_v47 }
 0x562   : > { %6065 = vmatmul.mubr.msk.bf16.vlgmr.msra.gmra.mrb[16].mxu0 %vm851_vm1, %v8100_v59 }
 0x563   : > { %6113 = vmatpush3.bf16.msra.mxu0 %v6783_v14  ;;  %6068 = vmatprep.mubr.msk.bf16.mxu0 %vm851_vm1, %v8101_v61  ;;  %v8129_v14 = vld [vmem:[#allocation18_spill] sm:$0xff] }
 0x564   : > { %6114 = vmatprep.subr.bf16.mxu0 %v6784_v45  ;;  %v8130_v46 = vpack.c.bf16 %v8128_v36, %v8129_v14  ;;  %v6805_v14 = vld [vmem:[%s7158_s16 + $0x80] sm:$0xff]  }
 0x567   : > { %6115 = vmatpush3.bf16.msra.mxu0 %v6784_v45 }
 0x568   : > { %6164 = vmatprep.subr.bf16.mxu0 %v6785_v4 }
 0x56a   : > { %6069 = vmatmul.mubr.msk.bf16.gmra.mrb[20].mxu0 %vm851_vm1, %v8102_v1 }
 0x56b   : > { %6072 = vmatprep.mubr.msk.bf16.mxu0 %vm851_vm1, %v8103_v5  ;;  %v6796_v5 = vld [vmem:[%s7158_s16 + $0x38] sm:$0xff]  }
 0x572   : > { %6073 = vmatmul.mubr.msk.bf16.gmra.mrb[24].mxu0 %vm851_vm1, %v8104_v7 }
 0x573   : > { %6076 = vmatprep.mubr.msk.bf16.mxu0 %vm851_vm1, %v8105_v10 }
 0x57a   : > { %6077 = vmatmul.mubr.msk.bf16.gmra.mrb[28].mxu0 %vm851_vm1, %v8106_v9 }
 0x57b   : > { %6116 = vmatprep.mubr.msk.bf16.mxu0 %vm851_vm1, %v8107_v11 }
 0x582   : > { %6117 = vmatmul.mubr.msk.bf16.vlgmr.msra.gmra.mrb[16].mxu0 %vm851_vm1, %v8108_v15 }
 0x583   : > { %6165 = vmatpush3.bf16.msra.mxu0 %v6785_v4  ;;  %6120 = vmatprep.mubr.msk.bf16.mxu0 %vm851_vm1, %v8109_v16  ;;  %v6797_v16 = vld [vmem:[%s7158_s16 + $0x40] sm:$0xff]  }
 0x584   : > { %6166 = vmatprep.subr.bf16.mxu0 %v6786_v13 }
 0x587   : > { %6167 = vmatpush3.bf16.msra.mxu0 %v6786_v13 }
 0x588   : > { %6216 = vmatprep.subr.bf16.mxu0 %v6787_v17 }
 0x58a   : > { %6121 = vmatmul.mubr.msk.bf16.gmra.mrb[20].mxu0 %vm851_vm1, %v8110_v19 }
 0x58b   : > { %6124 = vmatprep.mubr.msk.bf16.mxu0 %vm851_vm1, %v8111_v25 }
 0x592   : > { %6125 = vmatmul.mubr.msk.bf16.gmra.mrb[24].mxu0 %vm851_vm1, %v8112_v21 }
 0x593   : > { %6128 = vmatprep.mubr.msk.bf16.mxu0 %vm851_vm1, %v8113_v22  ;;  %v6798_v22 = vld [vmem:[%s7158_s16 + $0x48] sm:$0xff]  }
 0x59a   : > { %6129 = vmatmul.mubr.msk.bf16.gmra.mrb[28].mxu0 %vm851_vm1, %v8115_v39 }
 0x59b   : > { %6168 = vmatprep.mubr.msk.bf16.mxu0 %vm851_vm1, %v8118_v30 }
 0x5a2   : > { %6169 = vmatmul.mubr.msk.bf16.vlgmr.msra.gmra.mrb[16].mxu0 %vm851_vm1, %v8121_v32 }
 0x5a3   : > { %6217 = vmatpush3.bf16.msra.mxu0 %v6787_v17  ;;  %6172 = vmatprep.mubr.msk.bf16.mxu0 %vm851_vm1, %v8124_v52  ;;  %v6802_v52 = vld [vmem:[%s7158_s16 + $0x68] sm:$0xff]  }
 0x5a4   : > { %6218 = vmatprep.subr.bf16.mxu0 %v6788_v38 }
 0x5a7   : > { %6219 = vmatpush3.bf16.msra.mxu0 %v6788_v38  ;;  %v6799_v38 = vld [vmem:[%s7158_s16 + $0x50] sm:$0xff]  }
 0x5aa   : > { %6173 = vmatmul.mubr.msk.bf16.gmra.mrb[20].mxu0 %vm851_vm1, %v8127_v35  ;;  %v6804_v35 = vld [vmem:[%s7158_s16 + $0x78] sm:$0xff]  }
 0x5ab   : > { %6176 = vmatprep.mubr.msk.bf16.mxu0 %vm851_vm1, %v8130_v46 }
 0x5b2   : > { %6177 = vmatmul.mubr.msk.bf16.gmra.mrb[24].mxu0 %vm851_vm1, %v8133_v60  ;;  %v6808_v60 = vld [vmem:[%s7158_s16 + $0x98] sm:$0xff]  }
 0x5b3   : > { %6180 = vmatprep.mubr.msk.bf16.mxu0 %vm851_vm1, %v8134_v63 }
 0x5ba   : > { %6181 = vmatmul.mubr.msk.bf16.gmra.mrb[28].mxu0 %vm851_vm1, %v8135_v54  ;;  %v6809_v54 = vld [vmem:[%s7158_s16 + $0xa0] sm:$0xff]  }
 0x5bb   : > { %6220 = vmatprep.mubr.msk.bf16.mxu0 %vm851_vm1, %v3419_v23 }
 0x5c2   : > { %6221 = vmatmul.mubr.msk.bf16.vlgmr.msra.gmra.mrb[16].mxu0 %vm851_vm1, %v3420_v56 }
 0x5c3   : > { %6224 = vmatprep.mubr.msk.bf16.mxu0 %vm851_vm1, %v3421_v41 }
 0x5ca   : > { %6225 = vmatmul.mubr.msk.bf16.gmra.mrb[20].mxu0 %vm851_vm1, %v8136_v62 }
 0x5cb   : > { %6228 = vmatprep.mubr.msk.bf16.mxu0 %vm851_vm1, %v8137_v42  ;;  %v6810_v42 = vld [vmem:[%s7158_s16 + $0xa8] sm:$0xff]  }
 0x5d2   : > { %6229 = vmatmul.mubr.msk.bf16.gmra.mrb[24].mxu0 %vm851_vm1, %v8138_v8  ;;  %v6811_v8 = vld [vmem:[%s7158_s16 + $0xb0] sm:$0xff]  }
 0x5d3   : > { %6232 = vmatprep.mubr.msk.bf16.mxu0 %vm851_vm1, %v3425_v51 }
 0x5da   : > { %6233 = vmatmul.mubr.msk.bf16.gmra.mrb[28].mxu0 %vm851_vm1, %v3426_v12 }
 0x695   : > { %v6222_v29 = vpop.f32.mrb[16].mxu0 }
 0x696   : > { %v3502_v58 = vpop.f32.mrb[17].mxu0  ;;  %v6428_v53 = vadd.f32 %v6222_v29, %v7802_v34  ;;  %v6813_v29 = vld [vmem:[%s7158_s16 + $0xc0] sm:$0xff]  }
 0x697   : > { %v6429_v0 = vadd.f32 %v7802_v34, %v3502_v58  ;;  %v7805_v56 = vpop.f32.mrb[18].mxu0 }
 0x698   : > { %v3505_v23 = vpop.f32.mrb[19].mxu0  ;;  %v3583_v32 = vmax.f32 %v6428_v53, 0.0  ;;  %v6430_v3 = vadd.f32 %v7805_v56, %v7802_v34  ;;  %v6815_v56 = vld [vmem:[%s7158_s16 + $0xd0] sm:$0xff]   ;;  %v6837_v53 = vld [vmem:[%s7158_s16 + $0x180] sm:$0xff]  }
 0x699   : > { %v3581_v33 = vmax.f32 %v6429_v0, 0.0  ;;  %v6431_v59 = vadd.f32 %v7802_v34, %v3505_v23  ;;  %v6814_v0 = vld [vmem:[%s7158_s16 + $0xc8] sm:$0xff]   ;;  %v6816_v23 = vld [vmem:[%s7158_s16 + $0xd8] sm:$0xff]  }
 0x69a   : > { %v3760_v24 = vpack.c.bf16 %v3583_v32, %v3583_v32  ;;  %v3584_v36 = vmax.f32 %v6430_v3, 0.0  ;;  %v6838_v32 = vld [vmem:[%s7158_s16 + $0x188] sm:$0xff]  }
 0x69b   : > { %v3604_v2 = vpack.c.bf16 %v3581_v33, %v3581_v33  ;;  %v3582_v7 = vmax.f32 %v6431_v59, 0.0  ;;  %v6825_v59 = vld [vmem:[%s7158_s16 + $0x120] sm:$0xff]   ;;  %v6842_v3 = vld [vmem:[%s7158_s16 + $0x1a8] sm:$0xff]  }
 0x69c   : > { %v3838_v46 = vpack.c.bf16 %v3584_v36, %v3584_v36 }
 0x69d   : > { %v6226_v44 = vpop.f32.mrb[20].mxu0  ;;  %6245 = vmatmul.mubr.msk.bf16.vlgmr.msra.gmra.mrb[96].mxu1 %vm3637_vm3, %v3604_v2  ;;  %v3682_v17 = vpack.c.bf16 %v3582_v7, %v3582_v7  ;;  %v6828_v7 = vld [vmem:[%s7158_s16 + $0x138] sm:$0xff]  }
 0x69e   : > { %v7810_v37 = vadd.f32 %v6226_v44, %v7802_v34  ;;  %6249 = vmatpush3.bf16.msra.mxu1 %v6793_v43  ;;  %v3518_v41 = vpop.f32.mrb[21].mxu0  ;;  %6256 = vmatprep.mubr.msk.bf16.mxu1 %vm6956_vm2, %v6955_v47  ;;  %v6817_v43 = vld [vmem:[%s7158_s16 + $0xe0] sm:$0xff]   ;;  %v6818_v44 = vld [vmem:[%s7158_s16 + $0xe8] sm:$0xff]  }
 0x69f   : > { %v7816_v48 = vadd.f32 %v7802_v34, %v3518_v41  ;;  %v6227_v40 = vpop.f32.mrb[22].mxu0  ;;  %6250 = vmatprep.subr.bf16.mxu1 %v6955_v47  ;;  %v6820_v41 = vld [vmem:[%s7158_s16 + $0xf8] sm:$0xff]  }
 0x6a0   : > { %v7820_v12 = vadd.f32 %v6227_v40, %v7802_v34  ;;  %v3521_v51 = vpop.f32.mrb[23].mxu0  ;;  %v3587_v33 = vmax.f32 %v7810_v37, 0.0  ;;  %v6819_v37 = vld [vmem:[%s7158_s16 + $0xf0] sm:$0xff]  }
 0x6a1   : > { %v7823_v45 = vadd.f32 %v7802_v34, %v3521_v51  ;;  %v3585_v63 = vmax.f32 %v7816_v48, 0.0  ;;  %v6821_v48 = vld [vmem:[%s7158_s16 + $0x100] sm:$0xff]   ;;  %v6822_v51 = vld [vmem:[%s7158_s16 + $0x108] sm:$0xff]  }
 0x6a2   : > { %6251 = vmatpush3.bf16.msra.mxu1 %v6794_v49  ;;  %v4072_v2 = vpack.c.bf16 %v3587_v33, %v3587_v33  ;;  %v3588_v49 = vmax.f32 %v7820_v12, 0.0  ;;  %v6823_v12 = vld [vmem:[%s7158_s16 + $0x110] sm:$0xff]  }
 0x6a3   : > { %6252 = vmatprep.subr.bf16.mxu1 %v6955_v47  ;;  %v3916_v62 = vpack.c.bf16 %v3585_v63, %v3585_v63  ;;  %v6849_v63 = vld [vmem:[%s7158_s16 + $0x1e0] sm:$0xff]  }
 0x6a4   : > { %v4150_v40 = vpack.c.bf16 %v3588_v49, %v3588_v49 }
 0x6a5   : > { %v6230_v61 = vpop.f32.mrb[24].mxu0 }
 0x6a6   : > { %v7829_v4 = vadd.f32 %v6230_v61, %v7802_v34  ;;  %6253 = vmatpush3.bf16.msra.mxu1 %v6795_v57  ;;  %v3534_v1 = vpop.f32.mrb[25].mxu0 }
 0x6a7   : > { %v7833_v10 = vadd.f32 %v7802_v34, %v3534_v1  ;;  %v6231_v9 = vpop.f32.mrb[26].mxu0  ;;  %6254 = vmatprep.subr.bf16.mxu1 %v6955_v47  ;;  %v6826_v1 = vld [vmem:[%s7158_s16 + $0x128] sm:$0xff]  }
 0x6a8   : > { %v7837_v11 = vadd.f32 %v6231_v9, %v7802_v34  ;;  %v3537_v13 = vpop.f32.mrb[27].mxu0  ;;  %v6829_v9 = vld [vmem:[%s7158_s16 + $0x140] sm:$0xff]  }
 0x6a9   : > { %v7840_v15 = vadd.f32 %v7802_v34, %v3537_v13  ;;  %v3589_v57 = vmax.f32 %v7833_v10, 0.0 }
 0x6aa   : > { %6255 = vmatpush3.bf16.msra.mxu1 %v6796_v5  ;;  %v6827_v5 = vld [vmem:[%s7158_s16 + $0x130] sm:$0xff]  }
 0x6ab   : > { %6260 = vmatprep.subr.bf16.mxu1 %v6955_v47  ;;  %v4228_v61 = vpack.c.bf16 %v3589_v57, %v3589_v57  ;;  %v3590_v10 = vmax.f32 %v7840_v15, 0.0  ;;  %v6831_v15 = vld [vmem:[%s7158_s16 + $0x150] sm:$0xff]  }
 0x6ad   : > { %6257 = vmatmul.mubr.msk.bf16.vlgmr.msra.gmra.mrb[96].mxu1 %vm3637_vm3, %v3682_v17  ;;  %v6234_v19 = vpop.f32.mrb[28].mxu0  ;;  %v4306_v13 = vpack.c.bf16 %v3590_v10, %v3590_v10  ;;  %v6832_v17 = vld [vmem:[%s7158_s16 + $0x158] sm:$0xff]  }
 0x6ae   : > { %v7846_v25 = vadd.f32 %v6234_v19, %v7802_v34  ;;  %6261 = vmatpush3.bf16.msra.mxu1 %v6797_v16  ;;  %v3550_v21 = vpop.f32.mrb[29].mxu0  ;;  %6268 = vmatprep.mubr.msk.bf16.mxu1 %vm6956_vm2, %v6955_v47  ;;  %v6830_v16 = vld [vmem:[%s7158_s16 + $0x148] sm:$0xff]   ;;  %v3591_v19 = vmax.f32 %v7829_v4, 0.0  ;;  %v6835_v4 = vld [vmem:[%s7158_s16 + $0x170] sm:$0xff]  }
 0x6af   : > { %v7852_v26 = vadd.f32 %v7802_v34, %v3550_v21  ;;  %v6235_v39 = vpop.f32.mrb[30].mxu0  ;;  %6262 = vmatprep.subr.bf16.mxu1 %v6955_v47  ;;  %v6833_v21 = vld [vmem:[%s7158_s16 + $0x160] sm:$0xff]  }
 0x6b0   : > { %v7856_v27 = vadd.f32 %v6235_v39, %v7802_v34  ;;  %v3553_v28 = vpop.f32.mrb[31].mxu0  ;;  %v6834_v39 = vld [vmem:[%s7158_s16 + $0x168] sm:$0xff]  }
 0x6b1   : > { %v7859_v30 = vadd.f32 %v7802_v34, %v3553_v28  ;;  %v3586_v34 = vmax.f32 %v7823_v45, 0.0  ;;  %v6824_v45 = vld [vmem:[%s7158_s16 + $0x118] sm:$0xff]  }
 0x6b2   : > { %6263 = vmatpush3.bf16.msra.mxu1 %v6798_v22  ;;  %v4384_v22 = vpack.c.bf16 %v3591_v19, %v3591_v19  ;;  %v6836_v28 = vld [vmem:[%s7158_s16 + $0x178] sm:$0xff]  }
 0x6b3   : > { %6264 = vmatprep.subr.bf16.mxu1 %v6955_v47  ;;  %v3994_v58 = vpack.c.bf16 %v3586_v34, %v3586_v34  ;;  %v3594_v36 = vmax.f32 %v7859_v30, 0.0  ;;  %v6847_v30 = vld [vmem:[%s7158_s16 + $0x1d0] sm:$0xff]   ;;  %v5221_v34 = vld [vmem:[%s436_s13] ss:$0 sm:$0xff] }
 0x6b6   : > { %6265 = vmatpush3.bf16.msra.mxu1 %v6799_v38  ;;  %v3592_v38 = vmax.f32 %v7837_v11, 0.0  ;;  %v6839_v11 = vld [vmem:[%s7158_s16 + $0x190] sm:$0xff]  }
 0x6b7   : > { %6266 = vmatprep.subr.bf16.mxu1 %v6955_v47 }
 0x6ba   : > { %6267 = vmatpush3.bf16.msra.mxu1 %v6800_v31  ;;  %v4462_v31 = vpack.c.bf16 %v3592_v38, %v3592_v38 }
 0x6bb   : > { %6272 = vmatprep.subr.bf16.mxu1 %v6955_v47 }
 0x6bd   : > { %6269 = vmatmul.mubr.msk.bf16.vlgmr.msra.gmra.mrb[96].mxu1 %vm3637_vm3, %v3760_v24  ;;  %v3593_v24 = vmax.f32 %v7852_v26, 0.0  ;;  %v6843_v26 = vld [vmem:[%s7158_s16 + $0x1b0] sm:$0xff]  }
 0x6be   : > { %6273 = vmatpush3.bf16.msra.mxu1 %v6801_v20  ;;  %6280 = vmatprep.mubr.msk.bf16.mxu1 %vm6956_vm2, %v6955_v47  ;;  %v6840_v20 = vld [vmem:[%s7158_s16 + $0x198] sm:$0xff]  }
 0x6bf   : > { %6274 = vmatprep.subr.bf16.mxu1 %v6955_v47 }
 0x6c2   : > { %6275 = vmatpush3.bf16.msra.mxu1 %v6802_v52  ;;  %v6841_v52 = vld [vmem:[%s7158_s16 + $0x1a0] sm:$0xff]  }
 0x6c3   : > { %6276 = vmatprep.subr.bf16.mxu1 %v6955_v47 }
 0x6c6   : > { %6277 = vmatpush3.bf16.msra.mxu1 %v6803_v18  ;;  %v4540_v18 = vpack.c.bf16 %v3593_v24, %v3593_v24 }
 0x6c7   : > { %6278 = vmatprep.subr.bf16.mxu1 %v6955_v47 }
 0x6ca   : > { %6279 = vmatpush3.bf16.msra.mxu1 %v6804_v35  ;;  %v6844_v35 = vld [vmem:[%s7158_s16 + $0x1b8] sm:$0xff]  }
 0x6cb   : > { %6284 = vmatprep.subr.bf16.mxu1 %v6955_v47 }
 0x6cd   : > { %6281 = vmatmul.mubr.msk.bf16.vlgmr.msra.gmra.mrb[96].mxu1 %vm3637_vm3, %v3838_v46  ;;  %v4618_v46 = vpack.c.bf16 %v3594_v36, %v3594_v36 }
 0x6ce   : > { %6285 = vmatpush3.bf16.msra.mxu1 %v6805_v14  ;;  %6292 = vmatprep.mubr.msk.bf16.mxu1 %vm6956_vm2, %v6955_v47  ;;  %v6845_v14 = vld [vmem:[%s7158_s16 + $0x1c0] sm:$0xff]  }
 0x6cf   : > { %6286 = vmatprep.subr.bf16.mxu1 %v6955_v47 }
 0x6d2   : > { %6287 = vmatpush3.bf16.msra.mxu1 %v6806_v6  ;;  %v6846_v6 = vld [vmem:[%s7158_s16 + $0x1c8] sm:$0xff]  }
 0x6d3   : > { %6288 = vmatprep.subr.bf16.mxu1 %v6955_v47 }
 0x6d6   : > { %6289 = vmatpush3.bf16.msra.mxu1 %v6807_v55  ;;  %v6848_v55 = vld [vmem:[%s7158_s16 + $0x1d8] sm:$0xff]  }
 0x6d7   : > { %6290 = vmatprep.subr.bf16.mxu1 %v6955_v47 }
 0x6da   : > { %6291 = vmatpush3.bf16.msra.mxu1 %v6808_v60  ;;  %v3595_v60 = vmax.f32 %v7846_v25, 0.0  ;;  %v6851_v25 = vld [vmem:[%s7158_s16 + $0x1f0] sm:$0xff]  }
 0x6db   : > { %6296 = vmatprep.subr.bf16.mxu1 %v6955_v47 }
 0x6dd   : > { %6293 = vmatmul.mubr.msk.bf16.vlgmr.msra.gmra.mrb[96].mxu1 %vm3637_vm3, %v3916_v62  ;;  %v6850_v62 = vld [vmem:[%s7158_s16 + $0x1e8] sm:$0xff]  }
 0x6de   : > { %6297 = vmatpush3.bf16.msra.mxu1 %v6809_v54  ;;  %6304 = vmatprep.mubr.msk.bf16.mxu1 %vm6956_vm2, %v6955_v47  ;;  %v4696_v54 = vpack.c.bf16 %v3595_v60, %v3595_v60 }
 0x6df   : > { %6298 = vmatprep.subr.bf16.mxu1 %v6955_v47 }
 0x6e2   : > { %6299 = vmatpush3.bf16.msra.mxu1 %v6810_v42  ;;  %v6852_v42 = vld [vmem:[%s7158_s16 + $0x1f8] sm:$0xff]  }
 0x6e3   : > { %6300 = vmatprep.subr.bf16.mxu1 %v6955_v47 }
 0x6e6   : > { %6301 = vmatpush3.bf16.msra.mxu1 %v6811_v8  ;;  %v3596_v8 = vmax.f32 %v7856_v27, 0.0 }
 0x6e7   : > { %6302 = vmatprep.subr.bf16.mxu1 %v6955_v47 }
 0x6ea   : > { %6303 = vmatpush3.bf16.msra.mxu1 %v6812_v50  ;;  %v4774_v50 = vpack.c.bf16 %v3596_v8, %v3596_v8 }
 0x6eb   : > { %6308 = vmatprep.subr.bf16.mxu1 %v6955_v47 }
 0x6ed   : > { %6305 = vmatmul.mubr.msk.bf16.vlgmr.msra.gmra.mrb[96].mxu1 %vm3637_vm3, %v3994_v58 }
 0x6ee   : > { %6309 = vmatpush3.bf16.msra.mxu1 %v6813_v29  ;;  %6316 = vmatprep.mubr.msk.bf16.mxu1 %vm6956_vm2, %v6955_v47 }
 0x6ef   : > { %6310 = vmatprep.subr.bf16.mxu1 %v6955_v47 }
 0x6f2   : > { %6311 = vmatpush3.bf16.msra.mxu1 %v6814_v0 }
 0x6f3   : > { %6312 = vmatprep.subr.bf16.mxu1 %v6955_v47 }
 0x6f6   : > { %6313 = vmatpush3.bf16.msra.mxu1 %v6815_v56 }
 0x6f7   : > { %6314 = vmatprep.subr.bf16.mxu1 %v6955_v47 }
 0x6fa   : > { %6315 = vmatpush3.bf16.msra.mxu1 %v6816_v23 }
 0x6fb   : > { %6320 = vmatprep.subr.bf16.mxu1 %v6955_v47 }
 0x6fd   : > { %6317 = vmatmul.mubr.msk.bf16.vlgmr.msra.gmra.mrb[96].mxu1 %vm3637_vm3, %v4072_v2 }
 0x6fe   : > { %6321 = vmatpush3.bf16.msra.mxu1 %v6817_v43  ;;  %6328 = vmatprep.mubr.msk.bf16.mxu1 %vm6956_vm2, %v6955_v47 }
 0x6ff   : > { %6322 = vmatprep.subr.bf16.mxu1 %v6955_v47 }
 0x702   : > { %6323 = vmatpush3.bf16.msra.mxu1 %v6818_v44 }
 0x703   : > { %6324 = vmatprep.subr.bf16.mxu1 %v6955_v47 }
 0x706   : > { %6325 = vmatpush3.bf16.msra.mxu1 %v6819_v37 }
 0x707   : > { %6326 = vmatprep.subr.bf16.mxu1 %v6955_v47 }
 0x70a   : > { %6327 = vmatpush3.bf16.msra.mxu1 %v6820_v41 }
 0x70b   : > { %6332 = vmatprep.subr.bf16.mxu1 %v6955_v47 }
 0x70d   : > { %6329 = vmatmul.mubr.msk.bf16.vlgmr.msra.gmra.mrb[96].mxu1 %vm3637_vm3, %v4150_v40 }
 0x70e   : > { %6333 = vmatpush3.bf16.msra.mxu1 %v6821_v48  ;;  %6340 = vmatprep.mubr.msk.bf16.mxu1 %vm6956_vm2, %v6955_v47 }
 0x70f   : > { %6334 = vmatprep.subr.bf16.mxu1 %v6955_v47 }
 0x712   : > { %6335 = vmatpush3.bf16.msra.mxu1 %v6822_v51 }
 0x713   : > { %6336 = vmatprep.subr.bf16.mxu1 %v6955_v47 }
 0x716   : > { %6337 = vmatpush3.bf16.msra.mxu1 %v6823_v12 }
 0x717   : > { %6338 = vmatprep.subr.bf16.mxu1 %v6955_v47 }
 0x71a   : > { %6339 = vmatpush3.bf16.msra.mxu1 %v6824_v45 }
 0x71b   : > { %6344 = vmatprep.subr.bf16.mxu1 %v6955_v47 }
 0x71d   : > { %6341 = vmatmul.mubr.msk.bf16.vlgmr.msra.gmra.mrb[96].mxu1 %vm3637_vm3, %v4228_v61 }
 0x71e   : > { %6345 = vmatpush3.bf16.msra.mxu1 %v6825_v59  ;;  %6352 = vmatprep.mubr.msk.bf16.mxu1 %vm6956_vm2, %v6955_v47 }
 0x71f   : > { %6346 = vmatprep.subr.bf16.mxu1 %v6955_v47 }
 0x722   : > { %6347 = vmatpush3.bf16.msra.mxu1 %v6826_v1 }
 0x723   : > { %6348 = vmatprep.subr.bf16.mxu1 %v6955_v47 }
 0x726   : > { %6349 = vmatpush3.bf16.msra.mxu1 %v6827_v5 }
 0x727   : > { %6350 = vmatprep.subr.bf16.mxu1 %v6955_v47 }
 0x72a   : > { %6351 = vmatpush3.bf16.msra.mxu1 %v6828_v7 }
 0x72b   : > { %6356 = vmatprep.subr.bf16.mxu1 %v6955_v47 }
 0x72d   : > { %6353 = vmatmul.mubr.msk.bf16.vlgmr.msra.gmra.mrb[96].mxu1 %vm3637_vm3, %v4306_v13 }
 0x72e   : > { %6357 = vmatpush3.bf16.msra.mxu1 %v6829_v9  ;;  %6364 = vmatprep.mubr.msk.bf16.mxu1 %vm6956_vm2, %v6955_v47 }
 0x72f   : > { %6358 = vmatprep.subr.bf16.mxu1 %v6955_v47 }
 0x732   : > { %6359 = vmatpush3.bf16.msra.mxu1 %v6830_v16 }
 0x733   : > { %6360 = vmatprep.subr.bf16.mxu1 %v6955_v47 }
 0x736   : > { %6361 = vmatpush3.bf16.msra.mxu1 %v6831_v15 }
 0x737   : > { %6362 = vmatprep.subr.bf16.mxu1 %v6955_v47 }
 0x73a   : > { %6363 = vmatpush3.bf16.msra.mxu1 %v6832_v17 }
 0x73b   : > { %6368 = vmatprep.subr.bf16.mxu1 %v6955_v47 }
 0x73d   : > { %6365 = vmatmul.mubr.msk.bf16.vlgmr.msra.gmra.mrb[96].mxu1 %vm3637_vm3, %v4384_v22 }
 0x73e   : > { %6369 = vmatpush3.bf16.msra.mxu1 %v6833_v21  ;;  %6376 = vmatprep.mubr.msk.bf16.mxu1 %vm6956_vm2, %v6955_v47 }
 0x73f   : > { %6370 = vmatprep.subr.bf16.mxu1 %v6955_v47 }
 0x742   : > { %6371 = vmatpush3.bf16.msra.mxu1 %v6834_v39 }
 0x743   : > { %6372 = vmatprep.subr.bf16.mxu1 %v6955_v47 }
 0x746   : > { %6373 = vmatpush3.bf16.msra.mxu1 %v6835_v4 }
 0x747   : > { %6374 = vmatprep.subr.bf16.mxu1 %v6955_v47 }
 0x74a   : > { %6375 = vmatpush3.bf16.msra.mxu1 %v6836_v28 }
 0x74b   : > { %6380 = vmatprep.subr.bf16.mxu1 %v6955_v47 }
 0x74d   : > { %6377 = vmatmul.mubr.msk.bf16.vlgmr.msra.gmra.mrb[96].mxu1 %vm3637_vm3, %v4462_v31 }
 0x74e   : > { %6381 = vmatpush3.bf16.msra.mxu1 %v6837_v53  ;;  %6388 = vmatprep.mubr.msk.bf16.mxu1 %vm6956_vm2, %v6955_v47 }
 0x74f   : > { %6382 = vmatprep.subr.bf16.mxu1 %v6955_v47 }
 0x752   : > { %6383 = vmatpush3.bf16.msra.mxu1 %v6838_v32 }
 0x753   : > { %6384 = vmatprep.subr.bf16.mxu1 %v6955_v47 }
 0x756   : > { %6385 = vmatpush3.bf16.msra.mxu1 %v6839_v11 }
 0x757   : > { %6386 = vmatprep.subr.bf16.mxu1 %v6955_v47 }
 0x75a   : > { %6387 = vmatpush3.bf16.msra.mxu1 %v6840_v20 }
 0x75b   : > { %6392 = vmatprep.subr.bf16.mxu1 %v6955_v47 }
 0x75d   : > { %6389 = vmatmul.mubr.msk.bf16.vlgmr.msra.gmra.mrb[96].mxu1 %vm3637_vm3, %v4540_v18 }
 0x75e   : > { %6393 = vmatpush3.bf16.msra.mxu1 %v6841_v52  ;;  %6400 = vmatprep.mubr.msk.bf16.mxu1 %vm6956_vm2, %v6955_v47 }
 0x75f   : > { %6394 = vmatprep.subr.bf16.mxu1 %v6955_v47 }
 0x762   : > { %6395 = vmatpush3.bf16.msra.mxu1 %v6842_v3 }
 0x763   : > { %6396 = vmatprep.subr.bf16.mxu1 %v6955_v47 }
 0x766   : > { %6397 = vmatpush3.bf16.msra.mxu1 %v6843_v26 }
 0x767   : > { %6398 = vmatprep.subr.bf16.mxu1 %v6955_v47 }
 0x76a   : > { %6399 = vmatpush3.bf16.msra.mxu1 %v6844_v35 }
 0x76b   : > { %6404 = vmatprep.subr.bf16.mxu1 %v6955_v47 }
 0x76d   : > { %6401 = vmatmul.mubr.msk.bf16.vlgmr.msra.gmra.mrb[96].mxu1 %vm3637_vm3, %v4618_v46 }
 0x76e   : > { %6405 = vmatpush3.bf16.msra.mxu1 %v6845_v14  ;;  %6412 = vmatprep.mubr.msk.bf16.mxu1 %vm6956_vm2, %v6955_v47 }
 0x76f   : > { %6406 = vmatprep.subr.bf16.mxu1 %v6955_v47 }
 0x772   : > { %6407 = vmatpush3.bf16.msra.mxu1 %v6846_v6 }
 0x773   : > { %6408 = vmatprep.subr.bf16.mxu1 %v6955_v47 }
 0x776   : > { %6409 = vmatpush3.bf16.msra.mxu1 %v6847_v30 }
 0x777   : > { %6410 = vmatprep.subr.bf16.mxu1 %v6955_v47 }
 0x77a   : > { %6411 = vmatpush3.bf16.msra.mxu1 %v6848_v55 }
 0x77b   : > { %6416 = vmatprep.subr.bf16.mxu1 %v6955_v47 }
 0x77d   : > { %6413 = vmatmul.mubr.msk.bf16.vlgmr.msra.gmra.mrb[96].mxu1 %vm3637_vm3, %v4696_v54 }
 0x77e   : > { %6417 = vmatpush3.bf16.msra.mxu1 %v6849_v63  ;;  %6424 = vmatprep.mubr.msk.bf16.mxu1 %vm6956_vm2, %v6955_v47 }
 0x77f   : > { %6418 = vmatprep.subr.bf16.mxu1 %v6955_v47 }
 0x782   : > { %6419 = vmatpush3.bf16.msra.mxu1 %v6850_v62 }
 0x783   : > { %6420 = vmatprep.subr.bf16.mxu1 %v6955_v47 }
 0x786   : > { %6421 = vmatpush3.bf16.msra.mxu1 %v6851_v25 }
 0x787   : > { %6422 = vmatprep.subr.bf16.mxu1 %v6955_v47 }
 0x78a   : > { %6423 = vmatpush3.bf16.msra.mxu1 %v6852_v42 }
 0x78d   : > { %6425 = vmatmul.mubr.msk.bf16.vlgmr.msra.gmra.mrb[96].mxu1 %vm3637_vm3, %v4774_v50 }
 0x860   : > { %v4845_v29 = vpop.f32.mrb[96].mxu1 }
 0x861   : > { %v6444_v58 = vadd.f32 %v5221_v34, %v4845_v29  ;;  %v6426_v0 = vpop.f32.mrb[97].mxu1 }
 0x862   : > { %v4848_v27 = vpop.f32.mrb[98].mxu1 }
 0x863   : > { %v4852_v56 = vmax.f32 %v6444_v58, 0.0  ;;  %v6427_v47 = vpop.f32.mrb[99].mxu1 }
 0x865   : > { %4853 = vst [vmem:[%s440_s24] sm:$0x3] %v4852_v56 }
 0x866 PF: > { %p19_p1 = scmp.ge.s32.totalorder %s7046_s15, 4   ;;  %s8139_s27 = smov %s6941_s28 }
 0x867   : > { %s8140_s28 = smov %s6945_s29  ;;  %s8141_s29 = smov %s7075_s19 }
 0x868   : > { %s8142_s30 = smov %s7046_s15  ;;  %21 = sbr.rel (!%p19_p1) target bundleno = 4 (0x4), region = 146 }
 0x86f   :  { %4873 = vsyncpa [#allocation3], 1 }
 0x870   :  { %4875 = vsyncpa [#allocation3 + $0x1], 1 }
 0x871   :  { %4876 = vsyncpa [#allocation5], 1 }
 0x872   :  { %4878 = vsyncpa [#allocation5 + $0x1], 1 }

</bundles_post_ra>
